<compile_context>
chip_gen: v5e
topology: v5e:2x2
jax: 0.10.0
libtpu: 0.0.40
codegen_flags: <defaults>
</compile_context>

<pallas_src>
import jax
import jax.numpy as jnp
import numpy as np
from jax.experimental import pallas as pl
from jax.experimental.pallas import tpu as pltpu


def _upsample_kernel(x_ref, w_ref, b_ref, out_ref):
    # x_ref:   (TH+2, W+2, C)   zero-padded NHWC row-tile (2-row / 2-col halo)
    # w_ref:   (2, 2, 4*C, C)   fused sub-pixel weights [py, px, (2*dy+dx)*C+ci, co]
    # b_ref:   (1, C)           bias
    # out_ref: (2, 2, TH*W, C)  sub-pixel output [py, px, i*W+j, co]
    TH = x_ref.shape[0] - 2
    W = x_ref.shape[1] - 2
    C = x_ref.shape[2]

    b = b_ref[...]                                             # (1, C)
    for py in range(2):
        for px in range(2):
            # Fused K=4C window: concat the 4 shifted taps along channels,
            # reading each window directly from the input ref.
            xwin = jnp.concatenate(
                [x_ref[py + dy:py + dy + TH, px + dx:px + dx + W, :]
                 for dy in range(2) for dx in range(2)],
                axis=-1)                                       # (TH, W, 4C)
            acc = jnp.dot(xwin.reshape(TH * W, 4 * C), w_ref[py, px],
                          preferred_element_type=jnp.float32)  # (TH*W, C)
            out_ref[py, px] = (acc + b).astype(out_ref.dtype)


def _pick_tile_rows(H, W, C, itemsize=4, budget_bytes=2 << 20):
    """Largest divisor of H whose double-buffered block footprint fits budget."""
    for th in range(H, 0, -1):
        if H % th:
            continue
        in_bytes = (th + 2) * (W + 2) * C * itemsize
        out_bytes = 4 * th * W * C * itemsize
        if 2 * (in_bytes + out_bytes) <= budget_bytes:
            return th
    return 1


def upsample_conv_transpose(x_nchw, weight, bias, tile_rows=None):
    """ConvTranspose2d(C, C, (4,4), stride (2,2), padding (1,1)) — NCHW in/out."""
    N, C, H, W = x_nchw.shape
    Ci, Co, KH, KW = weight.shape
    assert (Ci, KH, KW) == (C, 4, 4)

    TH = tile_rows if tile_rows is not None else _pick_tile_rows(
        H, W, C, jnp.dtype(x_nchw.dtype).itemsize)
    assert H % TH == 0, (H, TH)
    nH = H // TH

    # NCHW -> NHWC, zero-pad spatially by 1, gather overlapped row tiles with a
    # 2-row halo.  XLA fuses these into one pass over the (4x smaller) input.
    x = jnp.transpose(x_nchw, (0, 2, 3, 1))                    # (N, H, W, C)
    xpad = jnp.pad(x, ((0, 0), (1, 1), (1, 1), (0, 0)))        # (N, H+2, W+2, C)
    rows = jnp.arange(nH)[:, None] * TH + jnp.arange(TH + 2)[None, :]
    x_tiles = xpad[:, rows]                                    # (N, nH, TH+2, W+2, C)

    # Fused sub-pixel weights:
    #   w2[py, px, (2*dy+dx)*C + ci, co] = weight[ci, co, 3-py-2dy, 3-px-2dx]
    w2 = jnp.stack([
        jnp.stack([
            jnp.concatenate([weight[:, :, 3 - py - 2 * dy, 3 - px - 2 * dx]
                             for dy in range(2) for dx in range(2)], axis=0)
            for px in range(2)], axis=0)
        for py in range(2)], axis=0)                           # (2, 2, 4C, Co)
    b2 = bias.reshape(1, Co)

    out_sub = pl.pallas_call(
        _upsample_kernel,
        out_shape=jax.ShapeDtypeStruct((N, nH, 2, 2, TH * W, Co), x.dtype),
        grid_spec=pltpu.PrefetchScalarGridSpec(
            num_scalar_prefetch=0,
            grid=(N, nH),
            in_specs=[
                pl.BlockSpec((None, None, TH + 2, W + 2, C),
                             lambda n, h: (n, h, 0, 0, 0)),
                pl.BlockSpec((2, 2, 4 * C, Co), lambda n, h: (0, 0, 0, 0)),
                pl.BlockSpec((1, Co), lambda n, h: (0, 0)),
            ],
            out_specs=pl.BlockSpec((None, None, 2, 2, TH * W, Co),
                                   lambda n, h: (n, h, 0, 0, 0, 0)),
        ),
        compiler_params=pltpu.CompilerParams(
            dimension_semantics=("parallel", "parallel")),
    )(x_tiles, w2, b2)

    # Single fused relayout to the module's NCHW contract:
    # (n, h, py, px, i*W+j, c) -> (n, c, 2*(h*TH+i)+py, 2*j+px)
    y = out_sub.reshape(N, nH, 2, 2, TH, W, Co)
    y = jnp.transpose(y, (0, 6, 1, 4, 2, 5, 3))                # (N, C, nH, TH, 2, W, 2)
    return y.reshape(N, Co, 2 * H, 2 * W)


def _ref_conv_transpose(x_nchw, weight, bias):
    """Pure-XLA reference for PyTorch ConvTranspose2d(k=4, s=2, p=1)."""
    w_flip = jnp.transpose(weight[:, :, ::-1, ::-1], (1, 0, 2, 3))  # (Co, Ci, kh, kw)
    y = jax.lax.conv_general_dilated(
        x_nchw, w_flip,
        window_strides=(1, 1),
        padding=[(2, 2), (2, 2)],          # k - 1 - p = 2
        lhs_dilation=(2, 2),               # stride of the transposed conv
        dimension_numbers=("NCHW", "OIHW", "NCHW"),
        precision=jax.lax.Precision.HIGHEST,
    )
    return y + bias[None, :, None, None]


if __name__ == "__main__":
    key = jax.random.PRNGKey(0)
    N, C, H, W = 2, 4, 16, 16
    kx, kw, kb = jax.random.split(key, 3)

    x = jax.random.normal(kx, (N, C, H, W), dtype=jnp.float32)
    # ConvTranspose2d weight shape: (in_channels, out_channels, kH, kW); deterministic init.
    bound = 1.0 / np.sqrt(C * 4 * 4)
    weight = jax.random.uniform(kw, (C, C, 4, 4), jnp.float32, -bound, bound)
    bias = jax.random.uniform(kb, (C,), jnp.float32, -bound, bound)

    y_ref = jax.block_until_ready(_ref_conv_transpose(x, weight, bias))

    # Auto-picked row tile (whole image at this small size).
    y0 = jax.block_until_ready(upsample_conv_transpose(x, weight, bias))
    assert y0.shape == (N, C, 2 * H, 2 * W), y0.shape
    np.testing.assert_allclose(np.asarray(y0), np.asarray(y_ref), rtol=5e-3, atol=5e-3)

    # Explicit row tiling (H=16 -> 2 tiles of 8 rows) to exercise the tiled path.
    y1 = jax.block_until_ready(upsample_conv_transpose(x, weight, bias, tile_rows=8))
    np.testing.assert_allclose(np.asarray(y1), np.asarray(y_ref), rtol=5e-3, atol=5e-3)

    print("KERNEL_OK")
</pallas_src>

<mosaic_0001>
module attributes {stable_mosaic.version = 11 : i64} {
  func.func @_upsample_kernel(%arg0: i32, %arg1: i32, %arg2: memref<1x1x18x18x4xf32, #tpu.memory_space<vmem>>, %arg3: memref<2x2x16x4xf32, #tpu.memory_space<vmem>>, %arg4: memref<1x4xf32, #tpu.memory_space<vmem>>, %arg5: memref<1x1x2x2x256x4xf32, #tpu.memory_space<vmem>>) attributes {dimension_semantics = [#tpu.dimension_semantics<parallel>, #tpu.dimension_semantics<parallel>], iteration_bounds = array<i64: 2, 1>, scalar_prefetch = 0 : i64, scratch_operands = 0 : i64, tpu.core_type = #tpu.core_type<tc>, window_params = [{transform_indices = @transform_0, window_bounds = array<i64: 1, 1, 18, 18, 4>}, {pipeline_mode = #tpu.pipeline_mode<synchronous>, transform_indices = @transform_1, window_bounds = array<i64: 2, 2, 16, 4>}, {pipeline_mode = #tpu.pipeline_mode<synchronous>, transform_indices = @transform_2, window_bounds = array<i64: 1, 4>}, {transform_indices = @transform_3, window_bounds = array<i64: 1, 1, 2, 2, 256, 4>}]} {
    %c0 = arith.constant 0 : index
    %c0_0 = arith.constant 0 : index
    %0 = vector.load %arg4[%c0, %c0_0] : memref<1x4xf32, #tpu.memory_space<vmem>>, vector<1x4xf32>
    %c0_1 = arith.constant 0 : index
    %c0_2 = arith.constant 0 : index
    %c0_3 = arith.constant 0 : index
    %c0_4 = arith.constant 0 : index
    %c0_5 = arith.constant 0 : index
    %1 = vector.load %arg2[%c0_1, %c0_2, %c0_3, %c0_4, %c0_5] : memref<1x1x18x18x4xf32, #tpu.memory_space<vmem>>, vector<1x1x16x16x4xf32>
    %2 = vector.shape_cast %1 : vector<1x1x16x16x4xf32> to vector<16x16x4xf32>
    %c0_6 = arith.constant 0 : index
    %c0_7 = arith.constant 0 : index
    %c0_8 = arith.constant 0 : index
    %c1 = arith.constant 1 : index
    %c0_9 = arith.constant 0 : index
    %3 = vector.load %arg2[%c0_6, %c0_7, %c0_8, %c1, %c0_9] : memref<1x1x18x18x4xf32, #tpu.memory_space<vmem>>, vector<1x1x16x16x4xf32>
    %4 = vector.shape_cast %3 : vector<1x1x16x16x4xf32> to vector<16x16x4xf32>
    %c0_10 = arith.constant 0 : index
    %c0_11 = arith.constant 0 : index
    %c1_12 = arith.constant 1 : index
    %c0_13 = arith.constant 0 : index
    %c0_14 = arith.constant 0 : index
    %5 = vector.load %arg2[%c0_10, %c0_11, %c1_12, %c0_13, %c0_14] : memref<1x1x18x18x4xf32, #tpu.memory_space<vmem>>, vector<1x1x16x16x4xf32>
    %6 = vector.shape_cast %5 : vector<1x1x16x16x4xf32> to vector<16x16x4xf32>
    %c0_15 = arith.constant 0 : index
    %c0_16 = arith.constant 0 : index
    %c1_17 = arith.constant 1 : index
    %c1_18 = arith.constant 1 : index
    %c0_19 = arith.constant 0 : index
    %7 = vector.load %arg2[%c0_15, %c0_16, %c1_17, %c1_18, %c0_19] : memref<1x1x18x18x4xf32, #tpu.memory_space<vmem>>, vector<1x1x16x16x4xf32>
    %8 = vector.shape_cast %7 : vector<1x1x16x16x4xf32> to vector<16x16x4xf32>
    %9 = tpu.concatenate %2, %4, %6, %8 in 2 : vector<16x16x4xf32>, vector<16x16x4xf32>, vector<16x16x4xf32>, vector<16x16x4xf32> -> vector<16x16x16xf32>
    %10 = vector.shape_cast %9 : vector<16x16x16xf32> to vector<256x16xf32>
    %c0_20 = arith.constant 0 : index
    %c0_21 = arith.constant 0 : index
    %c0_22 = arith.constant 0 : index
    %c0_23 = arith.constant 0 : index
    %11 = vector.load %arg3[%c0_20, %c0_21, %c0_22, %c0_23] : memref<2x2x16x4xf32, #tpu.memory_space<vmem>>, vector<1x1x16x4xf32>
    %12 = vector.shape_cast %11 : vector<1x1x16x4xf32> to vector<16x4xf32>
    %cst = arith.constant dense<0.000000e+00> : vector<256x4xf32>
    %13 = tpu.matmul %10, %12, %cst {dimension_numbers = #tpu.dot_dimension_numbers<[1], [0], [0], [1], [0, 0, 1, 1], [], []>} : vector<256x16xf32>, vector<16x4xf32>, vector<256x4xf32> -> vector<256x4xf32>
    %14 = vector.broadcast %0 : vector<1x4xf32> to vector<256x4xf32>
    %15 = arith.addf %13, %14 : vector<256x4xf32>
    %c0_24 = arith.constant 0 : index
    %c0_25 = arith.constant 0 : index
    %c0_26 = arith.constant 0 : index
    %c0_27 = arith.constant 0 : index
    %c0_28 = arith.constant 0 : index
    %c0_29 = arith.constant 0 : index
    %16 = vector.load %arg5[%c0_24, %c0_25, %c0_26, %c0_27, %c0_28, %c0_29] : memref<1x1x2x2x256x4xf32, #tpu.memory_space<vmem>>, vector<1x1x1x1x256x4xf32>
    %17 = vector.shape_cast %16 : vector<1x1x1x1x256x4xf32> to vector<256x4xf32>
    %18 = vector.shape_cast %15 : vector<256x4xf32> to vector<1x1x1x1x256x4xf32>
    tpu.vector_store %arg5[%c0_24, %c0_25, %c0_26, %c0_27, %c0_28, %c0_29], %18 {strides = array<i32>} : memref<1x1x2x2x256x4xf32, #tpu.memory_space<vmem>>, vector<1x1x1x1x256x4xf32>,
    %c0_30 = arith.constant 0 : index
    %c0_31 = arith.constant 0 : index
    %c0_32 = arith.constant 0 : index
    %c1_33 = arith.constant 1 : index
    %c0_34 = arith.constant 0 : index
    %19 = vector.load %arg2[%c0_30, %c0_31, %c0_32, %c1_33, %c0_34] : memref<1x1x18x18x4xf32, #tpu.memory_space<vmem>>, vector<1x1x16x16x4xf32>
    %20 = vector.shape_cast %19 : vector<1x1x16x16x4xf32> to vector<16x16x4xf32>
    %c0_35 = arith.constant 0 : index
    %c0_36 = arith.constant 0 : index
    %c0_37 = arith.constant 0 : index
    %c2 = arith.constant 2 : index
    %c0_38 = arith.constant 0 : index
    %21 = vector.load %arg2[%c0_35, %c0_36, %c0_37, %c2, %c0_38] : memref<1x1x18x18x4xf32, #tpu.memory_space<vmem>>, vector<1x1x16x16x4xf32>
    %22 = vector.shape_cast %21 : vector<1x1x16x16x4xf32> to vector<16x16x4xf32>
    %c0_39 = arith.constant 0 : index
    %c0_40 = arith.constant 0 : index
    %c1_41 = arith.constant 1 : index
    %c1_42 = arith.constant 1 : index
    %c0_43 = arith.constant 0 : index
    %23 = vector.load %arg2[%c0_39, %c0_40, %c1_41, %c1_42, %c0_43] : memref<1x1x18x18x4xf32, #tpu.memory_space<vmem>>, vector<1x1x16x16x4xf32>
    %24 = vector.shape_cast %23 : vector<1x1x16x16x4xf32> to vector<16x16x4xf32>
    %c0_44 = arith.constant 0 : index
    %c0_45 = arith.constant 0 : index
    %c1_46 = arith.constant 1 : index
    %c2_47 = arith.constant 2 : index
    %c0_48 = arith.constant 0 : index
    %25 = vector.load %arg2[%c0_44, %c0_45, %c1_46, %c2_47, %c0_48] : memref<1x1x18x18x4xf32, #tpu.memory_space<vmem>>, vector<1x1x16x16x4xf32>
    %26 = vector.shape_cast %25 : vector<1x1x16x16x4xf32> to vector<16x16x4xf32>
    %27 = tpu.concatenate %20, %22, %24, %26 in 2 : vector<16x16x4xf32>, vector<16x16x4xf32>, vector<16x16x4xf32>, vector<16x16x4xf32> -> vector<16x16x16xf32>
    %28 = vector.shape_cast %27 : vector<16x16x16xf32> to vector<256x16xf32>
    %c0_49 = arith.constant 0 : index
    %c1_50 = arith.constant 1 : index
    %c0_51 = arith.constant 0 : index
    %c0_52 = arith.constant 0 : index
    %29 = vector.load %arg3[%c0_49, %c1_50, %c0_51, %c0_52] : memref<2x2x16x4xf32, #tpu.memory_space<vmem>>, vector<1x1x16x4xf32>
    %30 = vector.shape_cast %29 : vector<1x1x16x4xf32> to vector<16x4xf32>
    %cst_53 = arith.constant dense<0.000000e+00> : vector<256x4xf32>
    %31 = tpu.matmul %28, %30, %cst_53 {dimension_numbers = #tpu.dot_dimension_numbers<[1], [0], [0], [1], [0, 0, 1, 1], [], []>} : vector<256x16xf32>, vector<16x4xf32>, vector<256x4xf32> -> vector<256x4xf32>
    %32 = vector.broadcast %0 : vector<1x4xf32> to vector<256x4xf32>
    %33 = arith.addf %31, %32 : vector<256x4xf32>
    %c0_54 = arith.constant 0 : index
    %c0_55 = arith.constant 0 : index
    %c0_56 = arith.constant 0 : index
    %c1_57 = arith.constant 1 : index
    %c0_58 = arith.constant 0 : index
    %c0_59 = arith.constant 0 : index
    %34 = vector.load %arg5[%c0_54, %c0_55, %c0_56, %c1_57, %c0_58, %c0_59] : memref<1x1x2x2x256x4xf32, #tpu.memory_space<vmem>>, vector<1x1x1x1x256x4xf32>
    %35 = vector.shape_cast %34 : vector<1x1x1x1x256x4xf32> to vector<256x4xf32>
    %36 = vector.shape_cast %33 : vector<256x4xf32> to vector<1x1x1x1x256x4xf32>
    tpu.vector_store %arg5[%c0_54, %c0_55, %c0_56, %c1_57, %c0_58, %c0_59], %36 {strides = array<i32>} : memref<1x1x2x2x256x4xf32, #tpu.memory_space<vmem>>, vector<1x1x1x1x256x4xf32>,
    %c0_60 = arith.constant 0 : index
    %c0_61 = arith.constant 0 : index
    %c1_62 = arith.constant 1 : index
    %c0_63 = arith.constant 0 : index
    %c0_64 = arith.constant 0 : index
    %37 = vector.load %arg2[%c0_60, %c0_61, %c1_62, %c0_63, %c0_64] : memref<1x1x18x18x4xf32, #tpu.memory_space<vmem>>, vector<1x1x16x16x4xf32>
    %38 = vector.shape_cast %37 : vector<1x1x16x16x4xf32> to vector<16x16x4xf32>
    %c0_65 = arith.constant 0 : index
    %c0_66 = arith.constant 0 : index
    %c1_67 = arith.constant 1 : index
    %c1_68 = arith.constant 1 : index
    %c0_69 = arith.constant 0 : index
    %39 = vector.load %arg2[%c0_65, %c0_66, %c1_67, %c1_68, %c0_69] : memref<1x1x18x18x4xf32, #tpu.memory_space<vmem>>, vector<1x1x16x16x4xf32>
    %40 = vector.shape_cast %39 : vector<1x1x16x16x4xf32> to vector<16x16x4xf32>
    %c0_70 = arith.constant 0 : index
    %c0_71 = arith.constant 0 : index
    %c2_72 = arith.constant 2 : index
    %c0_73 = arith.constant 0 : index
    %c0_74 = arith.constant 0 : index
    %41 = vector.load %arg2[%c0_70, %c0_71, %c2_72, %c0_73, %c0_74] : memref<1x1x18x18x4xf32, #tpu.memory_space<vmem>>, vector<1x1x16x16x4xf32>
    %42 = vector.shape_cast %41 : vector<1x1x16x16x4xf32> to vector<16x16x4xf32>
    %c0_75 = arith.constant 0 : index
    %c0_76 = arith.constant 0 : index
    %c2_77 = arith.constant 2 : index
    %c1_78 = arith.constant 1 : index
    %c0_79 = arith.constant 0 : index
    %43 = vector.load %arg2[%c0_75, %c0_76, %c2_77, %c1_78, %c0_79] : memref<1x1x18x18x4xf32, #tpu.memory_space<vmem>>, vector<1x1x16x16x4xf32>
    %44 = vector.shape_cast %43 : vector<1x1x16x16x4xf32> to vector<16x16x4xf32>
    %45 = tpu.concatenate %38, %40, %42, %44 in 2 : vector<16x16x4xf32>, vector<16x16x4xf32>, vector<16x16x4xf32>, vector<16x16x4xf32> -> vector<16x16x16xf32>
    %46 = vector.shape_cast %45 : vector<16x16x16xf32> to vector<256x16xf32>
    %c1_80 = arith.constant 1 : index
    %c0_81 = arith.constant 0 : index
    %c0_82 = arith.constant 0 : index
    %c0_83 = arith.constant 0 : index
    %47 = vector.load %arg3[%c1_80, %c0_81, %c0_82, %c0_83] : memref<2x2x16x4xf32, #tpu.memory_space<vmem>>, vector<1x1x16x4xf32>
    %48 = vector.shape_cast %47 : vector<1x1x16x4xf32> to vector<16x4xf32>
    %cst_84 = arith.constant dense<0.000000e+00> : vector<256x4xf32>
    %49 = tpu.matmul %46, %48, %cst_84 {dimension_numbers = #tpu.dot_dimension_numbers<[1], [0], [0], [1], [0, 0, 1, 1], [], []>} : vector<256x16xf32>, vector<16x4xf32>, vector<256x4xf32> -> vector<256x4xf32>
    %50 = vector.broadcast %0 : vector<1x4xf32> to vector<256x4xf32>
    %51 = arith.addf %49, %50 : vector<256x4xf32>
    %c0_85 = arith.constant 0 : index
    %c0_86 = arith.constant 0 : index
    %c1_87 = arith.constant 1 : index
    %c0_88 = arith.constant 0 : index
    %c0_89 = arith.constant 0 : index
    %c0_90 = arith.constant 0 : index
    %52 = vector.load %arg5[%c0_85, %c0_86, %c1_87, %c0_88, %c0_89, %c0_90] : memref<1x1x2x2x256x4xf32, #tpu.memory_space<vmem>>, vector<1x1x1x1x256x4xf32>
    %53 = vector.shape_cast %52 : vector<1x1x1x1x256x4xf32> to vector<256x4xf32>
    %54 = vector.shape_cast %51 : vector<256x4xf32> to vector<1x1x1x1x256x4xf32>
    tpu.vector_store %arg5[%c0_85, %c0_86, %c1_87, %c0_88, %c0_89, %c0_90], %54 {strides = array<i32>} : memref<1x1x2x2x256x4xf32, #tpu.memory_space<vmem>>, vector<1x1x1x1x256x4xf32>,
    %c0_91 = arith.constant 0 : index
    %c0_92 = arith.constant 0 : index
    %c1_93 = arith.constant 1 : index
    %c1_94 = arith.constant 1 : index
    %c0_95 = arith.constant 0 : index
    %55 = vector.load %arg2[%c0_91, %c0_92, %c1_93, %c1_94, %c0_95] : memref<1x1x18x18x4xf32, #tpu.memory_space<vmem>>, vector<1x1x16x16x4xf32>
    %56 = vector.shape_cast %55 : vector<1x1x16x16x4xf32> to vector<16x16x4xf32>
    %c0_96 = arith.constant 0 : index
    %c0_97 = arith.constant 0 : index
    %c1_98 = arith.constant 1 : index
    %c2_99 = arith.constant 2 : index
    %c0_100 = arith.constant 0 : index
    %57 = vector.load %arg2[%c0_96, %c0_97, %c1_98, %c2_99, %c0_100] : memref<1x1x18x18x4xf32, #tpu.memory_space<vmem>>, vector<1x1x16x16x4xf32>
    %58 = vector.shape_cast %57 : vector<1x1x16x16x4xf32> to vector<16x16x4xf32>
    %c0_101 = arith.constant 0 : index
    %c0_102 = arith.constant 0 : index
    %c2_103 = arith.constant 2 : index
    %c1_104 = arith.constant 1 : index
    %c0_105 = arith.constant 0 : index
    %59 = vector.load %arg2[%c0_101, %c0_102, %c2_103, %c1_104, %c0_105] : memref<1x1x18x18x4xf32, #tpu.memory_space<vmem>>, vector<1x1x16x16x4xf32>
    %60 = vector.shape_cast %59 : vector<1x1x16x16x4xf32> to vector<16x16x4xf32>
    %c0_106 = arith.constant 0 : index
    %c0_107 = arith.constant 0 : index
    %c2_108 = arith.constant 2 : index
    %c2_109 = arith.constant 2 : index
    %c0_110 = arith.constant 0 : index
    %61 = vector.load %arg2[%c0_106, %c0_107, %c2_108, %c2_109, %c0_110] : memref<1x1x18x18x4xf32, #tpu.memory_space<vmem>>, vector<1x1x16x16x4xf32>
    %62 = vector.shape_cast %61 : vector<1x1x16x16x4xf32> to vector<16x16x4xf32>
    %63 = tpu.concatenate %56, %58, %60, %62 in 2 : vector<16x16x4xf32>, vector<16x16x4xf32>, vector<16x16x4xf32>, vector<16x16x4xf32> -> vector<16x16x16xf32>
    %64 = vector.shape_cast %63 : vector<16x16x16xf32> to vector<256x16xf32>
    %c1_111 = arith.constant 1 : index
    %c1_112 = arith.constant 1 : index
    %c0_113 = arith.constant 0 : index
    %c0_114 = arith.constant 0 : index
    %65 = vector.load %arg3[%c1_111, %c1_112, %c0_113, %c0_114] : memref<2x2x16x4xf32, #tpu.memory_space<vmem>>, vector<1x1x16x4xf32>
    %66 = vector.shape_cast %65 : vector<1x1x16x4xf32> to vector<16x4xf32>
    %cst_115 = arith.constant dense<0.000000e+00> : vector<256x4xf32>
    %67 = tpu.matmul %64, %66, %cst_115 {dimension_numbers = #tpu.dot_dimension_numbers<[1], [0], [0], [1], [0, 0, 1, 1], [], []>} : vector<256x16xf32>, vector<16x4xf32>, vector<256x4xf32> -> vector<256x4xf32>
    %68 = vector.broadcast %0 : vector<1x4xf32> to vector<256x4xf32>
    %69 = arith.addf %67, %68 : vector<256x4xf32>
    %c0_116 = arith.constant 0 : index
    %c0_117 = arith.constant 0 : index
    %c1_118 = arith.constant 1 : index
    %c1_119 = arith.constant 1 : index
    %c0_120 = arith.constant 0 : index
    %c0_121 = arith.constant 0 : index
    %70 = vector.load %arg5[%c0_116, %c0_117, %c1_118, %c1_119, %c0_120, %c0_121] : memref<1x1x2x2x256x4xf32, #tpu.memory_space<vmem>>, vector<1x1x1x1x256x4xf32>
    %71 = vector.shape_cast %70 : vector<1x1x1x1x256x4xf32> to vector<256x4xf32>
    %72 = vector.shape_cast %69 : vector<256x4xf32> to vector<1x1x1x1x256x4xf32>
    tpu.vector_store %arg5[%c0_116, %c0_117, %c1_118, %c1_119, %c0_120, %c0_121], %72 {strides = array<i32>} : memref<1x1x2x2x256x4xf32, #tpu.memory_space<vmem>>, vector<1x1x1x1x256x4xf32>,
    return
  }
  func.func @transform_0(%arg0: i32, %arg1: i32) -> (i32, i32, i32, i32, i32) {
    %c0_i32 = arith.constant 0 : i32
    %c0_i32_0 = arith.constant 0 : i32
    %c0_i32_1 = arith.constant 0 : i32
    %c0_i32_2 = arith.constant 0 : i32
    return %arg0, %arg1, %c0_i32, %c0_i32_0, %c0_i32_1 : i32, i32, i32, i32, i32
  }
  func.func @transform_1(%arg0: i32, %arg1: i32) -> (i32, i32, i32, i32) {
    %c0_i32 = arith.constant 0 : i32
    %c0_i32_0 = arith.constant 0 : i32
    %c0_i32_1 = arith.constant 0 : i32
    %c0_i32_2 = arith.constant 0 : i32
    %c0_i32_3 = arith.constant 0 : i32
    return %c0_i32, %c0_i32_0, %c0_i32_1, %c0_i32_2 : i32, i32, i32, i32
  }
  func.func @transform_2(%arg0: i32, %arg1: i32) -> (i32, i32) {
    %c0_i32 = arith.constant 0 : i32
    %c0_i32_0 = arith.constant 0 : i32
    %c0_i32_1 = arith.constant 0 : i32
    return %c0_i32, %c0_i32_0 : i32, i32
  }
  func.func @transform_3(%arg0: i32, %arg1: i32) -> (i32, i32, i32, i32, i32, i32) {
    %c0_i32 = arith.constant 0 : i32
    %c0_i32_0 = arith.constant 0 : i32
    %c0_i32_1 = arith.constant 0 : i32
    %c0_i32_2 = arith.constant 0 : i32
    %c0_i32_3 = arith.constant 0 : i32
    return %arg0, %arg1, %c0_i32, %c0_i32_0, %c0_i32_1, %c0_i32_2 : i32, i32, i32, i32, i32, i32
  }
}

</mosaic_0001>

<bundles_post_ra>
// kernel: tpu_custom_call.1
= control target key start
LH: loop header
LB: loop body
LE: loop exit
PB: predicated region body
PF: predicated region fallthrough
CT: control target
= control target key end

     0   :  { %s4446_s12 = smov 0   ;;  %s4448_s13 = smov 0   ;;  %s7555_s0 = inlined_call_operand.vmem [shape: f32[2,1,18,18,4], index: 0, kind: input, shape index: {}]   ;;  %s7556_s1 = inlined_call_operand.vmem [shape: f32[2,2,16,4], index: 1, kind: input, shape index: {}]   ;;  %s7557_s2 = inlined_call_operand.vmem [shape: f32[1,4], index: 2, kind: input, shape index: {}]   ;;  %s7558_s3 = inlined_call_operand.vmem [shape: f32[2,1,2,2,256,4], index: 3, kind: output, shape index: {}]  }
   0x1   :  { %s4450_s14 = smov 0  }
   0x2 LB: > { %s25_s15 = sadd.s32 1, %s4417_s13  ;;  %p3723_p0 = scmp.ge.s32.totalorder %s4421_s14, 1  ;;  %s4421_s14 = sphi %s4450_s14, %s13_s14   ;;  %s4417_s13 = sphi %s4448_s13, %s7889_s13   ;;  %s4413_s12 = sphi %s4446_s12, %s7888_s12  }
   0x3   : > { %p27_p1 = scmp.ge.s32.totalorder %s25_s15, 2  ;;  %p157_p2 = scmp.lt.s32.totalorder %s4421_s14, 3 }
   0x5   : > { %s7891_s15 = smov (%p27_p1, %s25_s15), 0  ;;  %p158_p3 = pnand %p3723_p0, %p157_p2 }
   0x7   : > { %161 = sbr.rel (%p158_p3) target bundleno = 1288 (0x508), region = 32 }
   0xc   : > { %p189_p4 = scmp.lt.s32.totalorder %s4413_s12, 1  ;;  %s4423_s20 = smov 4   ;;  %vm721_vm0 = vcmask 31744   ;;  %vm754_vm1 = vcmask 64512   ;;  %vm825_vm2 = vcmask 130048   ;;  %vm787_vm3 = vcmask 97280  }
   0xd   : > { %s4424_s21 = smov 8   ;;  %s4425_s22 = smov 12  }
   0xe   : > { %s7893_s12 = smov (!%p189_p4, %s4413_s12), 1 }
   0xf   : > { %s4344_s16 = smul.u32 432, %s7893_s12  ;;  %s4343_s27 = sshll.u32 %s7893_s12, 10 }
  0x10   : > { %s5449_s5 = scalar_lea.vmem %s7558_s3, %s4343_s27 }
  0x11   : > { %s4470_s19 = scalar_lea.vmem %s7555_s0, %s4344_s16 }
  0x12   : > { %v4473_v0 = vld [vmem:[%s4470_s19 + $0x31] sm:$0xff]  ;;  %v4476_v1 = vld [vmem:[%s4470_s19 + $0x19] sm:$0xff]  ;;  %v240_v2 = vld [vmem:[%s4470_s19 + $0x1] sm:$0xff] }
  0x13   : > { %377 = vrot.lane.b32.xlu2 %v4473_v0, %s4423_s20  ;;  %373 = vrot.lane.b32.xlu1 %v4476_v1, %s4423_s20  ;;  %v4485_v3 = vld [vmem:[%s4470_s19 + $0x39] sm:$0xff]  ;;  %v4488_v4 = vld [vmem:[%s4470_s19 + $0x21] sm:$0xff] }
  0x14   : > { %369 = vrot.lane.b32.xlu0 %v240_v2, %s4423_s20  ;;  %v241_v5 = vld [vmem:[%s4470_s19 + $0x9] sm:$0xff]  ;;  %v4497_v6 = vld [vmem:[%s4470_s19 + $0x61] sm:$0xff]  ;;  %v4500_v7 = vld [vmem:[%s4470_s19 + $0x51] sm:$0xff] }
  0x15   : > { %v4503_v8 = vld [vmem:[%s4470_s19 + $0x49] sm:$0xff]  ;;  %v4512_v9 = vld [vmem:[%s4470_s19 + $0x81] sm:$0xff]  ;;  %v4515_v10 = vld [vmem:[%s4470_s19 + $0x79] sm:$0xff] }
  0x16   : > { %v4518_v11 = vld [vmem:[%s4470_s19 + $0x69] sm:$0xff]  ;;  %v4530_v13 = vld [vmem:[%s4470_s19 + $0x99] sm:$0xff]  ;;  %v4533_v14 = vld [vmem:[%s4470_s19 + $0x91] sm:$0xff] }
  0x17   : > { %v4527_v12 = vld [vmem:[%s4470_s19 + $0xa9] sm:$0xff]  ;;  %v4545_v16 = vld [vmem:[%s4470_s19 + $0xc1] sm:$0xff]  ;;  %v4548_v17 = vld [vmem:[%s4470_s19 + $0xb1] sm:$0xff] }
  0x18   : > { %v4542_v15 = vld [vmem:[%s4470_s19 + $0xc9] sm:$0xff]  ;;  %7608 = vst [vmem:[#allocation2_spill] sm:$0xff] %v4548_v17  ;;  %v4557_v18 = vld [vmem:[%s4470_s19 + $0xf1] sm:$0xff]  ;;  %v4560_v19 = vld [vmem:[%s4470_s19 + $0xe1] sm:$0xff] }
  0x19   : > { %v4563_v20 = vld [vmem:[%s4470_s19 + $0xd9] sm:$0xff]  ;;  %v4572_v21 = vld [vmem:[%s4470_s19 + $0x111] sm:$0xff]  ;;  %v4575_v22 = vld [vmem:[%s4470_s19 + $0x109] sm:$0xff] }
  0x1a   : > { %v4578_v23 = vld [vmem:[%s4470_s19 + $0xf9] sm:$0xff]  ;;  %v4590_v25 = vld [vmem:[%s4470_s19 + $0x129] sm:$0xff]  ;;  %v4593_v26 = vld [vmem:[%s4470_s19 + $0x121] sm:$0xff] }
  0x1b   : > { %379 = vrot.lane.b32.xlu2 %v4485_v3, %s4423_s20  ;;  %375 = vrot.lane.b32.xlu1 %v4488_v4, %s4423_s20  ;;  %v4587_v24 = vld [vmem:[%s4470_s19 + $0x139] sm:$0xff]  ;;  %v4605_v28 = vld [vmem:[%s4470_s19 + $0x151] sm:$0xff] }
  0x1c   : > { %371 = vrot.lane.b32.xlu0 %v241_v5, %s4423_s20  ;;  %v4602_v27 = vld [vmem:[%s4470_s19 + $0x159] sm:$0xff]  ;;  %v4608_v29 = vld [vmem:[%s4470_s19 + $0x141] sm:$0xff]  ;;  %v4620_v31 = vld [vmem:[%s4470_s19 + $0x171] sm:$0xff] }
  0x1d   : > { %v4617_v30 = vld [vmem:[%s4470_s19 + $0x18] sm:$0xff]  ;;  %v4623_v32 = vld [vmem:[%s4470_s19 + $0x169] sm:$0xff]  ;;  %v4638_v35 = vld [vmem:[%s4470_s19 + $0x20] sm:$0xff] }
  0x1e   : > { %v4632_v33 = vld [vmem:[%s4470_s19 + $0x38] sm:$0xff]  ;;  %v4635_v34 = vld [vmem:[%s4470_s19 + $0x30] sm:$0xff]  ;;  %v4649_v37 = vld [vmem:[%s4470_s19 + $0x60] sm:$0xff] }
  0x1f   : > { %v4652_v38 = vld [vmem:[%s4470_s19 + $0x50] sm:$0xff]  ;;  %v4655_v39 = vld [vmem:[%s4470_s19 + $0x48] sm:$0xff]  ;;  %v4666_v41 = vld [vmem:[%s4470_s19 + $0x80] sm:$0xff] }
  0x20   : > { %v4669_v42 = vld [vmem:[%s4470_s19 + $0x78] sm:$0xff]  ;;  %v4672_v43 = vld [vmem:[%s4470_s19 + $0x68] sm:$0xff]  ;;  %v4689_v47 = vld [vmem:[%s4470_s19 + $0x90] sm:$0xff] }
  0x21   : > { %v4683_v45 = vld [vmem:[%s4470_s19 + $0xa8] sm:$0xff]  ;;  %v4686_v46 = vld [vmem:[%s4470_s19 + $0x98] sm:$0xff]  ;;  %v4707_v52 = vld [vmem:[%s4470_s19 + $0xc0] sm:$0xff] }
  0x22   : > { %7609 = vst [vmem:[#allocation3_spill] sm:$0xff] %v4683_v45  ;;  %v4704_v51 = vld [vmem:[%s4470_s19 + $0xc8] sm:$0xff]  ;;  %v4710_v53 = vld [vmem:[%s4470_s19 + $0xb0] sm:$0xff]  ;;  %v4728_v58 = vld [vmem:[%s4470_s19 + $0xe0] sm:$0xff] }
  0x23   : > { %385 = vrot.lane.b32.xlu2 %v4497_v6, %s4423_s20  ;;  %383 = vrot.lane.b32.xlu1 %v4500_v7, %s4423_s20  ;;  %7610 = vst [vmem:[#allocation4_spill] sm:$0xff] %v4686_v46  ;;  %v4725_v57 = vld [vmem:[%s4470_s19 + $0xf0] sm:$0xff]  ;;  %v4731_v59 = vld [vmem:[%s4470_s19 + $0xd8] sm:$0xff] }
  0x24   : > { %381 = vrot.lane.b32.xlu0 %v4503_v8, %s4423_s20  ;;  %7611 = vst [vmem:[#allocation5_spill] sm:$0xff] %v4704_v51  ;;  %v4746_v63 = vld [vmem:[%s4470_s19 + $0x110] sm:$0xff]  ;;  %v4749_v2 = vld [vmem:[%s4470_s19 + $0x108] sm:$0xff]  ;;  %v4752_v5 = vld [vmem:[%s4470_s19 + $0xf8] sm:$0xff] }
  0x25   : > { %7612 = vst [vmem:[#allocation6_spill] sm:$0xff] %v4707_v52 }
  0x26   : > { %7613 = vst [vmem:[#allocation7_spill] sm:$0xff] %v4710_v53 }
  0x27   : > { %7615 = vst [vmem:[#allocation9_spill] sm:$0xff] %v4725_v57 }
  0x28   : > { %7616 = vst [vmem:[#allocation10_spill] sm:$0xff] %v4728_v58 }
  0x29   : > { %7617 = vst [vmem:[#allocation11_spill] sm:$0xff] %v4731_v59 }
  0x2a   : > { %7619 = vst [vmem:[#allocation13_spill] sm:$0xff] %v4746_v63 }
  0x2b   : > { %391 = vrot.lane.b32.xlu2 %v4512_v9, %s4423_s20  ;;  %389 = vrot.lane.b32.xlu1 %v4515_v10, %s4423_s20  ;;  %7620 = vst [vmem:[#allocation14_spill] sm:$0xff] %v4749_v2 }
  0x2c   : > { %387 = vrot.lane.b32.xlu0 %v4518_v11, %s4423_s20  ;;  %7621 = vst [vmem:[#allocation15_spill] sm:$0xff] %v4752_v5 }
  0x33   : > { %397 = vrot.lane.b32.xlu2 %v4527_v12, %s4423_s20  ;;  %395 = vrot.lane.b32.xlu1 %v4530_v13, %s4423_s20 }
  0x34   : > { %393 = vrot.lane.b32.xlu0 %v4533_v14, %s4423_s20 }
  0x3b   : > { %403 = vrot.lane.b32.xlu2 %v4542_v15, %s4423_s20  ;;  %401 = vrot.lane.b32.xlu1 %v4545_v16, %s4423_s20 }
  0x3c   : > { %399 = vrot.lane.b32.xlu0 %v4548_v17, %s4423_s20 }
  0x43   : > { %409 = vrot.lane.b32.xlu2 %v4557_v18, %s4423_s20  ;;  %407 = vrot.lane.b32.xlu1 %v4560_v19, %s4423_s20 }
  0x44   : > { %405 = vrot.lane.b32.xlu0 %v4563_v20, %s4423_s20 }
  0x4b   : > { %415 = vrot.lane.b32.xlu2 %v4572_v21, %s4423_s20  ;;  %413 = vrot.lane.b32.xlu1 %v4575_v22, %s4423_s20 }
  0x4c   : > { %411 = vrot.lane.b32.xlu0 %v4578_v23, %s4423_s20 }
  0x53   : > { %421 = vrot.lane.b32.xlu2 %v4587_v24, %s4423_s20  ;;  %419 = vrot.lane.b32.xlu1 %v4590_v25, %s4423_s20 }
  0x54   : > { %417 = vrot.lane.b32.xlu0 %v4593_v26, %s4423_s20 }
  0x5b   : > { %427 = vrot.lane.b32.xlu2 %v4602_v27, %s4423_s20  ;;  %425 = vrot.lane.b32.xlu1 %v4605_v28, %s4423_s20 }
  0x5c   : > { %423 = vrot.lane.b32.xlu0 %v4608_v29, %s4423_s20 }
  0x63   : > { %497 = vrot.lane.b32.xlu2 %v4617_v30, %s4424_s21  ;;  %431 = vrot.lane.b32.xlu1 %v4620_v31, %s4423_s20 }
  0x64   : > { %429 = vrot.lane.b32.xlu0 %v4623_v32, %s4423_s20 }
  0x6b   : > { %503 = vrot.lane.b32.xlu2 %v4632_v33, %s4424_s21  ;;  %501 = vrot.lane.b32.xlu1 %v4635_v34, %s4424_s21 }
  0x6c   : > { %499 = vrot.lane.b32.xlu0 %v4638_v35, %s4424_s21 }
  0x6d   : > { %v4646_v36 = vpop.permute.xlu2 %377 }
  0x73   : > { %509 = vrot.lane.b32.xlu2 %v4649_v37, %s4424_s21  ;;  %507 = vrot.lane.b32.xlu1 %v4652_v38, %s4424_s21 }
  0x74   : > { %505 = vrot.lane.b32.xlu0 %v4655_v39, %s4424_s21 }
  0x75   : > { %v4663_v40 = vpop.permute.xlu2 %379 }
  0x7b   : > { %515 = vrot.lane.b32.xlu2 %v4666_v41, %s4424_s21  ;;  %513 = vrot.lane.b32.xlu1 %v4669_v42, %s4424_s21 }
  0x7c   : > { %511 = vrot.lane.b32.xlu0 %v4672_v43, %s4424_s21 }
  0x7d   : > { %v4680_v44 = vpop.permute.xlu2 %385 }
  0x83   : > { %521 = vrot.lane.b32.xlu2 %v4683_v45, %s4424_s21  ;;  %519 = vrot.lane.b32.xlu1 %v4686_v46, %s4424_s21  ;;  %v4794_v45 = vld [vmem:[%s4470_s19 + $0x140] sm:$0xff]  ;;  %v4811_v46 = vld [vmem:[%s4470_s19 + $0x168] sm:$0xff] }
  0x84   : > { %517 = vrot.lane.b32.xlu0 %v4689_v47, %s4424_s21  ;;  %7630 = vst [vmem:[#allocation24_spill] sm:$0xff] %v4794_v45 }
  0x85   : > { %v4697_v48 = vpop.permute.xlu2 %391  ;;  %v4699_v49 = vpop.permute.xlu1 %373  ;;  %7634 = vst [vmem:[#allocation28_spill] sm:$0xff] %v4811_v46 }
  0x86   : > { %v4701_v50 = vpop.permute.xlu0 %369 }
  0x8b   : > { %527 = vrot.lane.b32.xlu2 %v4704_v51, %s4424_s21  ;;  %525 = vrot.lane.b32.xlu1 %v4707_v52, %s4424_s21  ;;  %v4767_v51 = vld [vmem:[%s4470_s19 + $0x138] sm:$0xff]  ;;  %v4773_v52 = vld [vmem:[%s4470_s19 + $0x120] sm:$0xff] }
  0x8c   : > { %523 = vrot.lane.b32.xlu0 %v4710_v53, %s4424_s21  ;;  %7623 = vst [vmem:[#allocation17_spill] sm:$0xff] %v4767_v51  ;;  %v4791_v53 = vld [vmem:[%s4470_s19 + $0x150] sm:$0xff] }
  0x8d   : > { %v4718_v54 = vpop.permute.xlu2 %397  ;;  %v4720_v55 = vpop.permute.xlu1 %375  ;;  %7625 = vst [vmem:[#allocation19_spill] sm:$0xff] %v4773_v52 }
  0x8e   : > { %7614 = vst [vmem:[#allocation8_spill] sm:$0xff] %v4718_v54  ;;  %v4722_v56 = vpop.permute.xlu0 %371  ;;  %v3756_v54 = vld [vmem:[%s4470_s19 + $0x170] sm:$0xff] }
  0x8f   : > { %7629 = vst [vmem:[#allocation23_spill] sm:$0xff] %v4791_v53 }
  0x93   : > { %533 = vrot.lane.b32.xlu2 %v4725_v57, %s4424_s21  ;;  %531 = vrot.lane.b32.xlu1 %v4728_v58, %s4424_s21 }
  0x94   : > { %529 = vrot.lane.b32.xlu0 %v4731_v59, %s4424_s21 }
  0x95   : > { %v4739_v60 = vpop.permute.xlu2 %403  ;;  %v4741_v61 = vpop.permute.xlu1 %383 }
  0x96   : > { %7618 = vst [vmem:[#allocation12_spill] sm:$0xff] %v4739_v60  ;;  %v4743_v62 = vpop.permute.xlu0 %381  ;;  %v4770_v60 = vld [vmem:[%s4470_s19 + $0x128] sm:$0xff] }
  0x97   : > { %7624 = vst [vmem:[#allocation18_spill] sm:$0xff] %v4770_v60 }
  0x9b   : > { %539 = vrot.lane.b32.xlu2 %v4746_v63, %s4424_s21  ;;  %537 = vrot.lane.b32.xlu1 %v4749_v2, %s4424_s21 }
  0x9c   : > { %535 = vrot.lane.b32.xlu0 %v4752_v5, %s4424_s21 }
  0x9d   : > { %v4760_v57 = vpop.permute.xlu2 %409  ;;  %v4762_v58 = vpop.permute.xlu1 %389 }
  0x9e   : > { %7622 = vst [vmem:[#allocation16_spill] sm:$0xff] %v4760_v57  ;;  %v4764_v59 = vpop.permute.xlu0 %387  ;;  %v4788_v57 = vld [vmem:[%s4470_s19 + $0x158] sm:$0xff] }
  0x9f   : > { %7628 = vst [vmem:[#allocation22_spill] sm:$0xff] %v4788_v57 }
  0xa3   : > { %545 = vrot.lane.b32.xlu2 %v4767_v51, %s4424_s21  ;;  %543 = vrot.lane.b32.xlu1 %v4770_v60, %s4424_s21 }
  0xa4   : > { %541 = vrot.lane.b32.xlu0 %v4773_v52, %s4424_s21 }
  0xa5   : > { %v4781_v63 = vpop.permute.xlu2 %415  ;;  %v4783_v2 = vpop.permute.xlu1 %395 }
  0xa6   : > { %7626 = vst [vmem:[#allocation20_spill] sm:$0xff] %v4781_v63  ;;  %v4785_v5 = vpop.permute.xlu0 %393  ;;  %v3757_v63 = vld [vmem:[%s4470_s19 + $0x180] sm:$0xff] }
  0xa7   : > { %7627 = vst [vmem:[#allocation21_spill] sm:$0xff] %v4783_v2 }
  0xab   : > { %551 = vrot.lane.b32.xlu2 %v4788_v57, %s4424_s21  ;;  %549 = vrot.lane.b32.xlu1 %v4791_v53, %s4424_s21 }
  0xac   : > { %547 = vrot.lane.b32.xlu0 %v4794_v45, %s4424_s21 }
  0xad   : > { %v4802_v51 = vpop.permute.xlu2 %421  ;;  %v4804_v60 = vpop.permute.xlu1 %401 }
  0xae   : > { %7631 = vst [vmem:[#allocation25_spill] sm:$0xff] %v4802_v51  ;;  %v4806_v52 = vpop.permute.xlu0 %399  ;;  %v3758_v51 = vld [vmem:[%s4470_s19 + $0x188] sm:$0xff] }
  0xaf   : > { %7632 = vst [vmem:[#allocation26_spill] sm:$0xff] %v4804_v60 }
  0xb0   : > { %7633 = vst [vmem:[#allocation27_spill] sm:$0xff] %v4806_v52 }
  0xb3   : > { %557 = vrot.lane.b32.xlu2 %v3757_v63, %s4424_s21  ;;  %555 = vrot.lane.b32.xlu1 %v3756_v54, %s4424_s21 }
  0xb4   : > { %553 = vrot.lane.b32.xlu0 %v4811_v46, %s4424_s21 }
  0xb5   : > { %v4817_v57 = vpop.permute.xlu2 %427  ;;  %v4819_v53 = vpop.permute.xlu1 %407 }
  0xb6   : > { %7635 = vst [vmem:[#allocation29_spill] sm:$0xff] %v4817_v57  ;;  %v4821_v45 = vpop.permute.xlu0 %405 }
  0xb7   : > { %7636 = vst [vmem:[#allocation30_spill] sm:$0xff] %v4819_v53 }
  0xb8   : > { %7637 = vst [vmem:[#allocation31_spill] sm:$0xff] %v4821_v45 }
  0xbb   : > { %627 = vrot.lane.b32.xlu2 %v4488_v4, %s4425_s22  ;;  %625 = vrot.lane.b32.xlu1 %v4476_v1, %s4425_s22 }
  0xbc   : > { %559 = vrot.lane.b32.xlu0 %v3758_v51, %s4424_s21 }
  0xbd   : > { %v4829_v54 = vpop.permute.xlu2 %497  ;;  %v4831_v63 = vpop.permute.xlu1 %413 }
  0xbe   : > { %7638 = vst [vmem:[#allocation32_spill] sm:$0xff] %v4831_v63  ;;  %v4833_v46 = vpop.permute.xlu0 %411 }
  0xbf   : > { %7639 = vst [vmem:[#allocation33_spill] sm:$0xff] %v4833_v46 }
  0xc3   : > { %633 = vrot.lane.b32.xlu2 %v4503_v8, %s4425_s22  ;;  %631 = vrot.lane.b32.xlu1 %v4485_v3, %s4425_s22 }
  0xc4   : > { %629 = vrot.lane.b32.xlu0 %v4473_v0, %s4425_s22 }
  0xc5   : > { %v4841_v57 = vpop.permute.xlu2 %503  ;;  %v4843_v53 = vpop.permute.xlu1 %419 }
  0xc6   : > { %7640 = vst [vmem:[#allocation34_spill] sm:$0xff] %v4843_v53  ;;  %v4845_v51 = vpop.permute.xlu0 %417 }
  0xc7   : > { %7641 = vst [vmem:[#allocation35_spill] sm:$0xff] %v4845_v51 }
  0xcb   : > { %639 = vrot.lane.b32.xlu2 %v4518_v11, %s4425_s22  ;;  %637 = vrot.lane.b32.xlu1 %v4497_v6, %s4425_s22 }
  0xcc   : > { %635 = vrot.lane.b32.xlu0 %v4500_v7, %s4425_s22 }
  0xcd   : > { %v4853_v63 = vpop.permute.xlu2 %509  ;;  %v4855_v46 = vpop.permute.xlu1 %425 }
  0xce   : > { %7642 = vst [vmem:[#allocation36_spill] sm:$0xff] %v4855_v46  ;;  %v4857_v45 = vpop.permute.xlu0 %423 }
  0xcf   : > { %7643 = vst [vmem:[#allocation37_spill] sm:$0xff] %v4857_v45 }
  0xd3   : > { %645 = vrot.lane.b32.xlu2 %v4533_v14, %s4425_s22  ;;  %643 = vrot.lane.b32.xlu1 %v4512_v9, %s4425_s22 }
  0xd4   : > { %641 = vrot.lane.b32.xlu0 %v4515_v10, %s4425_s22 }
  0xd5   : > { %v4865_v53 = vpop.permute.xlu2 %515  ;;  %v4867_v51 = vpop.permute.xlu1 %431 }
  0xd6   : > { %7644 = vst [vmem:[#allocation38_spill] sm:$0xff] %v4867_v51  ;;  %v4869_v60 = vpop.permute.xlu0 %429 }
  0xd7   : > { %7645 = vst [vmem:[#allocation39_spill] sm:$0xff] %v4869_v60 }
  0xdb   : > { %651 = vrot.lane.b32.xlu2 %v4548_v17, %s4425_s22  ;;  %649 = vrot.lane.b32.xlu1 %v4527_v12, %s4425_s22 }
  0xdc   : > { %647 = vrot.lane.b32.xlu0 %v4530_v13, %s4425_s22 }
  0xdd   : > { %v4877_v46 = vpop.permute.xlu2 %521  ;;  %v4879_v45 = vpop.permute.xlu1 %501 }
  0xde   : > { %7646 = vst [vmem:[#allocation40_spill] sm:$0xff] %v4877_v46  ;;  %v4881_v52 = vpop.permute.xlu0 %499 }
  0xe3   : > { %657 = vrot.lane.b32.xlu2 %v4563_v20, %s4425_s22  ;;  %655 = vrot.lane.b32.xlu1 %v4542_v15, %s4425_s22 }
  0xe4   : > { %653 = vrot.lane.b32.xlu0 %v4545_v16, %s4425_s22 }
  0xe5   : > { %v4889_v51 = vpop.permute.xlu2 %527  ;;  %v4891_v60 = vpop.permute.xlu1 %507 }
  0xe6   : > { %7647 = vst [vmem:[#allocation41_spill] sm:$0xff] %v4889_v51  ;;  %v4893_v2 = vpop.permute.xlu0 %505  ;;  %v208_v51 = vld [vmem:[%s4470_s19] sm:$0xff] }
  0xeb   : > { %663 = vrot.lane.b32.xlu2 %v4578_v23, %s4425_s22  ;;  %661 = vrot.lane.b32.xlu1 %v4557_v18, %s4425_s22 }
  0xec   : > { %659 = vrot.lane.b32.xlu0 %v4560_v19, %s4425_s22 }
  0xed   : > { %v4901_v20 = vpop.permute.xlu2 %533  ;;  %v4903_v46 = vpop.permute.xlu1 %513 }
  0xee   : > { %7648 = vst [vmem:[#allocation42_spill] sm:$0xff] %v4901_v20  ;;  %v4905_v17 = vpop.permute.xlu0 %511  ;;  %v820_v20 = vld [vmem:[%s7556_s1] sm:$0xff] }
  0xf3   : > { %669 = vrot.lane.b32.xlu2 %v4593_v26, %s4425_s22  ;;  %667 = vrot.lane.b32.xlu1 %v4572_v21, %s4425_s22 }
  0xf4   : > { %665 = vrot.lane.b32.xlu0 %v4575_v22, %s4425_s22 }
  0xf5   : > { %v4913_v18 = vpop.permute.xlu2 %539  ;;  %v4915_v19 = vpop.permute.xlu1 %519 }
  0xf6   : > { %7649 = vst [vmem:[#allocation43_spill] sm:$0xff] %v4913_v18  ;;  %v4917_v23 = vpop.permute.xlu0 %517  ;;  %v4947_v18 = vld [vmem:[%s4470_s19 + $0x181] sm:$0xff] }
  0xf7   : > { %7656 = vst [vmem:[#allocation50_spill] sm:$0xff] %v4947_v18 }
  0xfb   : > { %675 = vrot.lane.b32.xlu2 %v4608_v29, %s4425_s22  ;;  %673 = vrot.lane.b32.xlu1 %v4587_v24, %s4425_s22 }
  0xfc   : > { %671 = vrot.lane.b32.xlu0 %v4590_v25, %s4425_s22 }
  0xfd   : > { %v4925_v21 = vpop.permute.xlu2 %545  ;;  %v4927_v22 = vpop.permute.xlu1 %525 }
  0xfe   : > { %7650 = vst [vmem:[#allocation44_spill] sm:$0xff] %v4925_v21  ;;  %v4929_v26 = vpop.permute.xlu0 %523  ;;  %v4944_v21 = vld [vmem:[%s4470_s19 + $0x189] sm:$0xff] }
  0xff   : > { %7651 = vst [vmem:[#allocation45_spill] sm:$0xff] %v4927_v22 }
 0x100   : > { %7655 = vst [vmem:[#allocation49_spill] sm:$0xff] %v4944_v21 }
 0x103   : > { %681 = vrot.lane.b32.xlu2 %v4623_v32, %s4425_s22  ;;  %679 = vrot.lane.b32.xlu1 %v4602_v27, %s4425_s22  ;;  %v821_v27 = vld [vmem:[%s7556_s1 + $0x8] sm:$0xff] }
 0x104   : > { %677 = vrot.lane.b32.xlu0 %v4605_v28, %s4425_s22  ;;  %936 = vmatpush.msra.mxu0 %v821_v27 }
 0x105   : > { %v4937_v24 = vpop.permute.xlu2 %551  ;;  %v4939_v25 = vpop.permute.xlu1 %531 }
 0x106   : > { %7652 = vst [vmem:[#allocation46_spill] sm:$0xff] %v4937_v24  ;;  %v4941_v29 = vpop.permute.xlu0 %529  ;;  %937 = vmatpush.msra.mxu0 %v820_v20  ;;  %v4981_v20 = vld [vmem:[%s4470_s19 + $0x3a] sm:$0xff] }
 0x107   : > { %7653 = vst [vmem:[#allocation47_spill] sm:$0xff] %v4939_v25  ;;  %v1099_v25 = vld [vmem:[%s4470_s19 + $0x2] sm:$0xff] }
 0x108   : > { %7654 = vst [vmem:[#allocation48_spill] sm:$0xff] %v4941_v29  ;;  %v5026_v29 = vld [vmem:[%s4470_s19 + $0x7a] sm:$0xff] }
 0x109   : > { %7663 = vst [vmem:[#allocation57_spill] sm:$0xff] %v4981_v20 }
 0x10a   : > { %7674 = vst [vmem:[#allocation68_spill] sm:$0xff] %v5026_v29 }
 0x10b   : > { %687 = vrot.lane.b32.xlu2 %v4944_v21, %s4425_s22  ;;  %685 = vrot.lane.b32.xlu1 %v4947_v18, %s4425_s22  ;;  %v1100_v21 = vld [vmem:[%s4470_s19 + $0xa] sm:$0xff]  ;;  %v4987_v18 = vld [vmem:[%s4470_s19 + $0x22] sm:$0xff] }
 0x10c   : > { %683 = vrot.lane.b32.xlu0 %v4620_v31, %s4425_s22  ;;  %v4968_v31 = vld [vmem:[%s4470_s19 + $0x1a] sm:$0xff]  ;;  %7665 = vst [vmem:[#allocation59_spill] sm:$0xff] %v4987_v18 }
 0x10d   : > { %v4958_v28 = vpop.permute.xlu2 %557  ;;  %v4960_v32 = vpop.permute.xlu1 %537  ;;  %7660 = vst [vmem:[#allocation54_spill] sm:$0xff] %v4968_v31 }
 0x10e   : > { %7657 = vst [vmem:[#allocation51_spill] sm:$0xff] %v4958_v28  ;;  %v4962_v24 = vpop.permute.xlu0 %535 }
 0x10f   : > { %7658 = vst [vmem:[#allocation52_spill] sm:$0xff] %v4960_v32 }
 0x110   : > { %7659 = vst [vmem:[#allocation53_spill] sm:$0xff] %v4962_v24  ;;  %v4984_v24 = vld [vmem:[%s4470_s19 + $0x32] sm:$0xff] }
 0x111   : > { %7664 = vst [vmem:[#allocation58_spill] sm:$0xff] %v4984_v24 }
 0x113   : > { %1231 = vrot.lane.b32.xlu2 %v4968_v31, %s4423_s20  ;;  %1229 = vrot.lane.b32.xlu1 %v1100_v21, %s4423_s20  ;;  %v5005_v31 = vld [vmem:[%s4470_s19 + $0x52] sm:$0xff] }
 0x114   : > { %1227 = vrot.lane.b32.xlu0 %v1099_v25, %s4423_s20  ;;  %7669 = vst [vmem:[#allocation63_spill] sm:$0xff] %v5005_v31 }
 0x115   : > { %v628_v27 = vpop.permute.xlu2 %627  ;;  %v4976_v28 = vpop.permute.xlu1 %543 }
 0x116   : > { %7661 = vst [vmem:[#allocation55_spill] sm:$0xff] %v4976_v28  ;;  %v4978_v32 = vpop.permute.xlu0 %541 }
 0x117   : > { %7662 = vst [vmem:[#allocation56_spill] sm:$0xff] %v4978_v32  ;;  %v5002_v32 = vld [vmem:[%s4470_s19 + $0x62] sm:$0xff] }
 0x118   : > { %7668 = vst [vmem:[#allocation62_spill] sm:$0xff] %v5002_v32 }
 0x11b   : > { %1237 = vrot.lane.b32.xlu2 %v4981_v20, %s4423_s20  ;;  %1235 = vrot.lane.b32.xlu1 %v4984_v24, %s4423_s20  ;;  %v5008_v20 = vld [vmem:[%s4470_s19 + $0x4a] sm:$0xff] }
 0x11c   : > { %1233 = vrot.lane.b32.xlu0 %v4987_v18, %s4423_s20  ;;  %7670 = vst [vmem:[#allocation64_spill] sm:$0xff] %v5008_v20  ;;  %v5023_v18 = vld [vmem:[%s4470_s19 + $0x82] sm:$0xff] }
 0x11d   : > { %v4995_v21 = vpop.permute.xlu2 %633  ;;  %v4997_v25 = vpop.permute.xlu1 %549  ;;  %7673 = vst [vmem:[#allocation67_spill] sm:$0xff] %v5023_v18 }
 0x11e   : > { %7666 = vst [vmem:[#allocation60_spill] sm:$0xff] %v4997_v25  ;;  %v4999_v28 = vpop.permute.xlu0 %547 }
 0x11f   : > { %7667 = vst [vmem:[#allocation61_spill] sm:$0xff] %v4999_v28 }
 0x123   : > { %1243 = vrot.lane.b32.xlu2 %v5002_v32, %s4423_s20  ;;  %1241 = vrot.lane.b32.xlu1 %v5005_v31, %s4423_s20  ;;  %v5030_v32 = vld [vmem:[%s4470_s19 + $0x6a] sm:$0xff] }
 0x124   : > { %1239 = vrot.lane.b32.xlu0 %v5008_v20, %s4423_s20  ;;  %7675 = vst [vmem:[#allocation69_spill] sm:$0xff] %v5030_v32 }
 0x125   : > { %v5016_v24 = vpop.permute.xlu2 %639  ;;  %v5018_v25 = vpop.permute.xlu1 %555 }
 0x126   : > { %7671 = vst [vmem:[#allocation65_spill] sm:$0xff] %v5018_v25  ;;  %v5020_v28 = vpop.permute.xlu0 %553  ;;  %v722_v25 = vsel %vm721_vm0, %v208_v51, %v4701_v50  ;;  %v5049_v50 = vld [vmem:[%s4470_s19 + $0xaa] sm:$0xff]  ;;  %v5052_v51 = vld [vmem:[%s4470_s19 + $0x9a] sm:$0xff] }
 0x127   : > { %7672 = vst [vmem:[#allocation66_spill] sm:$0xff] %v5020_v28  ;;  %v755_v28 = vsel %vm754_vm1, %v722_v25, %v4829_v54 }
 0x128   : > { %7677 = vst [vmem:[#allocation71_spill] sm:$0xff] %v5052_v51 }
 0x12b   : > { %1249 = vrot.lane.b32.xlu2 %v5023_v18, %s4423_s20  ;;  %1247 = vrot.lane.b32.xlu1 %v5026_v29, %s4423_s20  ;;  %v209_v29 = vld [vmem:[%s4470_s19 + $0x8] sm:$0xff] }
 0x12c   : > { %1245 = vrot.lane.b32.xlu0 %v5030_v32, %s4423_s20  ;;  %v5056_v32 = vld [vmem:[%s4470_s19 + $0x92] sm:$0xff]  ;;  %v723_v54 = vsel %vm721_vm0, %v209_v29, %v4722_v56  ;;  %v5076_v56 = vld [vmem:[%s4470_s19 + $0xc2] sm:$0xff] }
 0x12d   : > { %v5042_v31 = vpop.permute.xlu2 %645  ;;  %v626_v20 = vpop.permute.xlu1 %625  ;;  %7679 = vst [vmem:[#allocation73_spill] sm:$0xff] %v5076_v56  ;;  %v5079_v29 = vld [vmem:[%s4470_s19 + $0xb2] sm:$0xff] }
 0x12e   : > { %v5044_v22 = vpop.permute.xlu0 %559  ;;  %v788_v18 = vsel %vm787_vm3, %v755_v28, %v626_v20 }
 0x12f   : > { %7676 = vst [vmem:[#allocation70_spill] sm:$0xff] %v5044_v22  ;;  %3791 = vmatmul.msk.f32.vlgmr.msra.gmra.mxu0 %vm825_vm2, %v788_v18  ;;  %v756_v18 = vsel %vm754_vm1, %v723_v54, %v4881_v52  ;;  %v724_v52 = vsel %vm721_vm0, %v4617_v30, %v4699_v49  ;;  %v5100_v30 = vld [vmem:[%s4470_s19 + $0xe2] sm:$0xff]  ;;  %v5103_v49 = vld [vmem:[%s4470_s19 + $0xda] sm:$0xff] }
 0x130   : > { %v789_v22 = vsel %vm787_vm3, %v756_v18, %v628_v27  ;;  %7681 = vst [vmem:[#allocation75_spill] sm:$0xff] %v5100_v30 }
 0x133   : > { %1255 = vrot.lane.b32.xlu2 %v5049_v50, %s4423_s20  ;;  %1253 = vrot.lane.b32.xlu1 %v5052_v51, %s4423_s20  ;;  %v5073_v51 = vld [vmem:[%s4470_s19 + $0xca] sm:$0xff] }
 0x134   : > { %1251 = vrot.lane.b32.xlu0 %v5056_v32, %s4423_s20  ;;  %7678 = vst [vmem:[#allocation72_spill] sm:$0xff] %v5073_v51 }
 0x135   : > { %v5068_v28 = vpop.permute.xlu2 %651  ;;  %v632_v20 = vpop.permute.xlu1 %631 }
 0x136   : > { %v630_v25 = vpop.permute.xlu0 %629 }
 0x137   : > { %3792 = vmatmul.msk.f32.gmra.mxu0 %vm825_vm2, %v789_v22  ;;  %v757_v22 = vsel %vm754_vm1, %v724_v52, %v4879_v45  ;;  %v725_v45 = vsel %vm721_vm0, %v4638_v35, %v4720_v55  ;;  %v5125_v35 = vld [vmem:[%s4470_s19 + $0x112] sm:$0xff]  ;;  %v5128_v55 = vld [vmem:[%s4470_s19 + $0x10a] sm:$0xff] }
 0x138   : > { %7682 = vst [vmem:[#allocation76_spill] sm:$0xff] %v5125_v35 }
 0x139   : > { %7683 = vst [vmem:[#allocation77_spill] sm:$0xff] %v5128_v55 }
 0x13b   : > { %1261 = vrot.lane.b32.xlu2 %v5073_v51, %s4423_s20  ;;  %1259 = vrot.lane.b32.xlu1 %v5076_v56, %s4423_s20  ;;  %v790_v51 = vsel %vm787_vm3, %v757_v22, %v630_v25  ;;  %v5097_v56 = vld [vmem:[%s4470_s19 + $0xf2] sm:$0xff] }
 0x13c   : > { %1257 = vrot.lane.b32.xlu0 %v5079_v29, %s4423_s20  ;;  %7680 = vst [vmem:[#allocation74_spill] sm:$0xff] %v5097_v56 }
 0x13d   : > { %v5092_v27 = vpop.permute.xlu2 %657  ;;  %v638_v54 = vpop.permute.xlu1 %637 }
 0x13e   : > { %v636_v18 = vpop.permute.xlu0 %635 }
 0x13f   : > { %3793 = vmatmul.msk.f32.gmra.mxu0 %vm825_vm2, %v790_v51  ;;  %v758_v51 = vsel %vm754_vm1, %v725_v45, %v4841_v57  ;;  %v726_v57 = vsel %vm721_vm0, %v4635_v34, %v4646_v36  ;;  %v5154_v34 = vld [vmem:[%s4470_s19 + $0x13a] sm:$0xff]  ;;  %v5157_v36 = vld [vmem:[%s4470_s19 + $0x12a] sm:$0xff] }
 0x140   : > { %7684 = vst [vmem:[#allocation78_spill] sm:$0xff] %v5154_v34 }
 0x141   : > { %7685 = vst [vmem:[#allocation79_spill] sm:$0xff] %v5157_v36 }
 0x143   : > { %1267 = vrot.lane.b32.xlu2 %v5097_v56, %s4423_s20  ;;  %1265 = vrot.lane.b32.xlu1 %v5100_v30, %s4423_s20  ;;  %v791_v56 = vsel %vm787_vm3, %v758_v51, %v632_v20  ;;  %v5131_v30 = vld [vmem:[%s4470_s19 + $0xfa] sm:$0xff]  ;;  %v759_v20 = vsel %vm754_vm1, %v726_v57, %v4893_v2  ;;  %v727_v2 = vsel %vm721_vm0, %v4632_v33, %v4663_v40  ;;  %v5185_v33 = vld [vmem:[%s4470_s19 + $0x152] sm:$0xff] }
 0x144   : > { %1263 = vrot.lane.b32.xlu0 %v5103_v49, %s4423_s20  ;;  %7688 = vst [vmem:[#allocation82_spill] sm:$0xff] %v5185_v33  ;;  %v5188_v40 = vld [vmem:[%s4470_s19 + $0x142] sm:$0xff] }
 0x145   : > { %v5116_v25 = vpop.permute.xlu2 %663  ;;  %v5118_v52 = vpop.permute.xlu1 %643 }
 0x146   : > { %v5120_v22 = vpop.permute.xlu0 %641 }
 0x147   : > { %3794 = vmatmul.msk.f32.gmra.mxu0 %vm825_vm2, %v791_v56 }
 0x14b   : > { %1273 = vrot.lane.b32.xlu2 %v5125_v35, %s4423_s20  ;;  %1271 = vrot.lane.b32.xlu1 %v5128_v55, %s4423_s20  ;;  %v792_v55 = vsel %vm787_vm3, %v759_v20, %v4995_v21  ;;  %v5160_v35 = vld [vmem:[%s4470_s19 + $0x122] sm:$0xff]  ;;  %v760_v21 = vsel %vm754_vm1, %v727_v2, %v4891_v60  ;;  %v728_v60 = vsel %vm721_vm0, %v4655_v39, %v4743_v62 }
 0x14c   : > { %1269 = vrot.lane.b32.xlu0 %v5131_v30, %s4423_s20  ;;  %v729_v39 = vsel %vm721_vm0, %v4652_v38, %v4741_v61 }
 0x14d   : > { %v5144_v56 = vpop.permute.xlu2 %669  ;;  %v5146_v45 = vpop.permute.xlu1 %649  ;;  %v762_v62 = vsel %vm754_vm1, %v729_v39, %v4905_v17  ;;  %v730_v17 = vsel %vm721_vm0, %v4649_v37, %v4680_v44 }
 0x14e   : > { %v5148_v51 = vpop.permute.xlu0 %647  ;;  %v763_v38 = vsel %vm754_vm1, %v730_v17, %v4903_v46 }
 0x14f   : > { %3795 = vmatmul.msk.f32.gmra.mxu0 %vm825_vm2, %v792_v55 }
 0x153   : > { %1279 = vrot.lane.b32.xlu2 %v5154_v34, %s4423_s20  ;;  %1277 = vrot.lane.b32.xlu1 %v5157_v36, %s4423_s20  ;;  %v793_v34 = vsel %vm787_vm3, %v760_v21, %v636_v18  ;;  %v5182_v36 = vld [vmem:[%s4470_s19 + $0x15a] sm:$0xff]  ;;  %v761_v18 = vsel %vm754_vm1, %v728_v60, %v4853_v63 }
 0x154   : > { %1275 = vrot.lane.b32.xlu0 %v5160_v35, %s4423_s20  ;;  %7687 = vst [vmem:[#allocation81_spill] sm:$0xff] %v5182_v36 }
 0x155   : > { %v5173_v55 = vpop.permute.xlu2 %675  ;;  %v5175_v57 = vpop.permute.xlu1 %655 }
 0x156   : > { %7686 = vst [vmem:[#allocation80_spill] sm:$0xff] %v5173_v55  ;;  %v5177_v20 = vpop.permute.xlu0 %653  ;;  %v5213_v55 = vld [vmem:[%s4470_s19 + $0x16a] sm:$0xff] }
 0x157   : > { %3796 = vmatmul.msk.f32.gmra.mxu0 %vm825_vm2, %v793_v34 }
 0x15b   : > { %1285 = vrot.lane.b32.xlu2 %v5182_v36, %s4423_s20  ;;  %1283 = vrot.lane.b32.xlu1 %v5185_v33, %s4423_s20  ;;  %v794_v36 = vsel %vm787_vm3, %v761_v18, %v638_v54  ;;  %v5210_v33 = vld [vmem:[%s4470_s19 + $0x172] sm:$0xff] }
 0x15c   : > { %1281 = vrot.lane.b32.xlu0 %v5188_v40, %s4423_s20 }
 0x15d   : > { %v5201_v34 = vpop.permute.xlu2 %681  ;;  %v5203_v2 = vpop.permute.xlu1 %661 }
 0x15e   : > { %v5205_v21 = vpop.permute.xlu0 %659 }
 0x15f   : > { %3797 = vmatmul.msk.f32.gmra.mxu0 %vm825_vm2, %v794_v36 }
 0x163   : > { %1355 = vrot.lane.b32.xlu2 %v4476_v1, %s4424_s21  ;;  %1289 = vrot.lane.b32.xlu1 %v5210_v33, %s4423_s20  ;;  %v795_v1 = vsel %vm787_vm3, %v762_v62, %v5016_v24 }
 0x164   : > { %1287 = vrot.lane.b32.xlu0 %v5213_v55, %s4423_s20 }
 0x165   : > { %v5226_v63 = vpop.permute.xlu2 %687  ;;  %v5228_v54 = vpop.permute.xlu1 %667 }
 0x166   : > { %v5230_v36 = vpop.permute.xlu0 %665 }
 0x167   : > { %3798 = vmatmul.msk.f32.gmra.mxu0 %vm825_vm2, %v795_v1 }
 0x16b   : > { %1361 = vrot.lane.b32.xlu2 %v4485_v3, %s4424_s21  ;;  %1359 = vrot.lane.b32.xlu1 %v4473_v0, %s4424_s21  ;;  %v796_v3 = vsel %vm787_vm3, %v763_v38, %v5120_v22  ;;  %v731_v0 = vsel %vm721_vm0, %v4672_v43, %v4764_v59  ;;  %v7692_v22 = vld [vmem:[#allocation21_spill] sm:$0xff] }
 0x16c   : > { %1357 = vrot.lane.b32.xlu0 %v4488_v4, %s4424_s21  ;;  %v764_v4 = vsel %vm754_vm1, %v731_v0, %v4865_v53  ;;  %v5365_v38 = vld [vmem:[%s4470_s19 + $0x111] sm:$0xff]  ;;  %v5371_v0 = vld [vmem:[%s4470_s19 + $0xf9] sm:$0xff] }
 0x16d   : > { %v5246_v61 = vpop.permute.xlu2 %1231  ;;  %v5248_v24 = vpop.permute.xlu1 %673 }
 0x16e   : > { %v5250_v60 = vpop.permute.xlu0 %671 }
 0x16f   : > { %3799 = vmatmul.msk.f32.gmra.mxu0 %vm825_vm2, %v796_v3  ;;  %v5368_v3 = vld [vmem:[%s4470_s19 + $0x109] sm:$0xff] }
 0x173   : > { %1367 = vrot.lane.b32.xlu2 %v4497_v6, %s4424_s21  ;;  %1365 = vrot.lane.b32.xlu1 %v4500_v7, %s4424_s21  ;;  %v797_v6 = vsel %vm787_vm3, %v764_v4, %v5118_v52  ;;  %v732_v7 = vsel %vm721_vm0, %v4669_v42, %v4762_v58  ;;  %v7696_v4 = vld [vmem:[#allocation3_spill] sm:$0xff] }
 0x174   : > { %1363 = vrot.lane.b32.xlu0 %v4503_v8, %s4424_s21  ;;  %v765_v8 = vsel %vm754_vm1, %v732_v7, %v4917_v23 }
 0x175   : > { %v5266_v37 = vpop.permute.xlu2 %1237  ;;  %v5268_v44 = vpop.permute.xlu1 %679 }
 0x176   : > { %v5270_v46 = vpop.permute.xlu0 %677 }
 0x177   : > { %3800 = vmatmul.msk.f32.gmra.mxu0 %vm825_vm2, %v797_v6  ;;  %v7697_v6 = vld [vmem:[#allocation45_spill] sm:$0xff] }
 0x17b   : > { %1373 = vrot.lane.b32.xlu2 %v4512_v9, %s4424_s21  ;;  %1371 = vrot.lane.b32.xlu1 %v4515_v10, %s4424_s21  ;;  %v798_v9 = vsel %vm787_vm3, %v765_v8, %v5042_v31  ;;  %v733_v10 = vsel %vm721_vm0, %v4666_v41, %v4697_v48  ;;  %v7689_v41 = vld [vmem:[#allocation2_spill] sm:$0xff]  ;;  %v7690_v48 = vld [vmem:[#allocation40_spill] sm:$0xff] }
 0x17c   : > { %1369 = vrot.lane.b32.xlu0 %v4518_v11, %s4424_s21  ;;  %v766_v11 = vsel %vm754_vm1, %v733_v10, %v4915_v19 }
 0x17d   : > { %v5286_v43 = vpop.permute.xlu2 %1243  ;;  %v5288_v53 = vpop.permute.xlu1 %685 }
 0x17e   : > { %v5290_v59 = vpop.permute.xlu0 %683 }
 0x17f   : > { %3801 = vmatmul.msk.f32.gmra.mxu0 %vm825_vm2, %v798_v9 }
 0x183   : > { %1379 = vrot.lane.b32.xlu2 %v4527_v12, %s4424_s21  ;;  %1377 = vrot.lane.b32.xlu1 %v4530_v13, %s4424_s21  ;;  %v799_v13 = vsel %vm787_vm3, %v766_v11, %v5148_v51  ;;  %v7693_v51 = vld [vmem:[#allocation4_spill] sm:$0xff] }
 0x184   : > { %1375 = vrot.lane.b32.xlu0 %v4533_v14, %s4424_s21  ;;  %v734_v14 = vsel %vm721_vm0, %v4689_v47, %v4785_v5  ;;  %v5339_v47 = vld [vmem:[%s4470_s19 + $0xe1] sm:$0xff]  ;;  %v5342_v5 = vld [vmem:[%s4470_s19 + $0xd9] sm:$0xff] }
 0x185   : > { %v5306_v42 = vpop.permute.xlu2 %1249  ;;  %v5308_v58 = vpop.permute.xlu1 %1229  ;;  %v767_v19 = vsel %vm754_vm1, %v734_v14, %v7690_v48  ;;  %v5397_v14 = vld [vmem:[%s4470_s19 + $0x129] sm:$0xff] }
 0x186   : > { %v5310_v12 = vpop.permute.xlu0 %1227  ;;  %v7699_v48 = vld [vmem:[#allocation27_spill] sm:$0xff] }
 0x187   : > { %3802 = vmatmul.msk.f32.gmra.mxu0 %vm825_vm2, %v799_v13  ;;  %v5394_v13 = vld [vmem:[%s4470_s19 + $0x139] sm:$0xff] }
 0x18b   : > { %1385 = vrot.lane.b32.xlu2 %v4542_v15, %s4424_s21  ;;  %1383 = vrot.lane.b32.xlu1 %v4545_v16, %s4424_s21  ;;  %v800_v15 = vsel %vm787_vm3, %v767_v19, %v5146_v45  ;;  %v5336_v16 = vld [vmem:[%s4470_s19 + $0xf1] sm:$0xff]  ;;  %v735_v45 = vsel %vm721_vm0, %v7693_v51, %v7692_v22  ;;  %v7700_v19 = vld [vmem:[#allocation7_spill] sm:$0xff] }
 0x18c   : > { %1381 = vrot.lane.b32.xlu0 %v7689_v41, %s4424_s21  ;;  %v768_v18 = vsel %vm754_vm1, %v735_v45, %v4929_v26  ;;  %v7695_v26 = vld [vmem:[#allocation8_spill] sm:$0xff]  ;;  %v5400_v41 = vld [vmem:[%s4470_s19 + $0x121] sm:$0xff] }
 0x18d   : > { %v5326_v23 = vpop.permute.xlu2 %1255  ;;  %v5328_v31 = vpop.permute.xlu1 %1235  ;;  %v801_v17 = vsel %vm787_vm3, %v768_v18, %v5068_v28  ;;  %v736_v28 = vsel %vm721_vm0, %v7696_v4, %v7695_v26  ;;  %v5423_v26 = vld [vmem:[%s4470_s19 + $0x159] sm:$0xff]  ;;  %v5426_v4 = vld [vmem:[%s4470_s19 + $0x151] sm:$0xff] }
 0x18e   : > { %7691 = vst [vmem:[#allocation2_spill] sm:$0xff] %v5326_v23  ;;  %v5330_v52 = vpop.permute.xlu0 %1233  ;;  %v769_v7 = vsel %vm754_vm1, %v736_v28, %v7697_v6  ;;  %v5429_v28 = vld [vmem:[%s4470_s19 + $0x141] sm:$0xff]  ;;  %v5435_v6 = vld [vmem:[%s7557_s2] ss:$0 sm:$0xff] }
 0x18f   : > { %3803 = vmatmul.msk.f32.gmra.mxu0 %vm825_vm2, %v800_v15  ;;  %v802_v11 = vsel %vm787_vm3, %v769_v7, %v5177_v20  ;;  %v737_v20 = vsel %vm721_vm0, %v7700_v19, %v7699_v48  ;;  %v7701_v15 = vld [vmem:[#allocation41_spill] sm:$0xff]  ;;  %v7704_v7 = vld [vmem:[#allocation6_spill] sm:$0xff]  ;;  %v7705_v19 = vld [vmem:[#allocation48_spill] sm:$0xff] }
 0x190   : > { %v770_v22 = vsel %vm754_vm1, %v737_v20, %v7701_v15 }
 0x193   : > { %1391 = vrot.lane.b32.xlu2 %v5336_v16, %s4424_s21  ;;  %1389 = vrot.lane.b32.xlu1 %v5339_v47, %s4424_s21 }
 0x194   : > { %1387 = vrot.lane.b32.xlu0 %v5342_v5, %s4424_s21 }
 0x195   : > { %v5355_v39 = vpop.permute.xlu2 %1261  ;;  %v5357_v62 = vpop.permute.xlu1 %1241 }
 0x196   : > { %7694 = vst [vmem:[#allocation40_spill] sm:$0xff] %v5355_v39  ;;  %v5359_v1 = vpop.permute.xlu0 %1239 }
 0x197   : > { %3804 = vmatmul.msk.f32.gmra.mxu0 %vm825_vm2, %v801_v17  ;;  %v803_v17 = vsel %vm787_vm3, %v770_v22, %v5175_v57  ;;  %v7703_v57 = vld [vmem:[#allocation26_spill] sm:$0xff] }
 0x19b   : > { %1397 = vrot.lane.b32.xlu2 %v5365_v38, %s4424_s21  ;;  %1395 = vrot.lane.b32.xlu1 %v5368_v3, %s4424_s21 }
 0x19c   : > { %1393 = vrot.lane.b32.xlu0 %v5371_v0, %s4424_s21 }
 0x19d   : > { %v5384_v8 = vpop.permute.xlu2 %1267  ;;  %v5386_v9 = vpop.permute.xlu1 %1247 }
 0x19e   : > { %7698 = vst [vmem:[#allocation21_spill] sm:$0xff] %v5384_v8  ;;  %v5388_v10 = vpop.permute.xlu0 %1245  ;;  %v5469_v8 = vld [vmem:[%s4470_s19 + $0x169] sm:$0xff] }
 0x19f   : > { %3805 = vmatmul.msk.f32.gmra.mxu0 %vm825_vm2, %v802_v11  ;;  %v738_v11 = vsel %vm721_vm0, %v7704_v7, %v7703_v57 }
 0x1a0   : > { %v771_v20 = vsel %vm754_vm1, %v738_v11, %v7705_v19  ;;  %v7709_v11 = vld [vmem:[#allocation50_spill] sm:$0xff]  ;;  %v7711_v19 = vld [vmem:[#allocation5_spill] sm:$0xff] }
 0x1a1   : > { %v804_v7 = vsel %vm787_vm3, %v771_v20, %v5092_v27  ;;  %v7712_v20 = vld [vmem:[#allocation47_spill] sm:$0xff] }
 0x1a3   : > { %1403 = vrot.lane.b32.xlu2 %v5394_v13, %s4424_s21  ;;  %1401 = vrot.lane.b32.xlu1 %v5397_v14, %s4424_s21 }
 0x1a4   : > { %1399 = vrot.lane.b32.xlu0 %v5400_v41, %s4424_s21 }
 0x1a5   : > { %v5413_v51 = vpop.permute.xlu2 %1273  ;;  %v5415_v45 = vpop.permute.xlu1 %1253 }
 0x1a6   : > { %7702 = vst [vmem:[#allocation4_spill] sm:$0xff] %v5413_v51  ;;  %v5417_v18 = vpop.permute.xlu0 %1251  ;;  %v5466_v51 = vld [vmem:[%s4470_s19 + $0x171] sm:$0xff] }
 0x1a7   : > { %3806 = vmatmul.msk.f32.gmra.mxu0 %vm825_vm2, %v803_v17 }
 0x1ab   : > { %1409 = vrot.lane.b32.xlu2 %v5423_v26, %s4424_s21  ;;  %1407 = vrot.lane.b32.xlu1 %v5426_v4, %s4424_s21 }
 0x1ac   : > { %1405 = vrot.lane.b32.xlu0 %v5429_v28, %s4424_s21  ;;  %v939_v48 = vpop.f32.mrf.mxu0 }
 0x1ad   : > { %v940_v15 = vadd.f32 %v5435_v6, %v939_v48  ;;  %v5454_v22 = vpop.permute.xlu2 %1279  ;;  %v5456_v17 = vpop.permute.xlu1 %1259  ;;  %v7710_v48 = vld [vmem:[#allocation12_spill] sm:$0xff] }
 0x1ae   : > { %7706 = vst [vmem:[#allocation8_spill] sm:$0xff] %v5454_v22  ;;  %v5458_v57 = vpop.permute.xlu0 %1257  ;;  %v739_v22 = vsel %vm721_vm0, %v7711_v19, %v7710_v48  ;;  %v7716_v48 = vld [vmem:[#allocation59_spill] sm:$0xff] }
 0x1af   : > { %7707 = vst [vmem:[#allocation3_spill] sm:$0xff] %v5456_v17  ;;  %3807 = vmatmul.msk.f32.gmra.mxu0 %vm825_vm2, %v804_v7  ;;  %v7718_v19 = vld [vmem:[#allocation31_spill] sm:$0xff] }
 0x1b0   : > { %7708 = vst [vmem:[#allocation45_spill] sm:$0xff] %v5458_v57 }
 0x1b1   : > { %1035 = vst.msk [vmem:[%s5449_s5] sm:$0xff] %vm721_vm0, %v940_v15  ;;  %v772_v15 = vsel %vm754_vm1, %v739_v22, %v7712_v20  ;;  %v7717_v22 = vld [vmem:[#allocation54_spill] sm:$0xff] }
 0x1b2   : > { %v805_v57 = vsel %vm787_vm3, %v772_v15, %v5205_v21 }
 0x1b3   : > { %1415 = vrot.lane.b32.xlu2 %v7709_v11, %s4424_s21  ;;  %1413 = vrot.lane.b32.xlu1 %v5466_v51, %s4424_s21 }
 0x1b4   : > { %1411 = vrot.lane.b32.xlu0 %v5469_v8, %s4424_s21  ;;  %v942_v27 = vpop.f32.mrf.mxu0 }
 0x1b5   : > { %v943_v7 = vadd.f32 %v5435_v6, %v942_v27  ;;  %v5483_v39 = vpop.permute.xlu2 %1285  ;;  %v5485_v17 = vpop.permute.xlu1 %1265  ;;  %v7719_v27 = vld [vmem:[#allocation11_spill] sm:$0xff] }
 0x1b6   : > { %7713 = vst [vmem:[#allocation27_spill] sm:$0xff] %v5483_v39  ;;  %v5487_v11 = vpop.permute.xlu0 %1263  ;;  %v740_v20 = vsel %vm721_vm0, %v7719_v27, %v7718_v19  ;;  %v7720_v39 = vld [vmem:[#allocation49_spill] sm:$0xff]  ;;  %v7727_v19 = vld [vmem:[#allocation10_spill] sm:$0xff] }
 0x1b7   : > { %7714 = vst [vmem:[#allocation7_spill] sm:$0xff] %v5485_v17  ;;  %3808 = vmatmul.msk.f32.gmra.mxu0 %vm825_vm2, %v805_v57 }
 0x1b8   : > { %7715 = vst [vmem:[#allocation41_spill] sm:$0xff] %v5487_v11  ;;  %v7721_v11 = vld [vmem:[#allocation42_spill] sm:$0xff] }
 0x1b9   : > { %1036 = vst.msk [vmem:[%s5449_s5 + $0x8] sm:$0xff] %vm721_vm0, %v943_v7  ;;  %v773_v21 = vsel %vm754_vm1, %v740_v20, %v7721_v11  ;;  %v7725_v11 = vld [vmem:[#allocation57_spill] sm:$0xff]  ;;  %v7728_v20 = vld [vmem:[#allocation58_spill] sm:$0xff] }
 0x1bb   : > { %1485 = vrot.lane.b32.xlu2 %v7716_v48, %s4425_s22  ;;  %1483 = vrot.lane.b32.xlu1 %v7717_v22, %s4425_s22  ;;  %v806_v22 = vsel %vm787_vm3, %v773_v21, %v5203_v2 }
 0x1bc   : > { %1417 = vrot.lane.b32.xlu0 %v7720_v39, %s4424_s21  ;;  %v945_v17 = vpop.f32.mrf.mxu0  ;;  %v7724_v39 = vld [vmem:[#allocation64_spill] sm:$0xff] }
 0x1bd   : > { %v946_v15 = vadd.f32 %v5435_v6, %v945_v17  ;;  %v5506_v57 = vpop.permute.xlu2 %1355  ;;  %v5508_v7 = vpop.permute.xlu1 %1271  ;;  %v7726_v17 = vld [vmem:[#allocation30_spill] sm:$0xff] }
 0x1be   : > { %7722 = vst [vmem:[#allocation26_spill] sm:$0xff] %v5508_v7  ;;  %v5510_v48 = vpop.permute.xlu0 %1269  ;;  %v741_v27 = vsel %vm721_vm0, %v7727_v19, %v7726_v17  ;;  %v7732_v17 = vld [vmem:[#allocation69_spill] sm:$0xff] }
 0x1bf   : > { %7723 = vst [vmem:[#allocation6_spill] sm:$0xff] %v5510_v48  ;;  %3809 = vmatmul.msk.f32.gmra.mxu0 %vm825_vm2, %v806_v22  ;;  %v7729_v48 = vld [vmem:[#allocation53_spill] sm:$0xff] }
 0x1c0   : > { %1037 = vst.msk [vmem:[%s5449_s5 + $0x10] sm:$0xff] %vm721_vm0, %v946_v15  ;;  %v774_v2 = vsel %vm754_vm1, %v741_v27, %v7729_v48  ;;  %v7733_v48 = vld [vmem:[#allocation62_spill] sm:$0xff]  ;;  %v7735_v19 = vld [vmem:[#allocation9_spill] sm:$0xff] }
 0x1c3   : > { %1491 = vrot.lane.b32.xlu2 %v7724_v39, %s4425_s22  ;;  %1489 = vrot.lane.b32.xlu1 %v7725_v11, %s4425_s22  ;;  %v807_v11 = vsel %vm787_vm3, %v774_v2, %v5116_v25 }
 0x1c4   : > { %1487 = vrot.lane.b32.xlu0 %v7728_v20, %s4425_s22  ;;  %v948_v7 = vpop.f32.mrf.mxu0  ;;  %v7736_v20 = vld [vmem:[#allocation63_spill] sm:$0xff] }
 0x1c5   : > { %v949_v21 = vadd.f32 %v5435_v6, %v948_v7  ;;  %v5529_v15 = vpop.permute.xlu2 %1361  ;;  %v5531_v22 = vpop.permute.xlu1 %1277  ;;  %v7734_v7 = vld [vmem:[#allocation16_spill] sm:$0xff] }
 0x1c6   : > { %7730 = vst [vmem:[#allocation48_spill] sm:$0xff] %v5531_v22  ;;  %v5533_v39 = vpop.permute.xlu0 %1275  ;;  %v742_v27 = vsel %vm721_vm0, %v7735_v19, %v7734_v7  ;;  %v7742_v7 = vld [vmem:[#allocation15_spill] sm:$0xff] }
 0x1c7   : > { %7731 = vst [vmem:[#allocation50_spill] sm:$0xff] %v5533_v39  ;;  %3810 = vmatmul.msk.f32.gmra.mxu0 %vm825_vm2, %v807_v11  ;;  %v7737_v39 = vld [vmem:[#allocation52_spill] sm:$0xff] }
 0x1c8   : > { %1038 = vst.msk [vmem:[%s5449_s5 + $0x18] sm:$0xff] %vm721_vm0, %v949_v21  ;;  %v775_v25 = vsel %vm754_vm1, %v742_v27, %v7737_v39  ;;  %v7740_v39 = vld [vmem:[#allocation67_spill] sm:$0xff]  ;;  %v7743_v27 = vld [vmem:[#allocation68_spill] sm:$0xff] }
 0x1cb   : > { %1497 = vrot.lane.b32.xlu2 %v7732_v17, %s4425_s22  ;;  %1495 = vrot.lane.b32.xlu1 %v7733_v48, %s4425_s22  ;;  %v808_v48 = vsel %vm787_vm3, %v775_v25, %v5230_v36 }
 0x1cc   : > { %1493 = vrot.lane.b32.xlu0 %v7736_v20, %s4425_s22  ;;  %v951_v22 = vpop.f32.mrf.mxu0 }
 0x1cd   : > { %v952_v2 = vadd.f32 %v5435_v6, %v951_v22  ;;  %v5552_v21 = vpop.permute.xlu2 %1367  ;;  %v5554_v11 = vpop.permute.xlu1 %1283  ;;  %v7741_v22 = vld [vmem:[#allocation33_spill] sm:$0xff] }
 0x1ce   : > { %7738 = vst [vmem:[#allocation12_spill] sm:$0xff] %v5554_v11  ;;  %v5556_v17 = vpop.permute.xlu0 %1281  ;;  %v743_v19 = vsel %vm721_vm0, %v7742_v7, %v7741_v22  ;;  %v7744_v11 = vld [vmem:[#allocation43_spill] sm:$0xff]  ;;  %v7748_v22 = vld [vmem:[#allocation14_spill] sm:$0xff] }
 0x1cf   : > { %7739 = vst [vmem:[#allocation5_spill] sm:$0xff] %v5556_v17  ;;  %3811 = vmatmul.msk.f32.gmra.mxu0 %vm825_vm2, %v808_v48  ;;  %v776_v36 = vsel %vm754_vm1, %v743_v19, %v7744_v11  ;;  %v7747_v11 = vld [vmem:[#allocation32_spill] sm:$0xff]  ;;  %v7749_v19 = vld [vmem:[#allocation71_spill] sm:$0xff] }
 0x1d0   : > { %1039 = vst.msk [vmem:[%s5449_s5 + $0x20] sm:$0xff] %vm721_vm0, %v952_v2  ;;  %v744_v7 = vsel %vm721_vm0, %v7748_v22, %v7747_v11  ;;  %v7751_v11 = vld [vmem:[#allocation72_spill] sm:$0xff] }
 0x1d1   : > { %v7752_v22 = vld [vmem:[#allocation20_spill] sm:$0xff] }
 0x1d3   : > { %1503 = vrot.lane.b32.xlu2 %v5056_v32, %s4425_s22  ;;  %1501 = vrot.lane.b32.xlu1 %v7740_v39, %s4425_s22  ;;  %v809_v39 = vsel %vm787_vm3, %v776_v36, %v5228_v54 }
 0x1d4   : > { %1499 = vrot.lane.b32.xlu0 %v7743_v27, %s4425_s22  ;;  %v954_v20 = vpop.f32.mrf.mxu0 }
 0x1d5   : > { %v955_v25 = vadd.f32 %v5435_v6, %v954_v20  ;;  %v5575_v2 = vpop.permute.xlu2 %1373  ;;  %v5577_v48 = vpop.permute.xlu1 %1289  ;;  %v7750_v20 = vld [vmem:[#allocation56_spill] sm:$0xff] }
 0x1d6   : > { %7745 = vst [vmem:[#allocation47_spill] sm:$0xff] %v5577_v48  ;;  %v5579_v32 = vpop.permute.xlu0 %1287  ;;  %v777_v54 = vsel %vm754_vm1, %v744_v7, %v7750_v20  ;;  %v7753_v7 = vld [vmem:[#allocation13_spill] sm:$0xff]  ;;  %v7755_v48 = vld [vmem:[#allocation55_spill] sm:$0xff] }
 0x1d7   : > { %7746 = vst [vmem:[#allocation59_spill] sm:$0xff] %v5579_v32  ;;  %3812 = vmatmul.msk.f32.gmra.mxu0 %vm825_vm2, %v809_v39  ;;  %v7761_v32 = vld [vmem:[#allocation44_spill] sm:$0xff] }
 0x1d8   : > { %1040 = vst.msk [vmem:[%s5449_s5 + $0x28] sm:$0xff] %vm721_vm0, %v955_v25 }
 0x1db   : > { %1509 = vrot.lane.b32.xlu2 %v5079_v29, %s4425_s22  ;;  %1507 = vrot.lane.b32.xlu1 %v5049_v50, %s4425_s22  ;;  %v810_v50 = vsel %vm787_vm3, %v777_v54, %v5144_v56 }
 0x1dc   : > { %1505 = vrot.lane.b32.xlu0 %v7749_v19, %s4425_s22  ;;  %v957_v27 = vpop.f32.mrf.mxu0  ;;  %v745_v19 = vsel %vm721_vm0, %v7753_v7, %v7752_v22  ;;  %v7758_v22 = vld [vmem:[#allocation35_spill] sm:$0xff] }
 0x1dd   : > { %v958_v36 = vadd.f32 %v5435_v6, %v957_v27  ;;  %v5598_v25 = vpop.permute.xlu2 %1379  ;;  %v5600_v39 = vpop.permute.xlu1 %1359  ;;  %v7754_v27 = vld [vmem:[#allocation73_spill] sm:$0xff]  ;;  %v778_v56 = vsel %vm754_vm1, %v745_v19, %v7755_v48  ;;  %v7757_v48 = vld [vmem:[#allocation74_spill] sm:$0xff]  ;;  %v7759_v7 = vld [vmem:[#allocation19_spill] sm:$0xff] }
 0x1de   : > { %v5602_v29 = vpop.permute.xlu0 %1357  ;;  %v746_v19 = vsel %vm721_vm0, %v7759_v7, %v7758_v22  ;;  %v7764_v22 = vld [vmem:[#allocation34_spill] sm:$0xff] }
 0x1df   : > { %1041 = vst.msk [vmem:[%s5449_s5 + $0x30] sm:$0xff] %vm721_vm0, %v958_v36  ;;  %3813 = vmatmul.msk.f32.gmra.mxu0 %vm825_vm2, %v810_v50  ;;  %v7765_v7 = vld [vmem:[#allocation18_spill] sm:$0xff] }
 0x1e3   : > { %1515 = vrot.lane.b32.xlu2 %v5103_v49, %s4425_s22  ;;  %1513 = vrot.lane.b32.xlu1 %v7751_v11, %s4425_s22  ;;  %v811_v11 = vsel %vm787_vm3, %v778_v56, %v5250_v60  ;;  %v779_v60 = vsel %vm754_vm1, %v746_v19, %v7761_v32  ;;  %v7763_v32 = vld [vmem:[#allocation76_spill] sm:$0xff]  ;;  %v747_v19 = vsel %vm721_vm0, %v7765_v7, %v7764_v22  ;;  %v7770_v22 = vld [vmem:[#allocation78_spill] sm:$0xff]  ;;  %v7771_v7 = vld [vmem:[#allocation25_spill] sm:$0xff] }
 0x1e4   : > { %1511 = vrot.lane.b32.xlu0 %v7754_v27, %s4425_s22  ;;  %v960_v20 = vpop.f32.mrf.mxu0  ;;  %v7760_v27 = vld [vmem:[#allocation75_spill] sm:$0xff] }
 0x1e5   : > { %v961_v54 = vadd.f32 %v5435_v6, %v960_v20  ;;  %v5621_v36 = vpop.permute.xlu2 %1385  ;;  %v5623_v50 = vpop.permute.xlu1 %1365 }
 0x1e6   : > { %7756 = vst [vmem:[#allocation54_spill] sm:$0xff] %v5621_v36  ;;  %v5625_v49 = vpop.permute.xlu0 %1363 }
 0x1e7   : > { %1042 = vst.msk [vmem:[%s5449_s5 + $0x38] sm:$0xff] %vm721_vm0, %v961_v54  ;;  %3814 = vmatmul.msk.f32.gmra.mxu0 %vm825_vm2, %v811_v11 }
 0x1eb   : > { %1521 = vrot.lane.b32.xlu2 %v5131_v30, %s4425_s22  ;;  %1519 = vrot.lane.b32.xlu1 %v7757_v48, %s4425_s22  ;;  %v812_v30 = vsel %vm787_vm3, %v779_v60, %v5248_v24 }
 0x1ec   : > { %1517 = vrot.lane.b32.xlu0 %v7760_v27, %s4425_s22  ;;  %v963_v20 = vpop.f32.mrf.mxu0  ;;  %v7766_v27 = vld [vmem:[#allocation77_spill] sm:$0xff] }
 0x1ed   : > { %v964_v56 = vadd.f32 %v5435_v6, %v963_v20  ;;  %v5644_v54 = vpop.permute.xlu2 %1391  ;;  %v5646_v11 = vpop.permute.xlu1 %1371  ;;  %v7767_v20 = vld [vmem:[#allocation61_spill] sm:$0xff] }
 0x1ee   : > { %7762 = vst [vmem:[#allocation31_spill] sm:$0xff] %v5644_v54  ;;  %v5650_v48 = vpop.permute.xlu0 %1369  ;;  %v780_v60 = vsel %vm754_vm1, %v747_v19, %v7767_v20  ;;  %v7772_v19 = vld [vmem:[#allocation17_spill] sm:$0xff] }
 0x1ef   : > { %1043 = vst.msk [vmem:[%s5449_s5 + $0x40] sm:$0xff] %vm721_vm0, %v964_v56  ;;  %3815 = vmatmul.msk.f32.gmra.mxu0 %vm825_vm2, %v812_v30 }
 0x1f3   : > { %1527 = vrot.lane.b32.xlu2 %v5160_v35, %s4425_s22  ;;  %1525 = vrot.lane.b32.xlu1 %v7763_v32, %s4425_s22  ;;  %v7769_v35 = vld [vmem:[#allocation80_spill] sm:$0xff] }
 0x1f4   : > { %1523 = vrot.lane.b32.xlu0 %v7766_v27, %s4425_s22  ;;  %v966_v24 = vpop.f32.mrf.mxu0  ;;  %v813_v32 = vsel %vm787_vm3, %v780_v60, %v7769_v35  ;;  %v748_v27 = vsel %vm721_vm0, %v7772_v19, %v7771_v7  ;;  %v7774_v60 = vld [vmem:[#allocation60_spill] sm:$0xff]  ;;  %v7777_v7 = vld [vmem:[#allocation81_spill] sm:$0xff] }
 0x1f5   : > { %v967_v56 = vadd.f32 %v5435_v6, %v966_v24  ;;  %v5667_v30 = vpop.permute.xlu2 %1397  ;;  %v5669_v17 = vpop.permute.xlu1 %1377  ;;  %v7773_v24 = vld [vmem:[#allocation79_spill] sm:$0xff]  ;;  %v781_v35 = vsel %vm754_vm1, %v748_v27, %v7774_v60  ;;  %v7778_v19 = vld [vmem:[#allocation37_spill] sm:$0xff]  ;;  %v7779_v27 = vld [vmem:[#allocation24_spill] sm:$0xff] }
 0x1f6   : > { %7768 = vst [vmem:[#allocation11_spill] sm:$0xff] %v5667_v30  ;;  %v5673_v54 = vpop.permute.xlu0 %1375  ;;  %v7781_v60 = vld [vmem:[#allocation46_spill] sm:$0xff] }
 0x1f7   : > { %1044 = vst.msk [vmem:[%s5449_s5 + $0x48] sm:$0xff] %vm721_vm0, %v967_v56  ;;  %3816 = vmatmul.msk.f32.gmra.mxu0 %vm825_vm2, %v813_v32 }
 0x1fb   : > { %1533 = vrot.lane.b32.xlu2 %v5188_v40, %s4425_s22  ;;  %1531 = vrot.lane.b32.xlu1 %v7770_v22, %s4425_s22  ;;  %v814_v40 = vsel %vm787_vm3, %v781_v35, %v5270_v46  ;;  %v7780_v46 = vld [vmem:[#allocation82_spill] sm:$0xff] }
 0x1fc   : > { %1529 = vrot.lane.b32.xlu0 %v7773_v24, %s4425_s22  ;;  %v969_v20 = vpop.f32.mrf.mxu0  ;;  %v749_v24 = vsel %vm721_vm0, %v7779_v27, %v7778_v19  ;;  %v3886_v19 = vld [vmem:[%s4470_s19 + $0x18a] sm:$0xff]  ;;  %v3885_v27 = vld [vmem:[%s4470_s19 + $0x182] sm:$0xff] }
 0x1fd   : > { %v970_v56 = vadd.f32 %v5435_v6, %v969_v20  ;;  %v5690_v32 = vpop.permute.xlu2 %1403  ;;  %v5692_v30 = vpop.permute.xlu1 %1383  ;;  %v782_v35 = vsel %vm754_vm1, %v749_v24, %v7781_v60  ;;  %v7785_v24 = vld [vmem:[#allocation36_spill] sm:$0xff]  ;;  %v3888_v60 = vld [vmem:[%s7556_s1 + $0x18] sm:$0xff] }
 0x1fe   : > { %7775 = vst [vmem:[#allocation49_spill] sm:$0xff] %v5690_v32  ;;  %v5696_v22 = vpop.permute.xlu0 %1381  ;;  %1788 = vmatpush.msra.mxu1 %v3888_v60  ;;  %v5758_v60 = vld [vmem:[%s4470_s19 + $0x21] sm:$0xff] }
 0x1ff   : > { %7776 = vst [vmem:[#allocation42_spill] sm:$0xff] %v5692_v30  ;;  %3817 = vmatmul.msk.f32.gmra.mxu0 %vm825_vm2, %v814_v40 }
 0x200   : > { %1045 = vst.msk [vmem:[%s5449_s5 + $0x50] sm:$0xff] %vm721_vm0, %v970_v56 }
 0x203   : > { %1539 = vrot.lane.b32.xlu2 %v5213_v55, %s4425_s22  ;;  %1537 = vrot.lane.b32.xlu1 %v7777_v7, %s4425_s22  ;;  %v815_v55 = vsel %vm787_vm3, %v782_v35, %v5268_v44  ;;  %v7787_v35 = vld [vmem:[#allocation66_spill] sm:$0xff] }
 0x204   : > { %1535 = vrot.lane.b32.xlu0 %v7780_v46, %s4425_s22  ;;  %v972_v20 = vpop.f32.mrf.mxu0  ;;  %v7786_v46 = vld [vmem:[#allocation23_spill] sm:$0xff] }
 0x205   : > { %v973_v56 = vadd.f32 %v5435_v6, %v972_v20  ;;  %v5713_v40 = vpop.permute.xlu2 %1409  ;;  %v5715_v32 = vpop.permute.xlu1 %1389  ;;  %v750_v20 = vsel %vm721_vm0, %v7786_v46, %v7785_v24  ;;  %v3887_v46 = vld [vmem:[%s7556_s1 + $0x10] sm:$0xff] }
 0x206   : > { %7782 = vst [vmem:[#allocation64_spill] sm:$0xff] %v5713_v40  ;;  %v5719_v7 = vpop.permute.xlu0 %1387  ;;  %1789 = vmatpush.msra.mxu1 %v3887_v46 }
 0x207   : > { %7783 = vst [vmem:[#allocation57_spill] sm:$0xff] %v5715_v32  ;;  %3818 = vmatmul.msk.f32.gmra.mxu0 %vm825_vm2, %v815_v55 }
 0x208   : > { %7784 = vst [vmem:[#allocation30_spill] sm:$0xff] %v5719_v7 }
 0x209   : > { %1046 = vst.msk [vmem:[%s5449_s5 + $0x58] sm:$0xff] %vm721_vm0, %v973_v56  ;;  %v783_v56 = vsel %vm754_vm1, %v750_v20, %v7787_v35  ;;  %v3985_v20 = vld [vmem:[%s4470_s19 + $0x19] sm:$0xff] }
 0x20a   : > { %v816_v24 = vsel %vm787_vm3, %v783_v56, %v5201_v34  ;;  %v7791_v34 = vld [vmem:[#allocation29_spill] sm:$0xff]  ;;  %v7792_v35 = vld [vmem:[#allocation22_spill] sm:$0xff] }
 0x20b   : > { %1545 = vrot.lane.b32.xlu2 %v3886_v19, %s4425_s22  ;;  %1543 = vrot.lane.b32.xlu1 %v3885_v27, %s4425_s22  ;;  %v751_v56 = vsel %vm721_vm0, %v7792_v35, %v7791_v34  ;;  %v5786_v34 = vld [vmem:[%s4470_s19 + $0x51] sm:$0xff]  ;;  %v5789_v35 = vld [vmem:[%s4470_s19 + $0x49] sm:$0xff] }
 0x20c   : > { %1541 = vrot.lane.b32.xlu0 %v5210_v33, %s4425_s22  ;;  %v975_v44 = vpop.f32.mrf.mxu0 }
 0x20d   : > { %v976_v55 = vadd.f32 %v5435_v6, %v975_v44  ;;  %v5739_v19 = vpop.permute.xlu2 %1415  ;;  %v5741_v27 = vpop.permute.xlu1 %1395  ;;  %v5755_v44 = vld [vmem:[%s4470_s19 + $0x31] sm:$0xff] }
 0x20e   : > { %7788 = vst [vmem:[#allocation10_spill] sm:$0xff] %v5739_v19  ;;  %v5745_v33 = vpop.permute.xlu0 %1393 }
 0x20f   : > { %7789 = vst [vmem:[#allocation58_spill] sm:$0xff] %v5741_v27  ;;  %3819 = vmatmul.msk.f32.gmra.mxu0 %vm825_vm2, %v816_v24  ;;  %v7793_v24 = vld [vmem:[#allocation65_spill] sm:$0xff] }
 0x210   : > { %7790 = vst [vmem:[#allocation53_spill] sm:$0xff] %v5745_v33  ;;  %v784_v46 = vsel %vm754_vm1, %v751_v56, %v7793_v24 }
 0x211   : > { %1047 = vst.msk [vmem:[%s5449_s5 + $0x60] sm:$0xff] %vm721_vm0, %v976_v55  ;;  %v817_v33 = vsel %vm787_vm3, %v784_v46, %v5290_v59  ;;  %v7797_v59 = vld [vmem:[#allocation39_spill] sm:$0xff] }
 0x213   : > { %2085 = vrot.lane.b32.xlu2 %v5755_v44, %s4423_s20  ;;  %2083 = vrot.lane.b32.xlu1 %v5758_v60, %s4423_s20 }
 0x214   : > { %2081 = vrot.lane.b32.xlu0 %v3985_v20, %s4423_s20  ;;  %v978_v55 = vpop.f32.mrf.mxu0  ;;  %v5783_v20 = vld [vmem:[%s4470_s19 + $0x39] sm:$0xff] }
 0x215   : > { %v979_v19 = vadd.f32 %v5435_v6, %v978_v55  ;;  %v5771_v40 = vpop.permute.xlu2 %1485  ;;  %v5773_v27 = vpop.permute.xlu1 %1401  ;;  %7796 = vst [vmem:[#allocation16_spill] sm:$0xff] %v5783_v20  ;;  %v7799_v55 = vld [vmem:[#allocation51_spill] sm:$0xff] }
 0x216   : > { %7794 = vst [vmem:[#allocation69_spill] sm:$0xff] %v5773_v27  ;;  %v5777_v32 = vpop.permute.xlu0 %1399 }
 0x217   : > { %7795 = vst [vmem:[#allocation62_spill] sm:$0xff] %v5777_v32  ;;  %3820 = vmatmul.msk.f32.gmra.mxu0 %vm825_vm2, %v817_v33 }
 0x218   : > { %1048 = vst.msk [vmem:[%s5449_s5 + $0x68] sm:$0xff] %vm721_vm0, %v979_v19  ;;  %v7798_v19 = vld [vmem:[#allocation28_spill] sm:$0xff] }
 0x219   : > { %v752_v56 = vsel %vm721_vm0, %v7798_v19, %v7797_v59  ;;  %v5815_v59 = vld [vmem:[%s4470_s19 + $0x61] sm:$0xff]  ;;  %v5818_v19 = vld [vmem:[%s4470_s19 + $0x79] sm:$0xff] }
 0x21a   : > { %v785_v24 = vsel %vm754_vm1, %v752_v56, %v7799_v55  ;;  %7802 = vst [vmem:[#allocation52_spill] sm:$0xff] %v5815_v59  ;;  %v5821_v56 = vld [vmem:[%s4470_s19 + $0x69] sm:$0xff] }
 0x21b   : > { %2091 = vrot.lane.b32.xlu2 %v5786_v34, %s4423_s20  ;;  %2089 = vrot.lane.b32.xlu1 %v5789_v35, %s4423_s20  ;;  %v818_v7 = vsel %vm787_vm3, %v785_v24, %v5288_v53  ;;  %v4373_v53 = vld [vmem:[%s4470_s19 + $0x170] sm:$0xff]  ;;  %v7804_v24 = vld [vmem:[#allocation70_spill] sm:$0xff] }
 0x21c   : > { %2087 = vrot.lane.b32.xlu0 %v5783_v20, %s4423_s20  ;;  %v981_v33 = vpop.f32.mrf.mxu0 }
 0x21d   : > { %v982_v46 = vadd.f32 %v5435_v6, %v981_v33  ;;  %v5803_v27 = vpop.permute.xlu2 %1491  ;;  %v5805_v32 = vpop.permute.xlu1 %1407  ;;  %v7803_v33 = vld [vmem:[#allocation38_spill] sm:$0xff] }
 0x21e   : > { %7800 = vst [vmem:[#allocation9_spill] sm:$0xff] %v5805_v32  ;;  %v5809_v36 = vpop.permute.xlu0 %1405 }
 0x21f   : > { %7801 = vst [vmem:[#allocation63_spill] sm:$0xff] %v5809_v36  ;;  %3821 = vmatmul.msk.f32.gmra.mxu0 %vm825_vm2, %v818_v7  ;;  %v753_v7 = vsel %vm721_vm0, %v4373_v53, %v7803_v33  ;;  %v1067_v53 = vld [vmem:[%s4470_s19 + $0x1] sm:$0xff] }
 0x220   : > { %1049 = vst.msk [vmem:[%s5449_s5 + $0x70] sm:$0xff] %vm721_vm0, %v982_v46  ;;  %v786_v46 = vsel %vm754_vm1, %v753_v7, %v7804_v24  ;;  %v5848_v33 = vld [vmem:[%s4470_s19 + $0x81] sm:$0xff]  ;;  %v5851_v7 = vld [vmem:[%s4470_s19 + $0x99] sm:$0xff] }
 0x221   : > { %v819_v30 = vsel %vm787_vm3, %v786_v46, %v5226_v63  ;;  %7807 = vst [vmem:[#allocation15_spill] sm:$0xff] %v5848_v33  ;;  %v1579_v63 = vsel %vm721_vm0, %v1067_v53, %v5310_v12  ;;  %v1068_v12 = vld [vmem:[%s4470_s19 + $0x9] sm:$0xff]  ;;  %v5877_v53 = vld [vmem:[%s4470_s19 + $0xc1] sm:$0xff] }
 0x222   : > { %7809 = vst [vmem:[#allocation43_spill] sm:$0xff] %v5877_v53 }
 0x223   : > { %2097 = vrot.lane.b32.xlu2 %v5818_v19, %s4423_s20  ;;  %2095 = vrot.lane.b32.xlu1 %v5821_v56, %s4423_s20 }
 0x224   : > { %2093 = vrot.lane.b32.xlu0 %v5815_v59, %s4423_s20  ;;  %v984_v55 = vpop.f32.mrf.mxu0 }
 0x225   : > { %v985_v32 = vadd.f32 %v5435_v6, %v984_v55  ;;  %v5835_v36 = vpop.permute.xlu2 %1497  ;;  %v5837_v20 = vpop.permute.xlu1 %1413  ;;  %v5854_v55 = vld [vmem:[%s4470_s19 + $0x91] sm:$0xff] }
 0x226   : > { %7805 = vst [vmem:[#allocation67_spill] sm:$0xff] %v5837_v20  ;;  %v5841_v23 = vpop.permute.xlu0 %1411 }
 0x227   : > { %7806 = vst [vmem:[#allocation33_spill] sm:$0xff] %v5841_v23  ;;  %3822 = vmatmul.msk.f32.gmra.mxu0 %vm825_vm2, %v819_v30 }
 0x228   : > { %1050 = vst.msk [vmem:[%s5449_s5 + $0x78] sm:$0xff] %vm721_vm0, %v985_v32  ;;  %v1611_v32 = vsel %vm754_vm1, %v1579_v63, %v5506_v57  ;;  %v5883_v57 = vld [vmem:[%s4470_s19 + $0xa9] sm:$0xff] }
 0x22b   : > { %2103 = vrot.lane.b32.xlu2 %v5851_v7, %s4423_s20  ;;  %2101 = vrot.lane.b32.xlu1 %v5854_v55, %s4423_s20 }
 0x22c   : > { %2099 = vrot.lane.b32.xlu0 %v5848_v33, %s4423_s20  ;;  %v987_v30 = vpop.f32.mrf.mxu0  ;;  %v5880_v33 = vld [vmem:[%s4470_s19 + $0xb1] sm:$0xff] }
 0x22d   : > { %v988_v24 = vadd.f32 %v5435_v6, %v987_v30  ;;  %v5867_v46 = vpop.permute.xlu2 %1503  ;;  %v1484_v20 = vpop.permute.xlu1 %1483 }
 0x22e   : > { %v5869_v23 = vpop.permute.xlu0 %1417  ;;  %v1643_v59 = vsel %vm787_vm3, %v1611_v32, %v1484_v20  ;;  %v1580_v20 = vsel %vm721_vm0, %v1068_v12, %v5308_v58  ;;  %v5904_v58 = vld [vmem:[%s4470_s19 + $0xc9] sm:$0xff] }
 0x22f   : > { %7808 = vst [vmem:[#allocation68_spill] sm:$0xff] %v5869_v23  ;;  %3889 = vmatmul.msk.f32.vlgmr.msra.gmra.mxu1 %vm825_vm2, %v1643_v59  ;;  %v1612_v63 = vsel %vm754_vm1, %v1580_v20, %v5602_v29  ;;  %v4374_v29 = vld [vmem:[%s4470_s19 + $0x19] sm:$0xff] }
 0x230   : > { %1051 = vst.msk [vmem:[%s5449_s5 + $0x80] sm:$0xff] %vm721_vm0, %v988_v24  ;;  %v1581_v12 = vsel %vm721_vm0, %v4374_v29, %v5246_v61  ;;  %v1582_v61 = vsel %vm721_vm0, %v5758_v60, %v5330_v52  ;;  %v1583_v52 = vsel %vm721_vm0, %v5755_v44, %v5328_v31  ;;  %v4375_v31 = vld [vmem:[%s4470_s19 + $0x39] sm:$0xff] }
 0x231   : > { %v1613_v20 = vsel %vm754_vm1, %v1581_v12, %v5600_v39 }
 0x233   : > { %2109 = vrot.lane.b32.xlu2 %v5877_v53, %s4423_s20  ;;  %2107 = vrot.lane.b32.xlu1 %v5880_v33, %s4423_s20  ;;  %v1644_v53 = vsel %vm787_vm3, %v1612_v63, %v5771_v40 }
 0x234   : > { %2105 = vrot.lane.b32.xlu0 %v5883_v57, %s4423_s20  ;;  %v990_v59 = vpop.f32.mrf.mxu0 }
 0x235   : > { %v991_v30 = vadd.f32 %v5435_v6, %v990_v59  ;;  %v5896_v32 = vpop.permute.xlu2 %1509  ;;  %v1490_v24 = vpop.permute.xlu1 %1489 }
 0x236   : > { %v1488_v23 = vpop.permute.xlu0 %1487 }
 0x237   : > { %1052 = vst.msk [vmem:[%s5449_s5 + $0x88] sm:$0xff] %vm721_vm0, %v991_v30  ;;  %3890 = vmatmul.msk.f32.gmra.mxu1 %vm825_vm2, %v1644_v53 }
 0x23b   : > { %2115 = vrot.lane.b32.xlu2 %v5339_v47, %s4423_s20  ;;  %2113 = vrot.lane.b32.xlu1 %v5342_v5, %s4423_s20  ;;  %v1645_v5 = vsel %vm787_vm3, %v1613_v20, %v1488_v23  ;;  %v1614_v23 = vsel %vm754_vm1, %v1582_v61, %v5529_v15  ;;  %v1615_v15 = vsel %vm754_vm1, %v1583_v52, %v5625_v49 }
 0x23c   : > { %2111 = vrot.lane.b32.xlu0 %v5904_v58, %s4423_s20  ;;  %v993_v40 = vpop.f32.mrf.mxu0 }
 0x23d   : > { %v994_v53 = vadd.f32 %v5435_v6, %v993_v40  ;;  %v5918_v59 = vpop.permute.xlu2 %1515  ;;  %v1496_v63 = vpop.permute.xlu1 %1495 }
 0x23e   : > { %v1494_v47 = vpop.permute.xlu0 %1493 }
 0x23f   : > { %1053 = vst.msk [vmem:[%s5449_s5 + $0x90] sm:$0xff] %vm721_vm0, %v994_v53  ;;  %3891 = vmatmul.msk.f32.gmra.mxu1 %vm825_vm2, %v1645_v5 }
 0x243   : > { %2121 = vrot.lane.b32.xlu2 %v5368_v3, %s4423_s20  ;;  %2119 = vrot.lane.b32.xlu1 %v5371_v0, %s4423_s20  ;;  %v1646_v0 = vsel %vm787_vm3, %v1614_v23, %v1490_v24 }
 0x244   : > { %2117 = vrot.lane.b32.xlu0 %v5336_v16, %s4423_s20  ;;  %v996_v39 = vpop.f32.mrf.mxu0 }
 0x245   : > { %v997_v30 = vadd.f32 %v5435_v6, %v996_v39  ;;  %v5936_v29 = vpop.permute.xlu2 %1521  ;;  %v5938_v12 = vpop.permute.xlu1 %1501 }
 0x246   : > { %v5940_v3 = vpop.permute.xlu0 %1499 }
 0x247   : > { %1054 = vst.msk [vmem:[%s5449_s5 + $0x98] sm:$0xff] %vm721_vm0, %v997_v30  ;;  %3892 = vmatmul.msk.f32.gmra.mxu1 %vm825_vm2, %v1646_v0 }
 0x24b   : > { %2127 = vrot.lane.b32.xlu2 %v5397_v14, %s4423_s20  ;;  %2125 = vrot.lane.b32.xlu1 %v5400_v41, %s4423_s20  ;;  %v1647_v41 = vsel %vm787_vm3, %v1615_v15, %v5803_v27 }
 0x24c   : > { %2123 = vrot.lane.b32.xlu0 %v5365_v38, %s4423_s20  ;;  %v999_v16 = vpop.f32.mrf.mxu0  ;;  %v1584_v38 = vsel %vm721_vm0, %v4375_v31, %v5266_v37  ;;  %v1585_v37 = vsel %vm721_vm0, %v5789_v35, %v5359_v1  ;;  %v6014_v1 = vld [vmem:[%s4470_s19 + $0x30] sm:$0xff]  ;;  %v1586_v35 = vsel %vm721_vm0, %v5786_v34, %v5357_v62  ;;  %v6043_v34 = vld [vmem:[%s4470_s19 + $0x48] sm:$0xff] }
 0x24d   : > { %v1000_v60 = vadd.f32 %v5435_v6, %v999_v16  ;;  %v5958_v24 = vpop.permute.xlu2 %1527  ;;  %v5960_v40 = vpop.permute.xlu1 %1507  ;;  %v1616_v27 = vsel %vm754_vm1, %v1584_v38, %v5623_v50  ;;  %v1617_v50 = vsel %vm754_vm1, %v1585_v37, %v5552_v21  ;;  %v4015_v21 = vld [vmem:[%s4470_s19 + $0x181] sm:$0xff]  ;;  %v1618_v39 = vsel %vm754_vm1, %v1586_v35, %v5650_v48  ;;  %v6040_v62 = vld [vmem:[%s4470_s19 + $0x50] sm:$0xff]  ;;  %v6046_v48 = vld [vmem:[%s4470_s19 + $0x38] sm:$0xff] }
 0x24e   : > { %v5962_v14 = vpop.permute.xlu0 %1505  ;;  %v1650_v16 = vsel %vm787_vm3, %v1618_v39, %v5835_v36  ;;  %v4376_v36 = vld [vmem:[%s4470_s19 + $0x61] sm:$0xff] }
 0x24f   : > { %1055 = vst.msk [vmem:[%s5449_s5 + $0xa0] sm:$0xff] %vm721_vm0, %v1000_v60  ;;  %3893 = vmatmul.msk.f32.gmra.mxu1 %vm825_vm2, %v1647_v41  ;;  %v1587_v15 = vsel %vm721_vm0, %v4376_v36, %v5286_v43  ;;  %v6072_v43 = vld [vmem:[%s4470_s19 + $0x78] sm:$0xff] }
 0x250   : > { %v1619_v41 = vsel %vm754_vm1, %v1587_v15, %v5646_v11  ;;  %v6075_v11 = vld [vmem:[%s4470_s19 + $0x68] sm:$0xff] }
 0x253   : > { %2133 = vrot.lane.b32.xlu2 %v5426_v4, %s4423_s20  ;;  %2131 = vrot.lane.b32.xlu1 %v5429_v28, %s4423_s20  ;;  %v1648_v28 = vsel %vm787_vm3, %v1616_v27, %v1494_v47 }
 0x254   : > { %2129 = vrot.lane.b32.xlu0 %v5394_v13, %s4423_s20  ;;  %v1002_v49 = vpop.f32.mrf.mxu0 }
 0x255   : > { %v1003_v44 = vadd.f32 %v5435_v6, %v1002_v49  ;;  %v5981_v20 = vpop.permute.xlu2 %1533  ;;  %v5983_v53 = vpop.permute.xlu1 %1513 }
 0x256   : > { %v5985_v4 = vpop.permute.xlu0 %1511 }
 0x257   : > { %1056 = vst.msk [vmem:[%s5449_s5 + $0xa8] sm:$0xff] %vm721_vm0, %v1003_v44  ;;  %3894 = vmatmul.msk.f32.gmra.mxu1 %vm825_vm2, %v1648_v28  ;;  %v1651_v44 = vsel %vm787_vm3, %v1619_v41, %v5940_v3  ;;  %v6078_v28 = vld [vmem:[%s4470_s19 + $0x60] sm:$0xff]  ;;  %v1588_v3 = vsel %vm721_vm0, %v5821_v56, %v5388_v10  ;;  %v4026_v10 = vld [vmem:[%s4470_s19 + $0x98] sm:$0xff]  ;;  %v4025_v56 = vld [vmem:[%s4470_s19 + $0x90] sm:$0xff] }
 0x25b   : > { %2139 = vrot.lane.b32.xlu2 %v5466_v51, %s4423_s20  ;;  %2137 = vrot.lane.b32.xlu1 %v5469_v8, %s4423_s20  ;;  %v1649_v8 = vsel %vm787_vm3, %v1617_v50, %v1496_v63 }
 0x25c   : > { %2135 = vrot.lane.b32.xlu0 %v5423_v26, %s4423_s20  ;;  %v1005_v13 = vpop.f32.mrf.mxu0  ;;  %v4016_v26 = vld [vmem:[%s4470_s19 + $0x189] sm:$0xff] }
 0x25d   : > { %v1006_v47 = vadd.f32 %v5435_v6, %v1005_v13  ;;  %v6003_v5 = vpop.permute.xlu2 %1539  ;;  %v6005_v61 = vpop.permute.xlu1 %1519  ;;  %v1620_v13 = vsel %vm754_vm1, %v1588_v3, %v5575_v2  ;;  %v6106_v2 = vld [vmem:[%s4470_s19 + $0x80] sm:$0xff] }
 0x25e   : > { %v6007_v51 = vpop.permute.xlu0 %1517 }
 0x25f   : > { %1057 = vst.msk [vmem:[%s5449_s5 + $0xb0] sm:$0xff] %vm721_vm0, %v1006_v47  ;;  %3895 = vmatmul.msk.f32.gmra.mxu1 %vm825_vm2, %v1649_v8 }
 0x263   : > { %2209 = vrot.lane.b32.xlu2 %v6014_v1, %s4424_s21  ;;  %2143 = vrot.lane.b32.xlu1 %v4016_v26, %s4423_s20 }
 0x264   : > { %2141 = vrot.lane.b32.xlu0 %v4015_v21, %s4423_s20  ;;  %v1008_v63 = vpop.f32.mrf.mxu0  ;;  %v1652_v21 = vsel %vm787_vm3, %v1620_v13, %v5938_v12  ;;  %v1589_v12 = vsel %vm721_vm0, %v5818_v19, %v5386_v9  ;;  %v6130_v9 = vld [vmem:[%s4470_s19 + $0xc0] sm:$0xff]  ;;  %v6133_v19 = vld [vmem:[%s4470_s19 + $0xb0] sm:$0xff] }
 0x265   : > { %v1009_v23 = vadd.f32 %v5435_v6, %v1008_v63  ;;  %v6028_v30 = vpop.permute.xlu2 %1545  ;;  %v6030_v0 = vpop.permute.xlu1 %1525  ;;  %v1621_v63 = vsel %vm754_vm1, %v1589_v12, %v5673_v54  ;;  %v4027_v54 = vld [vmem:[%s4470_s19 + $0xa8] sm:$0xff] }
 0x266   : > { %v6032_v52 = vpop.permute.xlu0 %1523  ;;  %v1653_v15 = vsel %vm787_vm3, %v1621_v63, %v5867_v46  ;;  %v4377_v46 = vld [vmem:[%s4470_s19 + $0x81] sm:$0xff] }
 0x267   : > { %1058 = vst.msk [vmem:[%s5449_s5 + $0xb8] sm:$0xff] %vm721_vm0, %v1009_v23  ;;  %3896 = vmatmul.msk.f32.gmra.mxu1 %vm825_vm2, %v1650_v16 }
 0x26b   : > { %2215 = vrot.lane.b32.xlu2 %v6040_v62, %s4424_s21  ;;  %2213 = vrot.lane.b32.xlu1 %v6043_v34, %s4424_s21 }
 0x26c   : > { %2211 = vrot.lane.b32.xlu0 %v6046_v48, %s4424_s21  ;;  %v1011_v60 = vpop.f32.mrf.mxu0 }
 0x26d   : > { %v1012_v31 = vadd.f32 %v5435_v6, %v1011_v60  ;;  %v6060_v38 = vpop.permute.xlu2 %2085  ;;  %v6062_v49 = vpop.permute.xlu1 %1531  ;;  %v1590_v60 = vsel %vm721_vm0, %v4377_v46, %v5306_v42  ;;  %v6159_v42 = vld [vmem:[%s4470_s19 + $0xe0] sm:$0xff] }
 0x26e   : > { %v6064_v27 = vpop.permute.xlu0 %1529 }
 0x26f   : > { %1059 = vst.msk [vmem:[%s5449_s5 + $0xc0] sm:$0xff] %vm721_vm0, %v1012_v31  ;;  %3897 = vmatmul.msk.f32.gmra.mxu1 %vm825_vm2, %v1651_v44  ;;  %v1622_v31 = vsel %vm754_vm1, %v1590_v60, %v5669_v17  ;;  %v6162_v17 = vld [vmem:[%s4470_s19 + $0xd8] sm:$0xff] }
 0x273   : > { %2221 = vrot.lane.b32.xlu2 %v6072_v43, %s4424_s21  ;;  %2219 = vrot.lane.b32.xlu1 %v6075_v11, %s4424_s21 }
 0x274   : > { %2217 = vrot.lane.b32.xlu0 %v6078_v28, %s4424_s21  ;;  %v1014_v37 = vpop.f32.mrf.mxu0 }
 0x275   : > { %v1015_v50 = vadd.f32 %v5435_v6, %v1014_v37  ;;  %v6092_v47 = vpop.permute.xlu2 %2091  ;;  %v6094_v8 = vpop.permute.xlu1 %1537 }
 0x276   : > { %v6096_v26 = vpop.permute.xlu0 %1535 }
 0x277   : > { %1060 = vst.msk [vmem:[%s5449_s5 + $0xc8] sm:$0xff] %vm721_vm0, %v1015_v50  ;;  %3898 = vmatmul.msk.f32.gmra.mxu1 %vm825_vm2, %v1652_v21  ;;  %v1654_v50 = vsel %vm787_vm3, %v1622_v31, %v5962_v14  ;;  %v6165_v21 = vld [vmem:[%s4470_s19 + $0xc8] sm:$0xff]  ;;  %v1591_v14 = vsel %vm721_vm0, %v5854_v55, %v5417_v18  ;;  %v4034_v55 = vld [vmem:[%s4470_s19 + $0xf8] sm:$0xff] }
 0x278   : > { %v4035_v18 = vld [vmem:[%s4470_s19 + $0x108] sm:$0xff] }
 0x27b   : > { %2227 = vrot.lane.b32.xlu2 %v4026_v10, %s4424_s21  ;;  %2225 = vrot.lane.b32.xlu1 %v4025_v56, %s4424_s21  ;;  %v1623_v56 = vsel %vm754_vm1, %v1591_v14, %v5598_v25  ;;  %v6193_v25 = vld [vmem:[%s4470_s19 + $0xf0] sm:$0xff] }
 0x27c   : > { %2223 = vrot.lane.b32.xlu0 %v6106_v2, %s4424_s21  ;;  %v1017_v35 = vpop.f32.mrf.mxu0 }
 0x27d   : > { %v1018_v39 = vadd.f32 %v5435_v6, %v1017_v35  ;;  %v6118_v23 = vpop.permute.xlu2 %2097  ;;  %v6120_v16 = vpop.permute.xlu1 %1543 }
 0x27e   : > { %v6122_v36 = vpop.permute.xlu0 %1541 }
 0x27f   : > { %1061 = vst.msk [vmem:[%s5449_s5 + $0xd0] sm:$0xff] %vm721_vm0, %v1018_v39  ;;  %3899 = vmatmul.msk.f32.gmra.mxu1 %vm825_vm2, %v1653_v15  ;;  %v1655_v15 = vsel %vm787_vm3, %v1623_v56, %v5960_v40 }
 0x283   : > { %2233 = vrot.lane.b32.xlu2 %v6130_v9, %s4424_s21  ;;  %2231 = vrot.lane.b32.xlu1 %v6133_v19, %s4424_s21 }
 0x284   : > { %2229 = vrot.lane.b32.xlu0 %v4027_v54, %s4424_s21  ;;  %v1020_v41 = vpop.f32.mrf.mxu0  ;;  %v1592_v54 = vsel %vm721_vm0, %v5851_v7, %v5415_v45  ;;  %v6217_v45 = vld [vmem:[%s4470_s19 + $0x31] sm:$0xff]  ;;  %v7811_v7 = vld [vmem:[#allocation2_spill] sm:$0xff] }
 0x285   : > { %v1021_v44 = vadd.f32 %v5435_v6, %v1020_v41  ;;  %v6147_v3 = vpop.permute.xlu2 %2103  ;;  %v6149_v37 = vpop.permute.xlu1 %2083  ;;  %v1624_v46 = vsel %vm754_vm1, %v1592_v54, %v5696_v22  ;;  %v4179_v22 = vld [vmem:[%s4470_s19 + $0x1a] sm:$0xff] }
 0x286   : > { %7810 = vst [vmem:[#allocation32_spill] sm:$0xff] %v6147_v3  ;;  %v6151_v13 = vpop.permute.xlu0 %2081 }
 0x287   : > { %1062 = vst.msk [vmem:[%s5449_s5 + $0xd8] sm:$0xff] %vm721_vm0, %v1021_v44  ;;  %3900 = vmatmul.msk.f32.gmra.mxu1 %vm825_vm2, %v1654_v50  ;;  %v1656_v50 = vsel %vm787_vm3, %v1624_v46, %v5896_v32  ;;  %v1593_v32 = vsel %vm721_vm0, %v5883_v57, %v7811_v7  ;;  %v4180_v57 = vld [vmem:[%s4470_s19 + $0x22] sm:$0xff]  ;;  %v7815_v46 = vld [vmem:[#allocation16_spill] sm:$0xff] }
 0x28b   : > { %2239 = vrot.lane.b32.xlu2 %v6159_v42, %s4424_s21  ;;  %2237 = vrot.lane.b32.xlu1 %v6162_v17, %s4424_s21 }
 0x28c   : > { %2235 = vrot.lane.b32.xlu0 %v6165_v21, %s4424_s21  ;;  %v1023_v10 = vpop.f32.mrf.mxu0 }
 0x28d   : > { %v1024_v12 = vadd.f32 %v5435_v6, %v1023_v10  ;;  %v6179_v35 = vpop.permute.xlu2 %2109  ;;  %v6181_v63 = vpop.permute.xlu1 %2089  ;;  %v7812_v10 = vld [vmem:[#allocation42_spill] sm:$0xff] }
 0x28e   : > { %v6183_v39 = vpop.permute.xlu0 %2087  ;;  %v1625_v56 = vsel %vm754_vm1, %v1593_v32, %v7812_v10 }
 0x28f   : > { %1063 = vst.msk [vmem:[%s5449_s5 + $0xe0] sm:$0xff] %vm721_vm0, %v1024_v12  ;;  %3901 = vmatmul.msk.f32.gmra.mxu1 %vm825_vm2, %v1655_v15  ;;  %v1657_v54 = vsel %vm787_vm3, %v1625_v56, %v5985_v4 }
 0x293   : > { %2245 = vrot.lane.b32.xlu2 %v4035_v18, %s4424_s21  ;;  %2243 = vrot.lane.b32.xlu1 %v4034_v55, %s4424_s21 }
 0x294   : > { %2241 = vrot.lane.b32.xlu0 %v6193_v25, %s4424_s21  ;;  %v1026_v40 = vpop.f32.mrf.mxu0 }
 0x295   : > { %v1027_v60 = vadd.f32 %v5435_v6, %v1026_v40  ;;  %v6205_v41 = vpop.permute.xlu2 %2115  ;;  %v6207_v31 = vpop.permute.xlu1 %2095  ;;  %v4243_v40 = vld [vmem:[%s4470_s19 + $0x32] sm:$0xff] }
 0x296   : > { %v6209_v44 = vpop.permute.xlu0 %2093 }
 0x297   : > { %1064 = vst.msk [vmem:[%s5449_s5 + $0xe8] sm:$0xff] %vm721_vm0, %v1027_v60  ;;  %3902 = vmatmul.msk.f32.gmra.mxu1 %vm825_vm2, %v1656_v50  ;;  %v7816_v60 = vld [vmem:[#allocation45_spill] sm:$0xff] }
 0x298   : > { %v1594_v50 = vsel %vm721_vm0, %v5880_v33, %v7816_v60  ;;  %v4244_v33 = vld [vmem:[%s4470_s19 + $0x3a] sm:$0xff] }
 0x29b   : > { %2337 = vrot.lane.b32.xlu2 %v6217_v45, %s4425_s22  ;;  %3062 = vrot.lane.b32.xlu1 %v6217_v45, %s4424_s21 }
 0x29c   : > { %2934 = vrot.lane.b32.xlu0 %v4179_v22, %s4423_s20  ;;  %v1029_v14 = vpop.f32.mrf.mxu0  ;;  %v7817_v22 = vld [vmem:[#allocation54_spill] sm:$0xff] }
 0x29d   : > { %v1030_v12 = vadd.f32 %v5435_v6, %v1029_v14  ;;  %v6231_v15 = vpop.permute.xlu2 %2121  ;;  %v6233_v18 = vpop.permute.xlu1 %2101  ;;  %v1626_v7 = vsel %vm754_vm1, %v1594_v50, %v7817_v22 }
 0x29e   : > { %7813 = vst [vmem:[#allocation14_spill] sm:$0xff] %v6231_v15  ;;  %v6235_v55 = vpop.permute.xlu0 %2099 }
 0x29f   : > { %7814 = vst [vmem:[#allocation71_spill] sm:$0xff] %v6233_v18  ;;  %3903 = vmatmul.msk.f32.gmra.mxu1 %vm825_vm2, %v1657_v54  ;;  %v7820_v54 = vld [vmem:[#allocation3_spill] sm:$0xff] }
 0x2a0   : > { %1065 = vst.msk [vmem:[%s5449_s5 + $0xf0] sm:$0xff] %vm721_vm0, %v1030_v12  ;;  %v1658_v12 = vsel %vm787_vm3, %v1626_v7, %v5983_v53  ;;  %v7822_v53 = vld [vmem:[#allocation30_spill] sm:$0xff] }
 0x2a3   : > { %3064 = vrot.lane.b32.xlu2 %v7815_v46, %s4424_s21  ;;  %2936 = vrot.lane.b32.xlu1 %v4180_v57, %s4423_s20  ;;  %v7821_v57 = vld [vmem:[#allocation43_spill] sm:$0xff] }
 0x2a4   : > { %3190 = vrot.lane.b32.xlu0 %v4243_v40, %s4425_s22  ;;  %v1032_v4 = vpop.f32.mrf.mxu0  ;;  %v1595_v60 = vsel %vm721_vm0, %v7821_v57, %v7820_v54  ;;  %v6289_v54 = vld [vmem:[%s4470_s19 + $0x49] sm:$0xff] }
 0x2a5   : > { %v1033_v32 = vadd.f32 %v5435_v6, %v1032_v4  ;;  %v6254_v14 = vpop.permute.xlu2 %2127  ;;  %v6256_v10 = vpop.permute.xlu1 %2107  ;;  %v1627_v4 = vsel %vm754_vm1, %v1595_v60, %v7822_v53  ;;  %v7824_v57 = vld [vmem:[#allocation40_spill] sm:$0xff] }
 0x2a6   : > { %7818 = vst [vmem:[#allocation56_spill] sm:$0xff] %v6254_v14  ;;  %v6258_v56 = vpop.permute.xlu0 %2105  ;;  %v1596_v60 = vsel %vm721_vm0, %v5904_v58, %v7824_v57  ;;  %v6314_v58 = vld [vmem:[%s4470_s19 + $0x51] sm:$0xff]  ;;  %v4378_v57 = vld [vmem:[%s4470_s19 + $0xd9] sm:$0xff] }
 0x2a7   : > { %7819 = vst [vmem:[#allocation72_spill] sm:$0xff] %v6258_v56  ;;  %3904 = vmatmul.msk.f32.gmra.mxu1 %vm825_vm2, %v1658_v12  ;;  %v1659_v12 = vsel %vm787_vm3, %v1627_v4, %v5918_v59  ;;  %v4081_v56 = vld [vmem:[%s7556_s1 + $0x20] sm:$0xff] }
 0x2a8   : > { %1066 = vst.msk [vmem:[%s5449_s5 + $0xf8] sm:$0xff] %vm721_vm0, %v1033_v32 }
 0x2ab   : > { %2938 = vrot.lane.b32.xlu2 %v4243_v40, %s4423_s20  ;;  %3192 = vrot.lane.b32.xlu1 %v4244_v33, %s4425_s22 }
 0x2ac   : > { %2339 = vrot.lane.b32.xlu0 %v7815_v46, %s4425_s22  ;;  %v1791_v50 = vpop.f32.mrf.mxu1  ;;  %v4245_v46 = vld [vmem:[%s4470_s19 + $0x4a] sm:$0xff] }
 0x2ad   : > { %v1792_v22 = vadd.f32 %v5435_v6, %v1791_v50  ;;  %v6276_v7 = vpop.permute.xlu2 %2133  ;;  %v6278_v32 = vpop.permute.xlu1 %2113  ;;  %v7825_v50 = vld [vmem:[#allocation57_spill] sm:$0xff] }
 0x2ae   : > { %7823 = vst [vmem:[#allocation20_spill] sm:$0xff] %v6276_v7  ;;  %v6280_v40 = vpop.permute.xlu0 %2111  ;;  %v1628_v53 = vsel %vm754_vm1, %v1596_v60, %v7825_v50  ;;  %v7828_v60 = vld [vmem:[#allocation41_spill] sm:$0xff]  ;;  %v7829_v50 = vld [vmem:[#allocation31_spill] sm:$0xff] }
 0x2af   : > { %3921 = vst.msk [vmem:[%s5449_s5 + $0x100] sm:$0xff] %vm721_vm0, %v1792_v22  ;;  %3905 = vmatmul.msk.f32.gmra.mxu1 %vm825_vm2, %v1659_v12  ;;  %v1660_v14 = vsel %vm787_vm3, %v1628_v53, %v6007_v51 }
 0x2b3   : > { %3194 = vrot.lane.b32.xlu2 %v4245_v46, %s4425_s22  ;;  %2341 = vrot.lane.b32.xlu1 %v6289_v54, %s4425_s22 }
 0x2b4   : > { %3066 = vrot.lane.b32.xlu0 %v6289_v54, %s4424_s21  ;;  %v1794_v59 = vpop.f32.mrf.mxu1 }
 0x2b5   : > { %v1795_v4 = vadd.f32 %v5435_v6, %v1794_v59  ;;  %v6302_v22 = vpop.permute.xlu2 %2139  ;;  %v6304_v12 = vpop.permute.xlu1 %2119  ;;  %v1597_v59 = vsel %vm721_vm0, %v4378_v57, %v7828_v60  ;;  %v7832_v57 = vld [vmem:[#allocation52_spill] sm:$0xff]  ;;  %v7833_v60 = vld [vmem:[#allocation7_spill] sm:$0xff] }
 0x2b6   : > { %7826 = vst [vmem:[#allocation13_spill] sm:$0xff] %v6302_v22  ;;  %v6306_v7 = vpop.permute.xlu0 %2117 }
 0x2b7   : > { %7827 = vst [vmem:[#allocation73_spill] sm:$0xff] %v6304_v12  ;;  %3906 = vmatmul.msk.f32.gmra.mxu1 %vm825_vm2, %v1660_v14  ;;  %v1629_v14 = vsel %vm754_vm1, %v1597_v59, %v7829_v50 }
 0x2b8   : > { %3922 = vst.msk [vmem:[%s5449_s5 + $0x108] sm:$0xff] %vm721_vm0, %v1795_v4  ;;  %v1661_v12 = vsel %vm787_vm3, %v1629_v14, %v6005_v61 }
 0x2bb   : > { %2343 = vrot.lane.b32.xlu2 %v6314_v58, %s4425_s22  ;;  %3068 = vrot.lane.b32.xlu1 %v6314_v58, %s4424_s21 }
 0x2bc   : > { %2940 = vrot.lane.b32.xlu0 %v4244_v33, %s4423_s20  ;;  %v1797_v51 = vpop.f32.mrf.mxu1  ;;  %v4246_v33 = vld [vmem:[%s4470_s19 + $0x52] sm:$0xff] }
 0x2bd   : > { %v1798_v53 = vadd.f32 %v5435_v6, %v1797_v51  ;;  %v6327_v4 = vpop.permute.xlu2 %2209  ;;  %v6329_v22 = vpop.permute.xlu1 %2125  ;;  %v4379_v6 = vld [vmem:[%s4470_s19 + $0xe1] sm:$0xff]  ;;  %v7834_v51 = vld [vmem:[#allocation53_spill] sm:$0xff] }
 0x2be   : > { %7830 = vst [vmem:[#allocation55_spill] sm:$0xff] %v6329_v22  ;;  %v6331_v15 = vpop.permute.xlu0 %2123  ;;  %v1598_v59 = vsel %vm721_vm0, %v4379_v6, %v7833_v60  ;;  %v4247_v60 = vld [vmem:[%s4470_s19 + $0x62] sm:$0xff] }
 0x2bf   : > { %7831 = vst [vmem:[#allocation74_spill] sm:$0xff] %v6331_v15  ;;  %3907 = vmatmul.msk.f32.gmra.mxu1 %vm825_vm2, %v1661_v12  ;;  %v1630_v50 = vsel %vm754_vm1, %v1598_v59, %v7834_v51  ;;  %v6351_v12 = vld [vmem:[%s7557_s2] ss:$0 sm:$0xff]  ;;  %v4381_v59 = vld [vmem:[%s4470_s19 + $0xf1] sm:$0xff] }
 0x2c0   : > { %3923 = vst.msk [vmem:[%s5449_s5 + $0x110] sm:$0xff] %vm721_vm0, %v1798_v53  ;;  %v1662_v6 = vsel %vm787_vm3, %v1630_v50, %v5936_v29  ;;  %v7838_v50 = vld [vmem:[#allocation58_spill] sm:$0xff] }
 0x2c3   : > { %3070 = vrot.lane.b32.xlu2 %v7832_v57, %s4424_s21  ;;  %2942 = vrot.lane.b32.xlu1 %v4245_v46, %s4423_s20 }
 0x2c4   : > { %3196 = vrot.lane.b32.xlu0 %v4246_v33, %s4425_s22  ;;  %v1800_v61 = vpop.f32.mrf.mxu1 }
 0x2c5   : > { %v1801_v14 = vadd.f32 %v6351_v12, %v1800_v61  ;;  %v6354_v53 = vpop.permute.xlu2 %2215  ;;  %v6356_v46 = vpop.permute.xlu1 %2131  ;;  %v7837_v61 = vld [vmem:[#allocation21_spill] sm:$0xff] }
 0x2c6   : > { %7835 = vst [vmem:[#allocation35_spill] sm:$0xff] %v6356_v46  ;;  %v6358_v22 = vpop.permute.xlu0 %2129  ;;  %v1599_v51 = vsel %vm721_vm0, %v4381_v59, %v7837_v61  ;;  %v6389_v59 = vld [vmem:[%s4470_s19 + $0x69] sm:$0xff]  ;;  %v4382_v61 = vld [vmem:[%s4470_s19 + $0xf9] sm:$0xff] }
 0x2c7   : > { %7836 = vst [vmem:[#allocation19_spill] sm:$0xff] %v6358_v22  ;;  %3908 = vmatmul.msk.f32.gmra.mxu1 %vm825_vm2, %v1662_v6 }
 0x2c8   : > { %3924 = vst.msk [vmem:[%s5449_s5 + $0x118] sm:$0xff] %vm721_vm0, %v1801_v14  ;;  %v1631_v14 = vsel %vm754_vm1, %v1599_v51, %v7838_v50  ;;  %v7841_v51 = vld [vmem:[#allocation6_spill] sm:$0xff]  ;;  %v7842_v50 = vld [vmem:[#allocation11_spill] sm:$0xff] }
 0x2c9   : > { %v1663_v15 = vsel %vm787_vm3, %v1631_v14, %v6032_v52 }
 0x2cb   : > { %2944 = vrot.lane.b32.xlu2 %v4246_v33, %s4423_s20  ;;  %3198 = vrot.lane.b32.xlu1 %v4247_v60, %s4425_s22 }
 0x2cc   : > { %2345 = vrot.lane.b32.xlu0 %v7832_v57, %s4425_s22  ;;  %v1803_v29 = vpop.f32.mrf.mxu1  ;;  %v4248_v57 = vld [vmem:[%s4470_s19 + $0x6a] sm:$0xff] }
 0x2cd   : > { %v1804_v6 = vadd.f32 %v6351_v12, %v1803_v29  ;;  %v6376_v46 = vpop.permute.xlu2 %2221  ;;  %v6378_v22 = vpop.permute.xlu1 %2137  ;;  %v1600_v29 = vsel %vm721_vm0, %v4382_v61, %v7841_v51 }
 0x2ce   : > { %7839 = vst [vmem:[#allocation75_spill] sm:$0xff] %v6378_v22  ;;  %v6380_v33 = vpop.permute.xlu0 %2135  ;;  %v1632_v14 = vsel %vm754_vm1, %v1600_v29, %v7842_v50  ;;  %v6420_v29 = vld [vmem:[%s4470_s19 + $0x79] sm:$0xff] }
 0x2cf   : > { %7840 = vst [vmem:[#allocation44_spill] sm:$0xff] %v6380_v33  ;;  %3909 = vmatmul.msk.f32.gmra.mxu1 %vm825_vm2, %v1663_v15  ;;  %v4082_v15 = vld [vmem:[%s7556_s1 + $0x28] sm:$0xff]  ;;  %v1664_v51 = vsel %vm787_vm3, %v1632_v14, %v6030_v0  ;;  %v7846_v14 = vld [vmem:[#allocation62_spill] sm:$0xff] }
 0x2d0   : > { %3925 = vst.msk [vmem:[%s5449_s5 + $0x120] sm:$0xff] %vm721_vm0, %v1804_v6  ;;  %2642 = vmatpush.msra.mxu2 %v4082_v15  ;;  %v4383_v0 = vld [vmem:[%s4470_s19 + $0x109] sm:$0xff] }
 0x2d2   : > { %2643 = vmatpush.msra.mxu2 %v4081_v56 }
 0x2d3   : > { %3200 = vrot.lane.b32.xlu2 %v4248_v57, %s4425_s22  ;;  %2347 = vrot.lane.b32.xlu1 %v6389_v59, %s4425_s22 }
 0x2d4   : > { %3072 = vrot.lane.b32.xlu0 %v6389_v59, %s4424_s21  ;;  %v1806_v52 = vpop.f32.mrf.mxu1 }
 0x2d5   : > { %v1807_v6 = vadd.f32 %v6351_v12, %v1806_v52  ;;  %v6405_v22 = vpop.permute.xlu2 %2227  ;;  %v6407_v33 = vpop.permute.xlu1 %2143  ;;  %v7845_v52 = vld [vmem:[#allocation26_spill] sm:$0xff] }
 0x2d6   : > { %7843 = vst [vmem:[#allocation76_spill] sm:$0xff] %v6407_v33  ;;  %v6409_v61 = vpop.permute.xlu0 %2141  ;;  %v1601_v15 = vsel %vm721_vm0, %v4383_v0, %v7845_v52  ;;  %v7848_v0 = vld [vmem:[#allocation15_spill] sm:$0xff]  ;;  %v4384_v52 = vld [vmem:[%s4470_s19 + $0x111] sm:$0xff] }
 0x2d7   : > { %7844 = vst [vmem:[#allocation34_spill] sm:$0xff] %v6409_v61  ;;  %3910 = vmatmul.msk.f32.gmra.mxu1 %vm825_vm2, %v1664_v51  ;;  %v1633_v56 = vsel %vm754_vm1, %v1601_v15, %v7846_v14  ;;  %v7849_v15 = vld [vmem:[#allocation4_spill] sm:$0xff]  ;;  %v7850_v14 = vld [vmem:[#allocation69_spill] sm:$0xff] }
 0x2d8   : > { %3926 = vst.msk [vmem:[%s5449_s5 + $0x128] sm:$0xff] %vm721_vm0, %v1807_v6  ;;  %v1665_v3 = vsel %vm787_vm3, %v1633_v56, %v5958_v24 }
 0x2db   : > { %2349 = vrot.lane.b32.xlu2 %v6420_v29, %s4425_s22  ;;  %3074 = vrot.lane.b32.xlu1 %v6420_v29, %s4424_s21 }
 0x2dc   : > { %2946 = vrot.lane.b32.xlu0 %v4247_v60, %s4423_s20  ;;  %v1809_v50 = vpop.f32.mrf.mxu1  ;;  %v4249_v60 = vld [vmem:[%s4470_s19 + $0x7a] sm:$0xff] }
 0x2dd   : > { %v1810_v6 = vadd.f32 %v6351_v12, %v1809_v50  ;;  %v6433_v51 = vpop.permute.xlu2 %2233  ;;  %v6435_v33 = vpop.permute.xlu1 %2213  ;;  %v1602_v50 = vsel %vm721_vm0, %v4384_v52, %v7849_v15 }
 0x2de   : > { %7847 = vst [vmem:[#allocation18_spill] sm:$0xff] %v6433_v51  ;;  %v6437_v61 = vpop.permute.xlu0 %2211  ;;  %v1634_v56 = vsel %vm754_vm1, %v1602_v50, %v7850_v14  ;;  %v4250_v50 = vld [vmem:[%s4470_s19 + $0x82] sm:$0xff] }
 0x2df   : > { %3927 = vst.msk [vmem:[%s5449_s5 + $0x130] sm:$0xff] %vm721_vm0, %v1810_v6  ;;  %3911 = vmatmul.msk.f32.gmra.mxu1 %vm825_vm2, %v1665_v3  ;;  %v2448_v3 = vsel %vm721_vm0, %v6165_v21, %v6280_v40  ;;  %v1666_v15 = vsel %vm787_vm3, %v1634_v56, %v6064_v27  ;;  %v4385_v21 = vld [vmem:[%s4470_s19 + $0x121] sm:$0xff] }
 0x2e0   : > { %v7852_v40 = vld [vmem:[#allocation50_spill] sm:$0xff] }
 0x2e3   : > { %3076 = vrot.lane.b32.xlu2 %v7848_v0, %s4424_s21  ;;  %2948 = vrot.lane.b32.xlu1 %v4248_v57, %s4423_s20 }
 0x2e4   : > { %3202 = vrot.lane.b32.xlu0 %v4249_v60, %s4425_s22  ;;  %v1812_v24 = vpop.f32.mrf.mxu1 }
 0x2e5   : > { %v1813_v6 = vadd.f32 %v6351_v12, %v1812_v24  ;;  %v2240_v51 = vpop.permute.xlu2 %2239  ;;  %v6458_v18 = vpop.permute.xlu1 %2219  ;;  %v7853_v24 = vld [vmem:[#allocation49_spill] sm:$0xff] }
 0x2e6   : > { %v6461_v57 = vsel %vm754_vm1, %v2448_v3, %v2240_v51  ;;  %v6463_v52 = vpop.permute.xlu0 %2217  ;;  %v1603_v51 = vsel %vm721_vm0, %v4385_v21, %v7852_v40  ;;  %v4251_v40 = vld [vmem:[%s4470_s19 + $0x92] sm:$0xff] }
 0x2e7   : > { %7851 = vst [vmem:[#allocation77_spill] sm:$0xff] %v6461_v57  ;;  %3912 = vmatmul.msk.f32.gmra.mxu1 %vm825_vm2, %v1666_v15  ;;  %v1635_v14 = vsel %vm754_vm1, %v1603_v51, %v7853_v24  ;;  %v6498_v51 = vld [vmem:[%s4470_s19 + $0x91] sm:$0xff] }
 0x2e8   : > { %3928 = vst.msk [vmem:[%s5449_s5 + $0x138] sm:$0xff] %vm721_vm0, %v1813_v6  ;;  %v1667_v15 = vsel %vm787_vm3, %v1635_v14, %v6062_v49  ;;  %v7855_v49 = vld [vmem:[#allocation48_spill] sm:$0xff] }
 0x2eb   : > { %2950 = vrot.lane.b32.xlu2 %v4249_v60, %s4423_s20  ;;  %3204 = vrot.lane.b32.xlu1 %v4250_v50, %s4425_s22  ;;  %v2451_v60 = vsel %vm721_vm0, %v6193_v25, %v6306_v7  ;;  %v3953_v25 = vld [vmem:[%s4470_s19 + $0x18] sm:$0xff]  ;;  %v4386_v7 = vld [vmem:[%s4470_s19 + $0x129] sm:$0xff] }
 0x2ec   : > { %2351 = vrot.lane.b32.xlu0 %v7848_v0, %s4425_s22  ;;  %v1815_v27 = vpop.f32.mrf.mxu1  ;;  %v2433_v24 = vsel %vm721_vm0, %v3953_v25, %v6151_v13 }
 0x2ed   : > { %v1816_v56 = vadd.f32 %v6351_v12, %v1815_v27  ;;  %v2246_v3 = vpop.permute.xlu2 %2245  ;;  %v6484_v6 = vpop.permute.xlu1 %2225  ;;  %v1604_v27 = vsel %vm721_vm0, %v4386_v7, %v7855_v49 }
 0x2ee   : > { %v6489_v21 = vsel %vm754_vm1, %v2451_v60, %v2246_v3  ;;  %v6491_v0 = vpop.permute.xlu0 %2223  ;;  %v4276_v60 = vld [vmem:[%s7556_s1 + $0x38] sm:$0xff] }
 0x2ef   : > { %7854 = vst [vmem:[#allocation61_spill] sm:$0xff] %v6489_v21  ;;  %3913 = vmatmul.msk.f32.gmra.mxu1 %vm825_vm2, %v1667_v15  ;;  %v2465_v15 = vsel %vm754_vm1, %v2433_v24, %v6327_v4  ;;  %3495 = vmatpush.msra.mxu3 %v4276_v60  ;;  %v6534_v4 = vld [vmem:[%s4470_s19 + $0x99] sm:$0xff]  ;;  %v7857_v24 = vld [vmem:[#allocation8_spill] sm:$0xff] }
 0x2f0   : > { %3929 = vst.msk [vmem:[%s5449_s5 + $0x140] sm:$0xff] %vm721_vm0, %v1816_v56  ;;  %v7856_v56 = vld [vmem:[#allocation63_spill] sm:$0xff] }
 0x2f1   : > { %v1636_v3 = vsel %vm754_vm1, %v1604_v27, %v7856_v56  ;;  %v4275_v27 = vld [vmem:[%s7556_s1 + $0x30] sm:$0xff] }
 0x2f2   : > { %v1668_v25 = vsel %vm787_vm3, %v1636_v3, %v5981_v20  ;;  %3496 = vmatpush.msra.mxu3 %v4275_v27  ;;  %v4387_v20 = vld [vmem:[%s4470_s19 + $0x139] sm:$0xff]  ;;  %v2447_v3 = vsel %vm721_vm0, %v6130_v9, %v6179_v35  ;;  %v6567_v35 = vld [vmem:[%s4470_s19 + $0xa9] sm:$0xff] }
 0x2f3   : > { %3206 = vrot.lane.b32.xlu2 %v4251_v40, %s4425_s22  ;;  %2353 = vrot.lane.b32.xlu1 %v6498_v51, %s4425_s22 }
 0x2f4   : > { %3078 = vrot.lane.b32.xlu0 %v6498_v51, %s4424_s21  ;;  %v1818_v14 = vpop.f32.mrf.mxu1 }
 0x2f5   : > { %v1819_v7 = vadd.f32 %v6351_v12, %v1818_v14  ;;  %v2338_v49 = vpop.permute.xlu2 %2337  ;;  %v6519_v13 = vpop.permute.xlu1 %2231  ;;  %v1605_v14 = vsel %vm721_vm0, %v4387_v20, %v7857_v24  ;;  %v4252_v24 = vld [vmem:[%s4470_s19 + $0x9a] sm:$0xff] }
 0x2f6   : > { %v6523_v21 = vpop.permute.xlu0 %2229  ;;  %v2497_v57 = vsel %vm787_vm3, %v2465_v15, %v2338_v49 }
 0x2f7   : > { %3930 = vst.msk [vmem:[%s5449_s5 + $0x148] sm:$0xff] %vm721_vm0, %v1819_v7  ;;  %3914 = vmatmul.msk.f32.gmra.mxu1 %vm825_vm2, %v1668_v25  ;;  %4083 = vmatmul.msk.f32.vlgmr.msra.gmra.mxu2 %vm825_vm2, %v2497_v57  ;;  %v7858_v57 = vld [vmem:[#allocation9_spill] sm:$0xff] }
 0x2f8   : > { %v1637_v56 = vsel %vm754_vm1, %v1605_v14, %v7858_v57 }
 0x2f9   : > { %v1669_v25 = vsel %vm787_vm3, %v1637_v56, %v6096_v26  ;;  %v4388_v26 = vld [vmem:[%s4470_s19 + $0x141] sm:$0xff]  ;;  %v2450_v56 = vsel %vm721_vm0, %v6159_v42, %v6205_v41  ;;  %v4253_v41 = vld [vmem:[%s4470_s19 + $0xaa] sm:$0xff] }
 0x2fb   : > { %2355 = vrot.lane.b32.xlu2 %v6534_v4, %s4425_s22  ;;  %3080 = vrot.lane.b32.xlu1 %v6534_v4, %s4424_s21 }
 0x2fc   : > { %2952 = vrot.lane.b32.xlu0 %v4250_v50, %s4423_s20  ;;  %v1821_v60 = vpop.f32.mrf.mxu1  ;;  %v2446_v50 = vsel %vm721_vm0, %v6133_v19, %v6256_v10  ;;  %v7859_v19 = vld [vmem:[#allocation5_spill] sm:$0xff] }
 0x2fd   : > { %v1822_v15 = vadd.f32 %v6351_v12, %v1821_v60  ;;  %v6550_v7 = vpop.permute.xlu2 %3064  ;;  %v2238_v49 = vpop.permute.xlu1 %2237  ;;  %v1606_v10 = vsel %vm721_vm0, %v4388_v26, %v7859_v19  ;;  %v7860_v60 = vld [vmem:[#allocation64_spill] sm:$0xff]  ;;  %v7862_v19 = vld [vmem:[#allocation33_spill] sm:$0xff] }
 0x2fe   : > { %v6558_v27 = vsel %vm754_vm1, %v2447_v3, %v2238_v49  ;;  %v2236_v20 = vpop.permute.xlu0 %2235  ;;  %v1638_v57 = vsel %vm754_vm1, %v1606_v10, %v7860_v60 }
 0x2ff   : > { %3931 = vst.msk [vmem:[%s5449_s5 + $0x150] sm:$0xff] %vm721_vm0, %v1822_v15  ;;  %v6563_v9 = vsel %vm754_vm1, %v2446_v50, %v2236_v20  ;;  %3915 = vmatmul.msk.f32.gmra.mxu1 %vm825_vm2, %v1669_v25  ;;  %v1670_v49 = vsel %vm787_vm3, %v1638_v57, %v6094_v8  ;;  %v2449_v25 = vsel %vm721_vm0, %v6162_v17, %v6278_v32  ;;  %v4389_v8 = vld [vmem:[%s4470_s19 + $0x151] sm:$0xff] }
 0x300   : > { %v7861_v17 = vld [vmem:[#allocation12_spill] sm:$0xff] }
 0x301   : > { %v1607_v32 = vsel %vm721_vm0, %v4389_v8, %v7861_v17 }
 0x302   : > { %v1639_v10 = vsel %vm754_vm1, %v1607_v32, %v7862_v19  ;;  %v7864_v32 = vld [vmem:[#allocation67_spill] sm:$0xff] }
 0x303   : > { %3082 = vrot.lane.b32.xlu2 %v6567_v35, %s4424_s21  ;;  %2954 = vrot.lane.b32.xlu1 %v4251_v40, %s4423_s20  ;;  %v1671_v57 = vsel %vm787_vm3, %v1639_v10, %v6003_v5  ;;  %v7863_v5 = vld [vmem:[#allocation27_spill] sm:$0xff] }
 0x304   : > { %3208 = vrot.lane.b32.xlu0 %v4252_v24, %s4425_s22  ;;  %v1824_v14 = vpop.f32.mrf.mxu1 }
 0x305   : > { %v1825_v3 = vadd.f32 %v6351_v12, %v1824_v14  ;;  %v6583_v15 = vpop.permute.xlu2 %2938  ;;  %v2244_v40 = vpop.permute.xlu1 %2243 }
 0x306   : > { %v6591_v50 = vsel %vm754_vm1, %v2450_v56, %v2244_v40  ;;  %v2242_v20 = vpop.permute.xlu0 %2241  ;;  %v4254_v40 = vld [vmem:[%s4470_s19 + $0xb2] sm:$0xff] }
 0x307   : > { %3932 = vst.msk [vmem:[%s5449_s5 + $0x158] sm:$0xff] %vm721_vm0, %v1825_v3  ;;  %v6596_v42 = vsel %vm754_vm1, %v2449_v25, %v2242_v20  ;;  %3916 = vmatmul.msk.f32.gmra.mxu1 %vm825_vm2, %v1670_v49  ;;  %v4147_v3 = vld [vmem:[%s4470_s19 + $0x19] sm:$0xff]  ;;  %v6620_v49 = vld [vmem:[%s4470_s19 + $0xb1] sm:$0xff] }
 0x308   : > { %v4390_v20 = vld [vmem:[%s4470_s19 + $0x159] sm:$0xff] }
 0x309   : > { %v1608_v8 = vsel %vm721_vm0, %v4390_v20, %v7863_v5  ;;  %v4148_v20 = vld [vmem:[%s4470_s19 + $0x21] sm:$0xff] }
 0x30b   : > { %2956 = vrot.lane.b32.xlu2 %v4252_v24, %s4423_s20  ;;  %3210 = vrot.lane.b32.xlu1 %v4253_v41, %s4425_s22 }
 0x30c   : > { %2357 = vrot.lane.b32.xlu0 %v6567_v35, %s4425_s22  ;;  %v1827_v26 = vpop.f32.mrf.mxu1 }
 0x30d   : > { %v1828_v14 = vadd.f32 %v6351_v12, %v1827_v26  ;;  %v6610_v60 = vpop.permute.xlu2 %3194  ;;  %v3063_v24 = vpop.permute.xlu1 %3062  ;;  %v1640_v26 = vsel %vm754_vm1, %v1608_v8, %v7864_v32  ;;  %v6646_v8 = vld [vmem:[%s4470_s19 + $0xc1] sm:$0xff] }
 0x30e   : > { %v2935_v56 = vpop.permute.xlu0 %2934 }
 0x30f   : > { %3933 = vst.msk [vmem:[%s5449_s5 + $0x160] sm:$0xff] %vm721_vm0, %v1828_v14  ;;  %3917 = vmatmul.msk.f32.gmra.mxu1 %vm825_vm2, %v1671_v57  ;;  %v3286_v25 = vsel %vm721_vm0, %v4147_v3, %v2935_v56  ;;  %v1672_v57 = vsel %vm787_vm3, %v1640_v26, %v6122_v36  ;;  %v4391_v36 = vld [vmem:[%s4470_s19 + $0x169] sm:$0xff] }
 0x310   : > { %v3318_v3 = vsel %vm754_vm1, %v3286_v25, %v3063_v24  ;;  %v7865_v24 = vld [vmem:[#allocation59_spill] sm:$0xff] }
 0x311   : > { %v1609_v25 = vsel %vm721_vm0, %v4391_v36, %v7865_v24 }
 0x313   : > { %3212 = vrot.lane.b32.xlu2 %v4254_v40, %s4425_s22  ;;  %2359 = vrot.lane.b32.xlu1 %v6620_v49, %s4425_s22 }
 0x314   : > { %3084 = vrot.lane.b32.xlu0 %v6620_v49, %s4424_s21  ;;  %v1830_v17 = vpop.f32.mrf.mxu1 }
 0x315   : > { %v1831_v19 = vadd.f32 %v6351_v12, %v1830_v17  ;;  %v6634_v10 = vpop.permute.xlu2 %2343  ;;  %v2937_v14 = vpop.permute.xlu1 %2936  ;;  %v3954_v17 = vld [vmem:[%s4470_s19 + $0x20] sm:$0xff] }
 0x316   : > { %v3191_v56 = vpop.permute.xlu0 %3190  ;;  %v3287_v32 = vsel %vm721_vm0, %v4148_v20, %v2937_v14  ;;  %v2434_v14 = vsel %vm721_vm0, %v3954_v17, %v6149_v37  ;;  %v4255_v17 = vld [vmem:[%s4470_s19 + $0xc2] sm:$0xff] }
 0x317   : > { %3934 = vst.msk [vmem:[%s5449_s5 + $0x168] sm:$0xff] %vm721_vm0, %v1831_v19  ;;  %3918 = vmatmul.msk.f32.gmra.mxu1 %vm825_vm2, %v1672_v57  ;;  %v3350_v5 = vsel %vm787_vm3, %v3318_v3, %v3191_v56  ;;  %v7866_v19 = vld [vmem:[#allocation10_spill] sm:$0xff]  ;;  %v2466_v36 = vsel %vm754_vm1, %v2434_v14, %v6437_v61  ;;  %v7867_v61 = vld [vmem:[#allocation47_spill] sm:$0xff] }
 0x318   : > { %4277 = vmatmul.msk.f32.vlgmr.msra.gmra.mxu3 %vm825_vm2, %v3350_v5  ;;  %v1641_v57 = vsel %vm754_vm1, %v1609_v25, %v7866_v19  ;;  %v3319_v5 = vsel %vm754_vm1, %v3287_v32, %v6550_v7  ;;  %v6679_v7 = vld [vmem:[%s4470_s19 + $0xc9] sm:$0xff] }
 0x31b   : > { %2361 = vrot.lane.b32.xlu2 %v6646_v8, %s4425_s22  ;;  %3086 = vrot.lane.b32.xlu1 %v6646_v8, %s4424_s21 }
 0x31c   : > { %2958 = vrot.lane.b32.xlu0 %v4253_v41, %s4423_s20  ;;  %v1833_v26 = vpop.f32.mrf.mxu1  ;;  %v1673_v41 = vsel %vm787_vm3, %v1641_v57, %v6120_v16  ;;  %v4392_v16 = vld [vmem:[%s4470_s19 + $0x171] sm:$0xff] }
 0x31d   : > { %v1834_v56 = vadd.f32 %v6351_v12, %v1833_v26  ;;  %v6663_v3 = vpop.permute.xlu2 %3070  ;;  %v3193_v20 = vpop.permute.xlu1 %3192  ;;  %v1610_v32 = vsel %vm721_vm0, %v4392_v16, %v7867_v61  ;;  %v2435_v26 = vsel %vm721_vm0, %v6014_v1, %v6060_v38  ;;  %v7868_v57 = vld [vmem:[#allocation68_spill] sm:$0xff]  ;;  %v3288_v1 = vsel %vm721_vm0, %v6217_v45, %v6583_v15 }
 0x31e   : > { %v2340_v24 = vpop.permute.xlu0 %2339  ;;  %v3351_v25 = vsel %vm787_vm3, %v3319_v5, %v3193_v20  ;;  %v1642_v14 = vsel %vm754_vm1, %v1610_v32, %v7868_v57  ;;  %v2436_v15 = vsel %vm721_vm0, %v6046_v48, %v6183_v39  ;;  %v4150_v32 = vld [vmem:[%s4470_s19 + $0x39] sm:$0xff] }
 0x31f   : > { %3935 = vst.msk [vmem:[%s5449_s5 + $0x170] sm:$0xff] %vm721_vm0, %v1834_v56  ;;  %3919 = vmatmul.msk.f32.gmra.mxu1 %vm825_vm2, %v1673_v41  ;;  %v2498_v37 = vsel %vm787_vm3, %v2466_v36, %v2340_v24  ;;  %v2467_v56 = vsel %vm754_vm1, %v2435_v26, %v6435_v33  ;;  %v1674_v41 = vsel %vm787_vm3, %v1642_v14, %v6028_v30  ;;  %v4256_v33 = vld [vmem:[%s4470_s19 + $0xca] sm:$0xff]  ;;  %v4257_v26 = vld [vmem:[%s4470_s19 + $0xda] sm:$0xff] }
 0x320   : > { %4084 = vmatmul.msk.f32.gmra.mxu2 %vm825_vm2, %v2498_v37  ;;  %4278 = vmatmul.msk.f32.gmra.mxu3 %vm825_vm2, %v3351_v25  ;;  %v2468_v16 = vsel %vm754_vm1, %v2436_v15, %v6354_v53  ;;  %v6732_v48 = vld [vmem:[%s4470_s19 + $0xd9] sm:$0xff] }
 0x323   : > { %3088 = vrot.lane.b32.xlu2 %v6679_v7, %s4424_s21  ;;  %2960 = vrot.lane.b32.xlu1 %v4254_v40, %s4423_s20 }
 0x324   : > { %3214 = vrot.lane.b32.xlu0 %v4255_v17, %s4425_s22  ;;  %v1836_v19 = vpop.f32.mrf.mxu1 }
 0x325   : > { %v1837_v40 = vadd.f32 %v6351_v12, %v1836_v19  ;;  %v6697_v20 = vpop.permute.xlu2 %2944  ;;  %v2342_v5 = vpop.permute.xlu1 %2341 }
 0x326   : > { %v3067_v38 = vpop.permute.xlu0 %3066  ;;  %v2499_v36 = vsel %vm787_vm3, %v2467_v56, %v2342_v5  ;;  %v6747_v5 = vld [vmem:[%s4470_s19 + $0xe1] sm:$0xff] }
 0x327   : > { %3936 = vst.msk [vmem:[%s5449_s5 + $0x178] sm:$0xff] %vm721_vm0, %v1837_v40  ;;  %v3320_v24 = vsel %vm754_vm1, %v3288_v1, %v3067_v38  ;;  %3920 = vmatmul.msk.f32.gmra.mxu1 %vm825_vm2, %v1674_v41  ;;  %v2437_v38 = vsel %vm721_vm0, %v6043_v34, %v6181_v63  ;;  %v6773_v34 = vld [vmem:[%s4470_s19 + $0xf1] sm:$0xff]  ;;  %v4258_v63 = vld [vmem:[%s4470_s19 + $0xe2] sm:$0xff] }
 0x328   : > { %4085 = vmatmul.msk.f32.gmra.mxu2 %vm825_vm2, %v2499_v36  ;;  %v3352_v30 = vsel %vm787_vm3, %v3320_v24, %v6610_v60 }
 0x329   : > { %4279 = vmatmul.msk.f32.gmra.mxu3 %vm825_vm2, %v3352_v30 }
 0x32b   : > { %2962 = vrot.lane.b32.xlu2 %v4255_v17, %s4423_s20  ;;  %3216 = vrot.lane.b32.xlu1 %v4256_v33, %s4425_s22  ;;  %v2500_v17 = vsel %vm787_vm3, %v2468_v16, %v6634_v10 }
 0x32c   : > { %2363 = vrot.lane.b32.xlu0 %v6679_v7, %s4425_s22  ;;  %v1839_v45 = vpop.f32.mrf.mxu1 }
 0x32d   : > { %v1840_v25 = vadd.f32 %v6351_v12, %v1839_v45  ;;  %v3201_v60 = vpop.permute.xlu2 %3200  ;;  %v3069_v37 = vpop.permute.xlu1 %3068  ;;  %v2469_v45 = vsel %vm754_vm1, %v2437_v38, %v6463_v52  ;;  %v2438_v52 = vsel %vm721_vm0, %v6040_v62, %v6092_v47 }
 0x32e   : > { %v2941_v61 = vpop.permute.xlu0 %2940 }
 0x32f   : > { %3937 = vst.msk [vmem:[%s5449_s5 + $0x180] sm:$0xff] %vm721_vm0, %v1840_v25  ;;  %v3289_v39 = vsel %vm721_vm0, %v4150_v32, %v2941_v61  ;;  %v3291_v32 = vsel %vm721_vm0, %v6314_v58, %v6697_v20  ;;  %v2439_v20 = vsel %vm721_vm0, %v6078_v28, %v6209_v44 }
 0x330   : > { %4086 = vmatmul.msk.f32.gmra.mxu2 %vm825_vm2, %v2500_v17  ;;  %v3321_v56 = vsel %vm754_vm1, %v3289_v39, %v3069_v37  ;;  %v2470_v37 = vsel %vm754_vm1, %v2438_v52, %v6458_v18  ;;  %v4259_v18 = vld [vmem:[%s4470_s19 + $0xf2] sm:$0xff] }
 0x333   : > { %3218 = vrot.lane.b32.xlu2 %v4257_v26, %s4425_s22  ;;  %2365 = vrot.lane.b32.xlu1 %v6732_v48, %s4425_s22 }
 0x334   : > { %3090 = vrot.lane.b32.xlu0 %v6732_v48, %s4424_s21  ;;  %v1842_v53 = vpop.f32.mrf.mxu1 }
 0x335   : > { %v1843_v10 = vadd.f32 %v6351_v12, %v1842_v53  ;;  %v2350_v19 = vpop.permute.xlu2 %2349  ;;  %v2943_v57 = vpop.permute.xlu1 %2942 }
 0x336   : > { %v3197_v14 = vpop.permute.xlu0 %3196  ;;  %v3290_v41 = vsel %vm721_vm0, %v6289_v54, %v2943_v57  ;;  %v2471_v57 = vsel %vm754_vm1, %v2439_v20, %v6376_v46 }
 0x337   : > { %3938 = vst.msk [vmem:[%s5449_s5 + $0x188] sm:$0xff] %vm721_vm0, %v1843_v10  ;;  %v3353_v40 = vsel %vm787_vm3, %v3321_v56, %v3197_v14  ;;  %v3322_v30 = vsel %vm754_vm1, %v3290_v41, %v6663_v3  ;;  %v2503_v56 = vsel %vm787_vm3, %v2471_v57, %v2350_v19  ;;  %v4260_v41 = vld [vmem:[%s4470_s19 + $0xfa] sm:$0xff] }
 0x338   : > { %4280 = vmatmul.msk.f32.gmra.mxu3 %vm825_vm2, %v3353_v40  ;;  %v4153_v40 = vld [vmem:[%s4470_s19 + $0x61] sm:$0xff] }
 0x33b   : > { %2367 = vrot.lane.b32.xlu2 %v6747_v5, %s4425_s22  ;;  %3092 = vrot.lane.b32.xlu1 %v6747_v5, %s4424_s21 }
 0x33c   : > { %2964 = vrot.lane.b32.xlu0 %v4256_v33, %s4423_s20  ;;  %v1845_v1 = vpop.f32.mrf.mxu1 }
 0x33d   : > { %v1846_v36 = vadd.f32 %v6351_v12, %v1845_v1  ;;  %v6760_v24 = vpop.permute.xlu2 %3076  ;;  %v3199_v54 = vpop.permute.xlu1 %3198  ;;  %v6816_v1 = vld [vmem:[%s4470_s19 + $0xf9] sm:$0xff] }
 0x33e   : > { %v2346_v15 = vpop.permute.xlu0 %2345  ;;  %v3354_v25 = vsel %vm787_vm3, %v3322_v30, %v3199_v54 }
 0x33f   : > { %3939 = vst.msk [vmem:[%s5449_s5 + $0x190] sm:$0xff] %vm721_vm0, %v1846_v36  ;;  %v2501_v33 = vsel %vm787_vm3, %v2469_v45, %v2346_v15  ;;  %v6831_v45 = vld [vmem:[%s4470_s19 + $0x109] sm:$0xff] }
 0x340   : > { %4087 = vmatmul.msk.f32.gmra.mxu2 %vm825_vm2, %v2501_v33  ;;  %4281 = vmatmul.msk.f32.gmra.mxu3 %vm825_vm2, %v3354_v25  ;;  %v2440_v33 = vsel %vm721_vm0, %v6075_v11, %v6207_v31  ;;  %v4261_v11 = vld [vmem:[%s4470_s19 + $0x10a] sm:$0xff] }
 0x341   : > { %v6858_v31 = vld [vmem:[%s4470_s19 + $0x110] sm:$0xff] }
 0x343   : > { %3094 = vrot.lane.b32.xlu2 %v6773_v34, %s4424_s21  ;;  %2966 = vrot.lane.b32.xlu1 %v4257_v26, %s4423_s20 }
 0x344   : > { %3220 = vrot.lane.b32.xlu0 %v4258_v63, %s4425_s22  ;;  %v1848_v3 = vpop.f32.mrf.mxu1 }
 0x345   : > { %v1849_v16 = vadd.f32 %v6351_v12, %v1848_v3  ;;  %v6786_v61 = vpop.permute.xlu2 %2950  ;;  %v2348_v17 = vpop.permute.xlu1 %2347 }
 0x346   : > { %v3073_v26 = vpop.permute.xlu0 %3072  ;;  %v2502_v39 = vsel %vm787_vm3, %v2470_v37, %v2348_v17  ;;  %v2472_v37 = vsel %vm754_vm1, %v2440_v33, %v6491_v0  ;;  %v2441_v0 = vsel %vm721_vm0, %v6072_v43, %v6118_v23 }
 0x347   : > { %3940 = vst.msk [vmem:[%s5449_s5 + $0x198] sm:$0xff] %vm721_vm0, %v1849_v16  ;;  %v3323_v62 = vsel %vm754_vm1, %v3291_v32, %v3073_v26  ;;  %v2473_v26 = vsel %vm754_vm1, %v2441_v0, %v6484_v6  ;;  %v4262_v6 = vld [vmem:[%s4470_s19 + $0x112] sm:$0xff] }
 0x348   : > { %4088 = vmatmul.msk.f32.gmra.mxu2 %vm825_vm2, %v2502_v39  ;;  %v3355_v47 = vsel %vm787_vm3, %v3323_v62, %v3201_v60 }
 0x349   : > { %4282 = vmatmul.msk.f32.gmra.mxu3 %vm825_vm2, %v3355_v47 }
 0x34b   : > { %2968 = vrot.lane.b32.xlu2 %v4258_v63, %s4423_s20  ;;  %3222 = vrot.lane.b32.xlu1 %v4259_v18, %s4425_s22 }
 0x34c   : > { %2369 = vrot.lane.b32.xlu0 %v6773_v34, %s4425_s22  ;;  %v1851_v58 = vpop.f32.mrf.mxu1 }
 0x34d   : > { %v1852_v53 = vadd.f32 %v6351_v12, %v1851_v58  ;;  %v3207_v60 = vpop.permute.xlu2 %3206  ;;  %v3075_v10 = vpop.permute.xlu1 %3074 }
 0x34e   : > { %v2947_v14 = vpop.permute.xlu0 %2946 }
 0x34f   : > { %3941 = vst.msk [vmem:[%s5449_s5 + $0x1a0] sm:$0xff] %vm721_vm0, %v1852_v53  ;;  %v3292_v28 = vsel %vm721_vm0, %v4153_v40, %v2947_v14  ;;  %v6883_v53 = vld [vmem:[%s4470_s19 + $0x111] sm:$0xff] }
 0x350   : > { %4089 = vmatmul.msk.f32.gmra.mxu2 %vm825_vm2, %v2503_v56  ;;  %v3324_v54 = vsel %vm754_vm1, %v3292_v28, %v3075_v10  ;;  %v6905_v28 = vld [vmem:[%s4470_s19 + $0x121] sm:$0xff] }
 0x353   : > { %3224 = vrot.lane.b32.xlu2 %v4260_v41, %s4425_s22  ;;  %2371 = vrot.lane.b32.xlu1 %v6816_v1, %s4425_s22 }
 0x354   : > { %3096 = vrot.lane.b32.xlu0 %v6816_v1, %s4424_s21  ;;  %v1854_v44 = vpop.f32.mrf.mxu1 }
 0x355   : > { %v1855_v46 = vadd.f32 %v6351_v12, %v1854_v44  ;;  %v2356_v19 = vpop.permute.xlu2 %2355  ;;  %v2949_v38 = vpop.permute.xlu1 %2948 }
 0x356   : > { %v3203_v36 = vpop.permute.xlu0 %3202  ;;  %v3293_v15 = vsel %vm721_vm0, %v6389_v59, %v2949_v38 }
 0x357   : > { %3942 = vst.msk [vmem:[%s5449_s5 + $0x1a8] sm:$0xff] %vm721_vm0, %v1855_v46  ;;  %v3356_v30 = vsel %vm787_vm3, %v3324_v54, %v3203_v36  ;;  %v3325_v3 = vsel %vm754_vm1, %v3293_v15, %v6760_v24 }
 0x358   : > { %4283 = vmatmul.msk.f32.gmra.mxu3 %vm825_vm2, %v3356_v30  ;;  %v4263_v30 = vld [vmem:[%s4470_s19 + $0x122] sm:$0xff] }
 0x35b   : > { %2373 = vrot.lane.b32.xlu2 %v6831_v45, %s4425_s22  ;;  %3098 = vrot.lane.b32.xlu1 %v6831_v45, %s4424_s21 }
 0x35c   : > { %2970 = vrot.lane.b32.xlu0 %v4259_v18, %s4423_s20  ;;  %v1857_v25 = vpop.f32.mrf.mxu1  ;;  %v3294_v18 = vsel %vm721_vm0, %v6420_v29, %v6786_v61  ;;  %v2442_v61 = vsel %vm721_vm0, %v6106_v2, %v6235_v55  ;;  %v6908_v2 = vld [vmem:[%s4470_s19 + $0x120] sm:$0xff] }
 0x35d   : > { %v1858_v63 = vadd.f32 %v6351_v12, %v1857_v25  ;;  %v6844_v52 = vpop.permute.xlu2 %3082  ;;  %v3205_v59 = vpop.permute.xlu1 %3204  ;;  %v2474_v14 = vsel %vm754_vm1, %v2442_v61, %v6405_v22 }
 0x35e   : > { %v2352_v16 = vpop.permute.xlu0 %2351  ;;  %v3357_v17 = vsel %vm787_vm3, %v3325_v3, %v3205_v59  ;;  %v2506_v40 = vsel %vm787_vm3, %v2474_v14, %v2356_v19  ;;  %v4393_v59 = vld [vmem:[%s4470_s19 + $0x90] sm:$0xff]  ;;  %v7869_v3 = vld [vmem:[#allocation71_spill] sm:$0xff] }
 0x35f   : > { %3943 = vst.msk [vmem:[%s5449_s5 + $0x1b0] sm:$0xff] %vm721_vm0, %v1858_v63  ;;  %v2504_v32 = vsel %vm787_vm3, %v2472_v37, %v2352_v16  ;;  %v2443_v37 = vsel %vm721_vm0, %v4393_v59, %v7869_v3  ;;  %v4264_v14 = vld [vmem:[%s4470_s19 + $0x12a] sm:$0xff] }
 0x360   : > { %4090 = vmatmul.msk.f32.gmra.mxu2 %vm825_vm2, %v2504_v32  ;;  %4284 = vmatmul.msk.f32.gmra.mxu3 %vm825_vm2, %v3357_v17 }
 0x363   : > { %2247 = vrot.lane.b32.xlu2 %v6858_v31, %s4424_s21  ;;  %2972 = vrot.lane.b32.xlu1 %v4260_v41, %s4423_s20  ;;  %v4156_v41 = vld [vmem:[%s4470_s19 + $0x81] sm:$0xff] }
 0x364   : > { %3226 = vrot.lane.b32.xlu0 %v4261_v11, %s4425_s22  ;;  %v1860_v24 = vpop.f32.mrf.mxu1 }
 0x365   : > { %v1861_v39 = vadd.f32 %v6351_v12, %v1860_v24  ;;  %v6870_v62 = vpop.permute.xlu2 %2956  ;;  %v2354_v47 = vpop.permute.xlu1 %2353 }
 0x366   : > { %v3079_v58 = vpop.permute.xlu0 %3078  ;;  %v2505_v20 = vsel %vm787_vm3, %v2473_v26, %v2354_v47  ;;  %v6954_v47 = vld [vmem:[%s4470_s19 + $0x128] sm:$0xff] }
 0x367   : > { %3944 = vst.msk [vmem:[%s5449_s5 + $0x1b8] sm:$0xff] %vm721_vm0, %v1861_v39  ;;  %v3326_v43 = vsel %vm754_vm1, %v3294_v18, %v3079_v58  ;;  %v6951_v39 = vld [vmem:[%s4470_s19 + $0x129] sm:$0xff] }
 0x368   : > { %4091 = vmatmul.msk.f32.gmra.mxu2 %vm825_vm2, %v2505_v20  ;;  %v3358_v23 = vsel %vm787_vm3, %v3326_v43, %v3207_v60 }
 0x369   : > { %4285 = vmatmul.msk.f32.gmra.mxu3 %vm825_vm2, %v3358_v23 }
 0x36b   : > { %3228 = vrot.lane.b32.xlu2 %v4262_v6, %s4425_s22  ;;  %2375 = vrot.lane.b32.xlu1 %v6883_v53, %s4425_s22 }
 0x36c   : > { %3100 = vrot.lane.b32.xlu0 %v6883_v53, %s4424_s21  ;;  %v1863_v29 = vpop.f32.mrf.mxu1 }
 0x36d   : > { %v1864_v60 = vadd.f32 %v6351_v12, %v1863_v29  ;;  %v6895_v10 = vpop.permute.xlu2 %3212  ;;  %v3081_v57 = vpop.permute.xlu1 %3080  ;;  %v3297_v29 = vsel %vm721_vm0, %v6534_v4, %v6870_v62  ;;  %v4395_v62 = vld [vmem:[%s4470_s19 + $0xa8] sm:$0xff] }
 0x36e   : > { %v2953_v56 = vpop.permute.xlu0 %2952 }
 0x36f   : > { %3945 = vst.msk [vmem:[%s5449_s5 + $0x1c0] sm:$0xff] %vm721_vm0, %v1864_v60  ;;  %v3295_v55 = vsel %vm721_vm0, %v4156_v41, %v2953_v56  ;;  %v6983_v56 = vld [vmem:[%s4470_s19 + $0x138] sm:$0xff] }
 0x370   : > { %4092 = vmatmul.msk.f32.gmra.mxu2 %vm825_vm2, %v2506_v40  ;;  %v3327_v36 = vsel %vm754_vm1, %v3295_v55, %v3081_v57  ;;  %v7871_v40 = vld [vmem:[#allocation72_spill] sm:$0xff] }
 0x371   : > { %v2445_v41 = vsel %vm721_vm0, %v4395_v62, %v7871_v40 }
 0x373   : > { %3102 = vrot.lane.b32.xlu2 %v6905_v28, %s4424_s21  ;;  %2249 = vrot.lane.b32.xlu1 %v6908_v2, %s4424_s21 }
 0x374   : > { %2974 = vrot.lane.b32.xlu0 %v4261_v11, %s4423_s20  ;;  %v1866_v22 = vpop.f32.mrf.mxu1  ;;  %v2475_v11 = vsel %vm754_vm1, %v2443_v37, %v6523_v21  ;;  %v4394_v21 = vld [vmem:[%s4470_s19 + $0x98] sm:$0xff]  ;;  %v7022_v37 = vld [vmem:[%s4470_s19 + $0x141] sm:$0xff] }
 0x375   : > { %v1867_v44 = vadd.f32 %v6351_v12, %v1866_v22  ;;  %v6917_v46 = vpop.permute.xlu2 %2361  ;;  %v2955_v19 = vpop.permute.xlu1 %2954 }
 0x376   : > { %v3209_v38 = vpop.permute.xlu0 %3208  ;;  %v3296_v15 = vsel %vm721_vm0, %v6498_v51, %v2955_v19 }
 0x377   : > { %3946 = vst.msk [vmem:[%s5449_s5 + $0x1c8] sm:$0xff] %vm721_vm0, %v1867_v44  ;;  %v3359_v54 = vsel %vm787_vm3, %v3327_v36, %v3209_v38  ;;  %v3328_v32 = vsel %vm754_vm1, %v3296_v15, %v6844_v52  ;;  %v7870_v52 = vld [vmem:[#allocation32_spill] sm:$0xff]  ;;  %v7872_v44 = vld [vmem:[#allocation18_spill] sm:$0xff] }
 0x378   : > { %4286 = vmatmul.msk.f32.gmra.mxu3 %vm825_vm2, %v3359_v54  ;;  %v2444_v18 = vsel %vm721_vm0, %v4394_v21, %v7870_v52  ;;  %v2477_v19 = vsel %vm754_vm1, %v2445_v41, %v7872_v44  ;;  %v4265_v54 = vld [vmem:[%s4470_s19 + $0x13a] sm:$0xff] }
 0x379   : > { %v2476_v20 = vsel %vm754_vm1, %v2444_v18, %v6519_v13  ;;  %v2509_v36 = vsel %vm787_vm3, %v2477_v19, %v6917_v46 }
 0x37a   : > { %v2645_v25 = vpop.f32.mrf.mxu2 }
 0x37b   : > { %v2646_v33 = vadd.f32 %v6351_v12, %v2645_v25  ;;  %2976 = vrot.lane.b32.xlu2 %v4262_v6, %s4423_s20  ;;  %3230 = vrot.lane.b32.xlu1 %v4263_v30, %s4425_s22 }
 0x37c   : > { %2377 = vrot.lane.b32.xlu0 %v6905_v28, %s4425_s22  ;;  %v1869_v63 = vpop.f32.mrf.mxu1 }
 0x37d   : > { %4115 = vst.msk [vmem:[%s5449_s5 + $0x200] sm:$0xff] %vm721_vm0, %v2646_v33  ;;  %v1870_v51 = vadd.f32 %v6351_v12, %v1869_v63  ;;  %v6938_v16 = vpop.permute.xlu2 %3088  ;;  %v3211_v17 = vpop.permute.xlu1 %3210 }
 0x37e   : > { %v2358_v0 = vpop.permute.xlu0 %2357  ;;  %v3360_v24 = vsel %vm787_vm3, %v3328_v32, %v3211_v17 }
 0x37f   : > { %3947 = vst.msk [vmem:[%s5449_s5 + $0x1d0] sm:$0xff] %vm721_vm0, %v1870_v51  ;;  %v2507_v26 = vsel %vm787_vm3, %v2475_v11, %v2358_v0  ;;  %v7025_v51 = vld [vmem:[%s4470_s19 + $0x140] sm:$0xff] }
 0x380   : > { %4093 = vmatmul.msk.f32.gmra.mxu2 %vm825_vm2, %v2507_v26  ;;  %4287 = vmatmul.msk.f32.gmra.mxu3 %vm825_vm2, %v3360_v24 }
 0x383   : > { %2379 = vrot.lane.b32.xlu2 %v6951_v39, %s4425_s22  ;;  %3104 = vrot.lane.b32.xlu1 %v6951_v39, %s4424_s21 }
 0x384   : > { %2251 = vrot.lane.b32.xlu0 %v6954_v47, %s4424_s21  ;;  %v1872_v58 = vpop.f32.mrf.mxu1 }
 0x385   : > { %v1873_v43 = vadd.f32 %v6351_v12, %v1872_v58  ;;  %v6968_v23 = vpop.permute.xlu2 %2962  ;;  %v2360_v6 = vpop.permute.xlu1 %2359 }
 0x386   : > { %v3085_v61 = vpop.permute.xlu0 %3084  ;;  %v2508_v60 = vsel %vm787_vm3, %v2476_v20, %v2360_v6  ;;  %v4266_v20 = vld [vmem:[%s4470_s19 + $0x142] sm:$0xff] }
 0x387   : > { %3948 = vst.msk [vmem:[%s5449_s5 + $0x1d8] sm:$0xff] %vm721_vm0, %v1873_v43  ;;  %v3329_v57 = vsel %vm754_vm1, %v3297_v29, %v3085_v61 }
 0x388   : > { %4094 = vmatmul.msk.f32.gmra.mxu2 %vm825_vm2, %v2508_v60  ;;  %v3361_v13 = vsel %vm787_vm3, %v3329_v57, %v6895_v10 }
 0x389   : > { %4288 = vmatmul.msk.f32.gmra.mxu3 %vm825_vm2, %v3361_v13  ;;  %v3300_v13 = vsel %vm721_vm0, %v6646_v8, %v6968_v23  ;;  %v7075_v8 = vld [vmem:[%s4470_s19 + $0x151] sm:$0xff] }
 0x38a   : > { %v4041_v23 = vld [vmem:[%s4470_s19 + $0x150] sm:$0xff] }
 0x38b   : > { %2253 = vrot.lane.b32.xlu2 %v6983_v56, %s4424_s21  ;;  %2978 = vrot.lane.b32.xlu1 %v4263_v30, %s4423_s20  ;;  %v7004_v30 = vld [vmem:[%s4470_s19 + $0x139] sm:$0xff] }
 0x38c   : > { %3232 = vrot.lane.b32.xlu0 %v4264_v14, %s4425_s22  ;;  %v1875_v4 = vpop.f32.mrf.mxu1 }
 0x38d   : > { %v1876_v10 = vadd.f32 %v6351_v12, %v1875_v4  ;;  %v6993_v55 = vpop.permute.xlu2 %3218  ;;  %v3087_v22 = vpop.permute.xlu1 %3086 }
 0x38e   : > { %v2959_v38 = vpop.permute.xlu0 %2958 }
 0x38f   : > { %3949 = vst.msk [vmem:[%s5449_s5 + $0x1e0] sm:$0xff] %vm721_vm0, %v1876_v10  ;;  %v3298_v15 = vsel %vm721_vm0, %v6567_v35, %v2959_v38 }
 0x390   : > { %4095 = vmatmul.msk.f32.gmra.mxu2 %vm825_vm2, %v2509_v36  ;;  %v3330_v3 = vsel %vm754_vm1, %v3298_v15, %v3087_v22  ;;  %v7101_v15 = vld [vmem:[%s4470_s19 + $0x158] sm:$0xff] }
 0x393   : > { %3234 = vrot.lane.b32.xlu2 %v4265_v54, %s4425_s22  ;;  %2381 = vrot.lane.b32.xlu1 %v7004_v30, %s4425_s22 }
 0x394   : > { %3106 = vrot.lane.b32.xlu0 %v7004_v30, %s4424_s21  ;;  %v1878_v25 = vpop.f32.mrf.mxu1 }
 0x395   : > { %v1879_v46 = vadd.f32 %v6351_v12, %v1878_v25  ;;  %v7014_v33 = vpop.permute.xlu2 %2367  ;;  %v2961_v63 = vpop.permute.xlu1 %2960 }
 0x396   : > { %v3215_v59 = vpop.permute.xlu0 %3214  ;;  %v3299_v17 = vsel %vm721_vm0, %v6620_v49, %v2961_v63 }
 0x397   : > { %3950 = vst.msk [vmem:[%s5449_s5 + $0x1e8] sm:$0xff] %vm721_vm0, %v1879_v46  ;;  %v3362_v35 = vsel %vm787_vm3, %v3330_v3, %v3215_v59  ;;  %v3331_v49 = vsel %vm754_vm1, %v3299_v17, %v6938_v16  ;;  %v4268_v17 = vld [vmem:[%s4470_s19 + $0x15a] sm:$0xff] }
 0x398   : > { %4289 = vmatmul.msk.f32.gmra.mxu3 %vm825_vm2, %v3362_v35 }
 0x39b   : > { %v3498_v32 = vpop.f32.mrf.mxu3  ;;  %3108 = vrot.lane.b32.xlu2 %v7022_v37, %s4424_s21  ;;  %2255 = vrot.lane.b32.xlu1 %v7025_v51, %s4424_s21 }
 0x39c   : > { %v3499_v11 = vadd.f32 %v6351_v12, %v3498_v32  ;;  %2980 = vrot.lane.b32.xlu0 %v4264_v14, %s4423_s20  ;;  %v1881_v0 = vpop.f32.mrf.mxu1  ;;  %v7117_v32 = vld [vmem:[%s4470_s19 + $0x159] sm:$0xff] }
 0x39d   : > { %v1882_v24 = vadd.f32 %v6351_v12, %v1881_v0  ;;  %v7036_v26 = vpop.permute.xlu2 %3094  ;;  %v3217_v21 = vpop.permute.xlu1 %3216 }
 0x39e   : > { %4309 = vst.msk [vmem:[%s5449_s5 + $0x300] sm:$0xff] %vm721_vm0, %v3499_v11  ;;  %v2364_v52 = vpop.permute.xlu0 %2363  ;;  %v3363_v18 = vsel %vm787_vm3, %v3331_v49, %v3217_v21 }
 0x39f   : > { %3951 = vst.msk [vmem:[%s5449_s5 + $0x1f0] sm:$0xff] %vm721_vm0, %v1882_v24  ;;  %v2510_v58 = vsel %vm787_vm3, %v6563_v9, %v2364_v52 }
 0x3a0   : > { %4096 = vmatmul.msk.f32.gmra.mxu2 %vm825_vm2, %v2510_v58  ;;  %4290 = vmatmul.msk.f32.gmra.mxu3 %vm825_vm2, %v3363_v18 }
 0x3a3   : > { %v2648_v43 = vpop.f32.mrf.mxu2  ;;  %v3501_v6 = vpop.f32.mrf.mxu3  ;;  %2982 = vrot.lane.b32.xlu2 %v4265_v54, %s4423_s20  ;;  %3236 = vrot.lane.b32.xlu1 %v4266_v20, %s4425_s22  ;;  %v4267_v54 = vld [vmem:[%s4470_s19 + $0x152] sm:$0xff] }
 0x3a4   : > { %v2649_v16 = vadd.f32 %v6351_v12, %v2648_v43  ;;  %v3502_v29 = vadd.f32 %v6351_v12, %v3501_v6  ;;  %2383 = vrot.lane.b32.xlu0 %v7022_v37, %s4425_s22  ;;  %v1884_v9 = vpop.f32.mrf.mxu1  ;;  %v4043_v43 = vld [vmem:[%s4470_s19 + $0x168] sm:$0xff] }
 0x3a5   : > { %v1885_v61 = vadd.f32 %v6351_v12, %v1884_v9  ;;  %v7057_v60 = vpop.permute.xlu2 %2968  ;;  %v2366_v57 = vpop.permute.xlu1 %2365 }
 0x3a6   : > { %4116 = vst.msk [vmem:[%s5449_s5 + $0x208] sm:$0xff] %vm721_vm0, %v2649_v16  ;;  %v3091_v14 = vpop.permute.xlu0 %3090  ;;  %v2511_v4 = vsel %vm787_vm3, %v6558_v27, %v2366_v57 }
 0x3a7   : > { %4310 = vst.msk [vmem:[%s5449_s5 + $0x308] sm:$0xff] %vm721_vm0, %v3502_v29  ;;  %v3332_v62 = vsel %vm754_vm1, %v3300_v13, %v3091_v14 }
 0x3a8   : > { %3952 = vst.msk [vmem:[%s5449_s5 + $0x1f8] sm:$0xff] %vm721_vm0, %v1885_v61  ;;  %4097 = vmatmul.msk.f32.gmra.mxu2 %vm825_vm2, %v2511_v4  ;;  %v3364_v40 = vsel %vm787_vm3, %v3332_v62, %v6993_v55  ;;  %v7088_v55 = vld [vmem:[%s7557_s2] ss:$0 sm:$0xff]  ;;  %v3303_v61 = vsel %vm721_vm0, %v6747_v5, %v7057_v60  ;;  %v4269_v62 = vld [vmem:[%s4470_s19 + $0x16a] sm:$0xff] }
 0x3a9   : > { %4291 = vmatmul.msk.f32.gmra.mxu3 %vm825_vm2, %v3364_v40 }
 0x3ab   : > { %v2651_v27 = vpop.f32.mrf.mxu2  ;;  %2385 = vrot.lane.b32.xlu2 %v7075_v8, %s4425_s22  ;;  %3110 = vrot.lane.b32.xlu1 %v7075_v8, %s4424_s21 }
 0x3ac   : > { %v2652_v41 = vadd.f32 %v6351_v12, %v2651_v27  ;;  %2257 = vrot.lane.b32.xlu0 %v4041_v23, %s4424_s21  ;;  %v3504_v10 = vpop.f32.mrf.mxu3  ;;  %v7873_v12 = vld [vmem:[#allocation77_spill] sm:$0xff] }
 0x3ad   : > { %v3505_v22 = vadd.f32 %v7088_v55, %v3504_v10  ;;  %v3225_v44 = vpop.permute.xlu2 %3224  ;;  %v3093_v19 = vpop.permute.xlu1 %3092  ;;  %v2512_v36 = vsel %vm787_vm3, %v7873_v12, %v7014_v33  ;;  %v7874_v10 = vld [vmem:[#allocation61_spill] sm:$0xff] }
 0x3ae   : > { %4117 = vst.msk [vmem:[%s5449_s5 + $0x210] sm:$0xff] %vm721_vm0, %v2652_v41  ;;  %v2965_v38 = vpop.permute.xlu0 %2964 }
 0x3af   : > { %4311 = vst.msk [vmem:[%s5449_s5 + $0x310] sm:$0xff] %vm721_vm0, %v3505_v22  ;;  %v3301_v25 = vsel %vm721_vm0, %v6679_v7, %v2965_v38 }
 0x3b0   : > { %4098 = vmatmul.msk.f32.gmra.mxu2 %vm825_vm2, %v2512_v36  ;;  %v3333_v35 = vsel %vm754_vm1, %v3301_v25, %v3093_v19  ;;  %v4044_v19 = vld [vmem:[%s4470_s19 + $0x170] sm:$0xff] }
 0x3b3   : > { %v2654_v46 = vpop.f32.mrf.mxu2  ;;  %2259 = vrot.lane.b32.xlu2 %v7101_v15, %s4424_s21  ;;  %2984 = vrot.lane.b32.xlu1 %v4266_v20, %s4423_s20  ;;  %v7139_v20 = vld [vmem:[%s4470_s19 + $0x169] sm:$0xff] }
 0x3b4   : > { %v2655_v63 = vadd.f32 %v7088_v55, %v2654_v46  ;;  %3238 = vrot.lane.b32.xlu0 %v4267_v54, %s4425_s22 }
 0x3b5   : > { %v2374_v33 = vpop.permute.xlu2 %2373  ;;  %v2967_v59 = vpop.permute.xlu1 %2966 }
 0x3b6   : > { %4118 = vst.msk [vmem:[%s5449_s5 + $0x218] sm:$0xff] %vm721_vm0, %v2655_v63  ;;  %v3221_v3 = vpop.permute.xlu0 %3220  ;;  %v3302_v11 = vsel %vm721_vm0, %v6732_v48, %v2967_v59  ;;  %v2515_v22 = vsel %vm787_vm3, %v7874_v10, %v2374_v33  ;;  %v4045_v33 = vld [vmem:[%s4470_s19 + $0x180] sm:$0xff]  ;;  %v4270_v59 = vld [vmem:[%s4470_s19 + $0x172] sm:$0xff] }
 0x3b7   : > { %v3365_v7 = vsel %vm787_vm3, %v3333_v35, %v3221_v3  ;;  %v3334_v52 = vsel %vm754_vm1, %v3302_v11, %v7036_v26  ;;  %v4397_v35 = vld [vmem:[%s4470_s19 + $0xf8] sm:$0xff] }
 0x3b8   : > { %4292 = vmatmul.msk.f32.gmra.mxu3 %vm825_vm2, %v3365_v7  ;;  %v7875_v7 = vld [vmem:[#allocation73_spill] sm:$0xff] }
 0x3bb   : > { %v3507_v0 = vpop.f32.mrf.mxu3  ;;  %3240 = vrot.lane.b32.xlu2 %v4268_v17, %s4425_s22  ;;  %2387 = vrot.lane.b32.xlu1 %v7117_v32, %s4425_s22 }
 0x3bc   : > { %v3508_v24 = vadd.f32 %v7088_v55, %v3507_v0  ;;  %3112 = vrot.lane.b32.xlu0 %v7117_v32, %s4424_s21 }
 0x3bd   : > { %v7127_v21 = vpop.permute.xlu2 %2247  ;;  %v3223_v49 = vpop.permute.xlu1 %3222 }
 0x3be   : > { %4312 = vst.msk [vmem:[%s5449_s5 + $0x318] sm:$0xff] %vm721_vm0, %v3508_v24  ;;  %v2370_v48 = vpop.permute.xlu0 %2369  ;;  %v3366_v18 = vsel %vm787_vm3, %v3334_v52, %v3223_v49 }
 0x3bf   : > { %v2513_v58 = vsel %vm787_vm3, %v6596_v42, %v2370_v48 }
 0x3c0   : > { %4099 = vmatmul.msk.f32.gmra.mxu2 %vm825_vm2, %v2513_v58  ;;  %4293 = vmatmul.msk.f32.gmra.mxu3 %vm825_vm2, %v3366_v18 }
 0x3c3   : > { %v2657_v6 = vpop.f32.mrf.mxu2  ;;  %v3510_v16 = vpop.f32.mrf.mxu3  ;;  %3114 = vrot.lane.b32.xlu2 %v7139_v20, %s4424_s21  ;;  %2261 = vrot.lane.b32.xlu1 %v4043_v43, %s4424_s21 }
 0x3c4   : > { %v2658_v26 = vadd.f32 %v7088_v55, %v2657_v6  ;;  %v3511_v42 = vadd.f32 %v7088_v55, %v3510_v16  ;;  %2986 = vrot.lane.b32.xlu0 %v4267_v54, %s4423_s20  ;;  %v7217_v6 = vld [vmem:[%s4470_s19 + $0x181] sm:$0xff] }
 0x3c5   : > { %v3229_v29 = vpop.permute.xlu2 %3228  ;;  %v2372_v9 = vpop.permute.xlu1 %2371 }
 0x3c6   : > { %4119 = vst.msk [vmem:[%s5449_s5 + $0x220] sm:$0xff] %vm721_vm0, %v2658_v26  ;;  %v3097_v57 = vpop.permute.xlu0 %3096  ;;  %v2514_v13 = vsel %vm787_vm3, %v6591_v50, %v2372_v9 }
 0x3c7   : > { %4313 = vst.msk [vmem:[%s5449_s5 + $0x320] sm:$0xff] %vm721_vm0, %v3511_v42  ;;  %v3335_v14 = vsel %vm754_vm1, %v3303_v61, %v3097_v57  ;;  %v7234_v57 = vld [vmem:[%s4470_s19 + $0x189] sm:$0xff] }
 0x3c8   : > { %4100 = vmatmul.msk.f32.gmra.mxu2 %vm825_vm2, %v2514_v13  ;;  %v3367_v4 = vsel %vm787_vm3, %v3335_v14, %v3225_v44  ;;  %v7178_v44 = vld [vmem:[%s4470_s19 + $0x171] sm:$0xff]  ;;  %v4046_v13 = vld [vmem:[%s4470_s19 + $0x188] sm:$0xff] }
 0x3c9   : > { %4294 = vmatmul.msk.f32.gmra.mxu3 %vm825_vm2, %v3367_v4 }
 0x3cb   : > { %v2660_v5 = vpop.f32.mrf.mxu2  ;;  %2988 = vrot.lane.b32.xlu2 %v4268_v17, %s4423_s20  ;;  %3242 = vrot.lane.b32.xlu1 %v4269_v62, %s4425_s22  ;;  %v2452_v17 = vsel %vm721_vm0, %v4397_v35, %v7875_v7  ;;  %v4079_v7 = vld [vmem:[%s4470_s19 + $0x199] sm:$0xff] }
 0x3cc   : > { %v2661_v50 = vadd.f32 %v7088_v55, %v2660_v5  ;;  %2389 = vrot.lane.b32.xlu0 %v7139_v20, %s4425_s22  ;;  %v3513_v60 = vpop.f32.mrf.mxu3  ;;  %v2484_v0 = vsel %vm754_vm1, %v2452_v17, %v7127_v21  ;;  %v4271_v21 = vld [vmem:[%s4470_s19 + $0x182] sm:$0xff]  ;;  %v4047_v17 = vld [vmem:[%s4470_s19 + $0x198] sm:$0xff] }
 0x3cd   : > { %v3514_v40 = vadd.f32 %v7088_v55, %v3513_v60  ;;  %v7168_v23 = vpop.permute.xlu2 %3102  ;;  %v3099_v27 = vpop.permute.xlu1 %3098  ;;  %v7876_v60 = vld [vmem:[#allocation14_spill] sm:$0xff] }
 0x3ce   : > { %4120 = vst.msk [vmem:[%s5449_s5 + $0x228] sm:$0xff] %vm721_vm0, %v2661_v50  ;;  %v2971_v41 = vpop.permute.xlu0 %2970  ;;  %v4398_v50 = vld [vmem:[%s4470_s19 + $0x108] sm:$0xff] }
 0x3cf   : > { %4314 = vst.msk [vmem:[%s5449_s5 + $0x328] sm:$0xff] %vm721_vm0, %v3514_v40  ;;  %v3304_v38 = vsel %vm721_vm0, %v6773_v34, %v2971_v41  ;;  %v2453_v40 = vsel %vm721_vm0, %v4398_v50, %v7876_v60 }
 0x3d0   : > { %4101 = vmatmul.msk.f32.gmra.mxu2 %vm825_vm2, %v2515_v22  ;;  %v3336_v34 = vsel %vm754_vm1, %v3304_v38, %v3099_v27 }
 0x3d3   : > { %v2663_v12 = vpop.f32.mrf.mxu2  ;;  %2391 = vrot.lane.b32.xlu2 %v7178_v44, %s4425_s22  ;;  %3116 = vrot.lane.b32.xlu1 %v7178_v44, %s4424_s21 }
 0x3d4   : > { %v2664_v36 = vadd.f32 %v7088_v55, %v2663_v12  ;;  %2263 = vrot.lane.b32.xlu0 %v4044_v19, %s4424_s21 }
 0x3d5   : > { %v7189_v54 = vpop.permute.xlu2 %2976  ;;  %v2973_v25 = vpop.permute.xlu1 %2972 }
 0x3d6   : > { %4121 = vst.msk [vmem:[%s5449_s5 + $0x230] sm:$0xff] %vm721_vm0, %v2664_v36  ;;  %v3227_v46 = vpop.permute.xlu0 %3226  ;;  %v3305_v52 = vsel %vm721_vm0, %v6816_v1, %v2973_v25  ;;  %v4272_v36 = vld [vmem:[%s4470_s19 + $0x18a] sm:$0xff] }
 0x3d7   : > { %v3368_v63 = vsel %vm787_vm3, %v3336_v34, %v3227_v46 }
 0x3d8   : > { %4295 = vmatmul.msk.f32.gmra.mxu3 %vm825_vm2, %v3368_v63  ;;  %v7877_v63 = vld [vmem:[#allocation74_spill] sm:$0xff] }
 0x3db   : > { %v3516_v3 = vpop.f32.mrf.mxu3  ;;  %2265 = vrot.lane.b32.xlu2 %v4045_v33, %s4424_s21  ;;  %2990 = vrot.lane.b32.xlu1 %v4269_v62, %s4423_s20  ;;  %v2454_v33 = vsel %vm721_vm0, %v6858_v31, %v7877_v63 }
 0x3dc   : > { %v3517_v11 = vadd.f32 %v7088_v55, %v3516_v3  ;;  %3244 = vrot.lane.b32.xlu0 %v4270_v59, %s4425_s22 }
 0x3dd   : > { %v2380_v24 = vpop.permute.xlu2 %2379  ;;  %v2376_v49 = vpop.permute.xlu1 %2375 }
 0x3de   : > { %4315 = vst.msk [vmem:[%s5449_s5 + $0x330] sm:$0xff] %vm721_vm0, %v3517_v11  ;;  %v3101_v48 = vpop.permute.xlu0 %3100  ;;  %v2516_v18 = vsel %vm787_vm3, %v2484_v0, %v2376_v49  ;;  %v3307_v0 = vsel %vm721_vm0, %v6883_v53, %v7189_v54  ;;  %v7878_v53 = vld [vmem:[#allocation55_spill] sm:$0xff] }
 0x3df   : > { %v3337_v58 = vsel %vm754_vm1, %v3305_v52, %v3101_v48  ;;  %4102 = vmatmul.msk.f32.gmra.mxu2 %vm825_vm2, %v2516_v18  ;;  %v2455_v54 = vsel %vm721_vm0, %v6908_v2, %v7878_v53  ;;  %v7881_v53 = vld [vmem:[#allocation35_spill] sm:$0xff] }
 0x3e0   : > { %v3369_v43 = vsel %vm787_vm3, %v3337_v58, %v3229_v29  ;;  %v4048_v58 = vld [vmem:[%s4470_s19 + $0x1a0] sm:$0xff] }
 0x3e1   : > { %4296 = vmatmul.msk.f32.gmra.mxu3 %vm825_vm2, %v3369_v43  ;;  %v4273_v43 = vld [vmem:[%s4470_s19 + $0x19a] sm:$0xff] }
 0x3e3   : > { %v2666_v1 = vpop.f32.mrf.mxu2  ;;  %v3519_v16 = vpop.f32.mrf.mxu3  ;;  %3246 = vrot.lane.b32.xlu2 %v4271_v21, %s4425_s22  ;;  %2393 = vrot.lane.b32.xlu1 %v7217_v6, %s4425_s22 }
 0x3e4   : > { %v2667_v26 = vadd.f32 %v7088_v55, %v2666_v1  ;;  %v3520_v42 = vadd.f32 %v7088_v55, %v3519_v16  ;;  %3118 = vrot.lane.b32.xlu0 %v7217_v6, %s4424_s21 }
 0x3e5   : > { %v7227_v29 = vpop.permute.xlu2 %2253  ;;  %v2250_v9 = vpop.permute.xlu1 %2249 }
 0x3e6   : > { %4122 = vst.msk [vmem:[%s5449_s5 + $0x238] sm:$0xff] %vm721_vm0, %v2667_v26  ;;  %v2975_v61 = vpop.permute.xlu0 %2974  ;;  %v2485_v22 = vsel %vm754_vm1, %v2453_v40, %v2250_v9 }
 0x3e7   : > { %4316 = vst.msk [vmem:[%s5449_s5 + $0x338] sm:$0xff] %vm721_vm0, %v3520_v42  ;;  %v3306_v14 = vsel %vm721_vm0, %v6831_v45, %v2975_v61  ;;  %v2487_v42 = vsel %vm754_vm1, %v2455_v54, %v7227_v29  ;;  %v2458_v54 = vsel %vm721_vm0, %v7025_v51, %v7881_v53 }
 0x3e8   : > { %v3338_v10 = vsel %vm754_vm1, %v3306_v14, %v7168_v23 }
 0x3eb   : > { %v2669_v4 = vpop.f32.mrf.mxu2  ;;  %3120 = vrot.lane.b32.xlu2 %v7234_v57, %s4424_s21  ;;  %2267 = vrot.lane.b32.xlu1 %v4046_v13, %s4424_s21 }
 0x3ec   : > { %v2670_v62 = vadd.f32 %v7088_v55, %v2669_v4  ;;  %2992 = vrot.lane.b32.xlu0 %v4270_v59, %s4423_s20  ;;  %v3522_v5 = vpop.f32.mrf.mxu3 }
 0x3ed   : > { %v3523_v27 = vadd.f32 %v7088_v55, %v3522_v5  ;;  %v3235_v45 = vpop.permute.xlu2 %3234  ;;  %v3231_v41 = vpop.permute.xlu1 %3230  ;;  %v4274_v5 = vld [vmem:[%s4470_s19 + $0x1a2] sm:$0xff] }
 0x3ee   : > { %4123 = vst.msk [vmem:[%s5449_s5 + $0x240] sm:$0xff] %vm721_vm0, %v2670_v62  ;;  %v2378_v19 = vpop.permute.xlu0 %2377  ;;  %v3370_v38 = vsel %vm787_vm3, %v3338_v10, %v3231_v41  ;;  %v4080_v62 = vld [vmem:[%s4470_s19 + $0x1a1] sm:$0xff] }
 0x3ef   : > { %4317 = vst.msk [vmem:[%s5449_s5 + $0x340] sm:$0xff] %vm721_vm0, %v3523_v27  ;;  %v2517_v12 = vsel %vm787_vm3, %v2485_v22, %v2378_v19  ;;  %4297 = vmatmul.msk.f32.gmra.mxu3 %vm825_vm2, %v3370_v38  ;;  %v7879_v38 = vld [vmem:[#allocation56_spill] sm:$0xff] }
 0x3f0   : > { %4103 = vmatmul.msk.f32.gmra.mxu2 %vm825_vm2, %v2517_v12  ;;  %v2456_v12 = vsel %vm721_vm0, %v6954_v47, %v7879_v38 }
 0x3f3   : > { %v2672_v23 = vpop.f32.mrf.mxu2  ;;  %2994 = vrot.lane.b32.xlu2 %v4271_v21, %s4423_s20  ;;  %3248 = vrot.lane.b32.xlu1 %v4272_v36, %s4425_s22 }
 0x3f4   : > { %v2673_v25 = vadd.f32 %v7088_v55, %v2672_v23  ;;  %2395 = vrot.lane.b32.xlu0 %v7234_v57, %s4425_s22 }
 0x3f5   : > { %v7265_v46 = vpop.permute.xlu2 %3108  ;;  %v3105_v34 = vpop.permute.xlu1 %3104 }
 0x3f6   : > { %4124 = vst.msk [vmem:[%s5449_s5 + $0x248] sm:$0xff] %vm721_vm0, %v2673_v25  ;;  %v2252_v59 = vpop.permute.xlu0 %2251  ;;  %v3339_v52 = vsel %vm754_vm1, %v3307_v0, %v3105_v34 }
 0x3f7   : > { %v2486_v3 = vsel %vm754_vm1, %v2454_v33, %v2252_v59 }
 0x3f8   : > { %v2518_v35 = vsel %vm787_vm3, %v2486_v3, %v2380_v24 }
 0x3f9   : > { %4104 = vmatmul.msk.f32.gmra.mxu2 %vm825_vm2, %v2518_v35 }
 0x3fb   : > { %v3525_v11 = vpop.f32.mrf.mxu3  ;;  %2397 = vrot.lane.b32.xlu2 %v4079_v7, %s4425_s22  ;;  %3122 = vrot.lane.b32.xlu1 %v4079_v7, %s4424_s21 }
 0x3fc   : > { %v3526_v31 = vadd.f32 %v7088_v55, %v3525_v11  ;;  %2269 = vrot.lane.b32.xlu0 %v4047_v17, %s4424_s21 }
 0x3fd   : > { %v7284_v24 = vpop.permute.xlu2 %2982  ;;  %v2979_v49 = vpop.permute.xlu1 %2978 }
 0x3fe   : > { %4318 = vst.msk [vmem:[%s5449_s5 + $0x348] sm:$0xff] %vm721_vm0, %v3526_v31  ;;  %v3233_v48 = vpop.permute.xlu0 %3232  ;;  %v3308_v61 = vsel %vm721_vm0, %v6905_v28, %v2979_v49 }
 0x3ff   : > { %v3371_v18 = vsel %vm787_vm3, %v3339_v52, %v3233_v48 }
 0x400   : > { %4298 = vmatmul.msk.f32.gmra.mxu3 %vm825_vm2, %v3371_v18 }
 0x403   : > { %v2675_v21 = vpop.f32.mrf.mxu2  ;;  %v3528_v1 = vpop.f32.mrf.mxu3  ;;  %2271 = vrot.lane.b32.xlu2 %v4048_v58, %s4424_s21  ;;  %2996 = vrot.lane.b32.xlu1 %v4272_v36, %s4423_s20 }
 0x404   : > { %v2676_v16 = vadd.f32 %v7088_v55, %v2675_v21  ;;  %v3529_v26 = vadd.f32 %v7088_v55, %v3528_v1  ;;  %3250 = vrot.lane.b32.xlu0 %v4273_v43, %s4425_s22 }
 0x405   : > { %v2382_v9 = vpop.permute.xlu1 %2381  ;;  %v2386_v13 = vpop.permute.xlu2 %2385 }
 0x406   : > { %4125 = vst.msk [vmem:[%s5449_s5 + $0x250] sm:$0xff] %vm721_vm0, %v2676_v16  ;;  %v3107_v14 = vpop.permute.xlu0 %3106  ;;  %v2519_v2 = vsel %vm787_vm3, %v2487_v42, %v2382_v9 }
 0x407   : > { %4319 = vst.msk [vmem:[%s5449_s5 + $0x350] sm:$0xff] %vm721_vm0, %v3529_v26  ;;  %v3340_v4 = vsel %vm754_vm1, %v3308_v61, %v3107_v14  ;;  %4105 = vmatmul.msk.f32.gmra.mxu2 %vm825_vm2, %v2519_v2 }
 0x408   : > { %v3372_v29 = vsel %vm787_vm3, %v3340_v4, %v3235_v45 }
 0x409   : > { %4299 = vmatmul.msk.f32.gmra.mxu3 %vm825_vm2, %v3372_v29 }
 0x40b   : > { %v2678_v28 = vpop.f32.mrf.mxu2  ;;  %2399 = vrot.lane.b32.xlu1 %v4080_v62, %s4425_s22  ;;  %3252 = vrot.lane.b32.xlu2 %v4274_v5, %s4425_s22 }
 0x40c   : > { %v2679_v50 = vadd.f32 %v7088_v55, %v2678_v28  ;;  %3124 = vrot.lane.b32.xlu0 %v4080_v62, %s4424_s21  ;;  %v3531_v60 = vpop.f32.mrf.mxu3  ;;  %v3979_v28 = vld [vmem:[%s4470_s19 + $0x150] sm:$0xff] }
 0x40d   : > { %v3532_v40 = vadd.f32 %v7088_v55, %v3531_v60  ;;  %v2256_v27 = vpop.permute.xlu1 %2255  ;;  %v2260_v41 = vpop.permute.xlu2 %2259 }
 0x40e   : > { %4126 = vst.msk [vmem:[%s5449_s5 + $0x258] sm:$0xff] %vm721_vm0, %v2679_v50  ;;  %v2981_v45 = vpop.permute.xlu0 %2980  ;;  %v2488_v25 = vsel %vm754_vm1, %v2456_v12, %v2256_v27  ;;  %v2490_v16 = vsel %vm754_vm1, %v2458_v54, %v2260_v41  ;;  %v7882_v27 = vld [vmem:[#allocation20_spill] sm:$0xff] }
 0x40f   : > { %4320 = vst.msk [vmem:[%s5449_s5 + $0x358] sm:$0xff] %vm721_vm0, %v3532_v40  ;;  %v3309_v10 = vsel %vm721_vm0, %v6951_v39, %v2981_v45  ;;  %v2459_v45 = vsel %vm721_vm0, %v3979_v28, %v7882_v27  ;;  %v3983_v27 = vld [vmem:[%s4470_s19 + $0x180] sm:$0xff] }
 0x410   : > { %v3341_v23 = vsel %vm754_vm1, %v3309_v10, %v7265_v46  ;;  %v7880_v46 = vld [vmem:[#allocation19_spill] sm:$0xff] }
 0x411   : > { %v2457_v35 = vsel %vm721_vm0, %v6983_v56, %v7880_v46  ;;  %v3310_v56 = vsel %vm721_vm0, %v7004_v30, %v7284_v24 }
 0x413   : > { %v2681_v22 = vpop.f32.mrf.mxu2 }
 0x414   : > { %v2682_v19 = vadd.f32 %v7088_v55, %v2681_v22 }
 0x415   : > { %v3237_v36 = vpop.permute.xlu1 %3236  ;;  %v3241_v33 = vpop.permute.xlu2 %3240 }
 0x416   : > { %4127 = vst.msk [vmem:[%s5449_s5 + $0x260] sm:$0xff] %vm721_vm0, %v2682_v19  ;;  %v2384_v34 = vpop.permute.xlu0 %2383  ;;  %v3373_v63 = vsel %vm787_vm3, %v3341_v23, %v3237_v36 }
 0x417   : > { %v2520_v39 = vsel %vm787_vm3, %v2488_v25, %v2384_v34  ;;  %4300 = vmatmul.msk.f32.gmra.mxu3 %vm825_vm2, %v3373_v63 }
 0x418   : > { %4106 = vmatmul.msk.f32.gmra.mxu2 %vm825_vm2, %v2520_v39  ;;  %v7883_v39 = vld [vmem:[#allocation44_spill] sm:$0xff] }
 0x41b   : > { %v3534_v59 = vpop.f32.mrf.mxu3 }
 0x41c   : > { %v3535_v47 = vadd.f32 %v7088_v55, %v3534_v59 }
 0x41d   : > { %v3111_v3 = vpop.permute.xlu1 %3110  ;;  %v3115_v49 = vpop.permute.xlu2 %3114 }
 0x41e   : > { %4321 = vst.msk [vmem:[%s5449_s5 + $0x360] sm:$0xff] %vm721_vm0, %v3535_v47  ;;  %v2258_v7 = vpop.permute.xlu0 %2257  ;;  %v3342_v58 = vsel %vm754_vm1, %v3310_v56, %v3111_v3 }
 0x41f   : > { %v2489_v17 = vsel %vm754_vm1, %v2457_v35, %v2258_v7 }
 0x420   : > { %v2521_v11 = vsel %vm787_vm3, %v2489_v17, %v2386_v13 }
 0x421   : > { %4107 = vmatmul.msk.f32.gmra.mxu2 %vm825_vm2, %v2521_v11 }
 0x423   : > { %v2684_v31 = vpop.f32.mrf.mxu2  ;;  %v3537_v0 = vpop.f32.mrf.mxu3 }
 0x424   : > { %v2685_v52 = vadd.f32 %v7088_v55, %v2684_v31  ;;  %v3538_v48 = vadd.f32 %v7088_v55, %v3537_v0 }
 0x425   : > { %v2985_v18 = vpop.permute.xlu1 %2984  ;;  %v2989_v9 = vpop.permute.xlu2 %2988 }
 0x426   : > { %4128 = vst.msk [vmem:[%s5449_s5 + $0x268] sm:$0xff] %vm721_vm0, %v2685_v52  ;;  %v3239_v43 = vpop.permute.xlu0 %3238  ;;  %v3311_v61 = vsel %vm721_vm0, %v7022_v37, %v2985_v18  ;;  %v7884_v18 = vld [vmem:[#allocation75_spill] sm:$0xff] }
 0x427   : > { %4322 = vst.msk [vmem:[%s5449_s5 + $0x368] sm:$0xff] %vm721_vm0, %v3538_v48  ;;  %v3374_v21 = vsel %vm787_vm3, %v3342_v58, %v3239_v43  ;;  %v3981_v48 = vld [vmem:[%s4470_s19 + $0x168] sm:$0xff] }
 0x428   : > { %4301 = vmatmul.msk.f32.gmra.mxu3 %vm825_vm2, %v3374_v21 }
 0x42b   : > { %v2687_v1 = vpop.f32.mrf.mxu2 }
 0x42c   : > { %v2688_v30 = vadd.f32 %v7088_v55, %v2687_v1  ;;  %v3540_v24 = vpop.f32.mrf.mxu3 }
 0x42d   : > { %v3541_v26 = vadd.f32 %v7088_v55, %v3540_v24  ;;  %v2388_v42 = vpop.permute.xlu1 %2387  ;;  %v2392_v5 = vpop.permute.xlu2 %2391 }
 0x42e   : > { %4129 = vst.msk [vmem:[%s5449_s5 + $0x270] sm:$0xff] %vm721_vm0, %v2688_v30  ;;  %v2522_v13 = vsel %vm787_vm3, %v2490_v16, %v2388_v42  ;;  %v3113_v14 = vpop.permute.xlu0 %3112 }
 0x42f   : > { %4323 = vst.msk [vmem:[%s5449_s5 + $0x370] sm:$0xff] %vm721_vm0, %v3541_v26  ;;  %v3343_v51 = vsel %vm754_vm1, %v3311_v61, %v3113_v14  ;;  %4108 = vmatmul.msk.f32.gmra.mxu2 %vm825_vm2, %v2522_v13  ;;  %v3982_v13 = vld [vmem:[%s4470_s19 + $0x170] sm:$0xff] }
 0x430   : > { %v3375_v2 = vsel %vm787_vm3, %v3343_v51, %v3241_v33  ;;  %v2460_v33 = vsel %vm721_vm0, %v7101_v15, %v7883_v39  ;;  %v3313_v15 = vsel %vm721_vm0, %v7117_v32, %v2989_v9  ;;  %v2461_v32 = vsel %vm721_vm0, %v3981_v48, %v7884_v18 }
 0x431   : > { %4302 = vmatmul.msk.f32.gmra.mxu3 %vm825_vm2, %v3375_v2 }
 0x433   : > { %v2690_v4 = vpop.f32.mrf.mxu2 }
 0x434   : > { %v2691_v29 = vadd.f32 %v7088_v55, %v2690_v4 }
 0x435   : > { %v2262_v37 = vpop.permute.xlu1 %2261  ;;  %v2266_v12 = vpop.permute.xlu2 %2265 }
 0x436   : > { %4130 = vst.msk [vmem:[%s5449_s5 + $0x278] sm:$0xff] %vm721_vm0, %v2691_v29  ;;  %v2987_v62 = vpop.permute.xlu0 %2986  ;;  %v2491_v22 = vsel %vm754_vm1, %v2459_v45, %v2262_v37  ;;  %v2493_v43 = vsel %vm754_vm1, %v2461_v32, %v2266_v12  ;;  %v7885_v29 = vld [vmem:[#allocation13_spill] sm:$0xff] }
 0x437   : > { %v3312_v50 = vsel %vm721_vm0, %v7075_v8, %v2987_v62  ;;  %v2462_v37 = vsel %vm721_vm0, %v3982_v13, %v7885_v29 }
 0x438   : > { %v3344_v10 = vsel %vm754_vm1, %v3312_v50, %v3115_v49 }
 0x43b   : > { %v3543_v60 = vpop.f32.mrf.mxu3 }
 0x43c   : > { %v3544_v40 = vadd.f32 %v7088_v55, %v3543_v60 }
 0x43d   : > { %v3243_v41 = vpop.permute.xlu1 %3242  ;;  %v3247_v17 = vpop.permute.xlu2 %3246 }
 0x43e   : > { %4324 = vst.msk [vmem:[%s5449_s5 + $0x378] sm:$0xff] %vm721_vm0, %v3544_v40  ;;  %v3376_v19 = vsel %vm787_vm3, %v3344_v10, %v3243_v41  ;;  %v2390_v38 = vpop.permute.xlu0 %2389  ;;  %v7886_v10 = vld [vmem:[#allocation34_spill] sm:$0xff] }
 0x43f   : > { %v2523_v8 = vsel %vm787_vm3, %v2491_v22, %v2390_v38  ;;  %4303 = vmatmul.msk.f32.gmra.mxu3 %vm825_vm2, %v3376_v19  ;;  %v2463_v22 = vsel %vm721_vm0, %v3983_v27, %v7886_v10 }
 0x440   : > { %4109 = vmatmul.msk.f32.gmra.mxu2 %vm825_vm2, %v2523_v8 }
 0x443   : > { %v2693_v36 = vpop.f32.mrf.mxu2  ;;  %v3546_v23 = vpop.f32.mrf.mxu3 }
 0x444   : > { %v2694_v25 = vadd.f32 %v7088_v55, %v2693_v36  ;;  %v3547_v34 = vadd.f32 %v7088_v55, %v3546_v23 }
 0x445   : > { %v3117_v63 = vpop.permute.xlu1 %3116  ;;  %v3121_v30 = vpop.permute.xlu2 %3120 }
 0x446   : > { %4131 = vst.msk [vmem:[%s5449_s5 + $0x280] sm:$0xff] %vm721_vm0, %v2694_v25  ;;  %v2264_v59 = vpop.permute.xlu0 %2263  ;;  %v3345_v0 = vsel %vm754_vm1, %v3313_v15, %v3117_v63 }
 0x447   : > { %4325 = vst.msk [vmem:[%s5449_s5 + $0x380] sm:$0xff] %vm721_vm0, %v3547_v34  ;;  %v2492_v47 = vsel %vm754_vm1, %v2460_v33, %v2264_v59 }
 0x448   : > { %v2524_v3 = vsel %vm787_vm3, %v2492_v47, %v2392_v5 }
 0x449   : > { %4110 = vmatmul.msk.f32.gmra.mxu2 %vm825_vm2, %v2524_v3  ;;  %v3984_v3 = vld [vmem:[%s4470_s19 + $0x188] sm:$0xff] }
 0x44b   : > { %v2696_v46 = vpop.f32.mrf.mxu2 }
 0x44c   : > { %v2697_v35 = vadd.f32 %v7088_v55, %v2696_v46  ;;  %v3549_v7 = vpop.f32.mrf.mxu3  ;;  %v7887_v46 = vld [vmem:[#allocation76_spill] sm:$0xff] }
 0x44d   : > { %v3550_v11 = vadd.f32 %v7088_v55, %v3549_v7  ;;  %v2991_v31 = vpop.permute.xlu1 %2990  ;;  %v2995_v61 = vpop.permute.xlu2 %2994 }
 0x44e   : > { %4132 = vst.msk [vmem:[%s5449_s5 + $0x288] sm:$0xff] %vm721_vm0, %v2697_v35  ;;  %v3245_v49 = vpop.permute.xlu0 %3244  ;;  %v3314_v1 = vsel %vm721_vm0, %v7139_v20, %v2991_v31  ;;  %v3316_v34 = vsel %vm721_vm0, %v7217_v6, %v2995_v61  ;;  %v2464_v35 = vsel %vm721_vm0, %v3984_v3, %v7887_v46 }
 0x44f   : > { %4326 = vst.msk [vmem:[%s5449_s5 + $0x388] sm:$0xff] %vm721_vm0, %v3550_v11  ;;  %v3377_v52 = vsel %vm787_vm3, %v3345_v0, %v3245_v49 }
 0x450   : > { %4304 = vmatmul.msk.f32.gmra.mxu3 %vm825_vm2, %v3377_v52 }
 0x453   : > { %v2699_v56 = vpop.f32.mrf.mxu2 }
 0x454   : > { %v2700_v58 = vadd.f32 %v7088_v55, %v2699_v56 }
 0x455   : > { %v2394_v21 = vpop.permute.xlu1 %2393  ;;  %v2398_v45 = vpop.permute.xlu2 %2397 }
 0x456   : > { %4133 = vst.msk [vmem:[%s5449_s5 + $0x290] sm:$0xff] %vm721_vm0, %v2700_v58  ;;  %v2525_v53 = vsel %vm787_vm3, %v2493_v43, %v2394_v21  ;;  %v3119_v54 = vpop.permute.xlu0 %3118 }
 0x457   : > { %v3346_v24 = vsel %vm754_vm1, %v3314_v1, %v3119_v54  ;;  %4111 = vmatmul.msk.f32.gmra.mxu2 %vm825_vm2, %v2525_v53 }
 0x458   : > { %v3378_v16 = vsel %vm787_vm3, %v3346_v24, %v3247_v17 }
 0x459   : > { %4305 = vmatmul.msk.f32.gmra.mxu3 %vm825_vm2, %v3378_v16 }
 0x45b   : > { %v3552_v26 = vpop.f32.mrf.mxu3 }
 0x45c   : > { %v3553_v42 = vadd.f32 %v7088_v55, %v3552_v26 }
 0x45d   : > { %v2268_v9 = vpop.permute.xlu1 %2267  ;;  %v2272_v63 = vpop.permute.xlu2 %2271 }
 0x45e   : > { %4327 = vst.msk [vmem:[%s5449_s5 + $0x390] sm:$0xff] %vm721_vm0, %v3553_v42  ;;  %v2993_v20 = vpop.permute.xlu0 %2992  ;;  %v2494_v50 = vsel %vm754_vm1, %v2462_v37, %v2268_v9  ;;  %v2496_v7 = vsel %vm754_vm1, %v2464_v35, %v2272_v63 }
 0x45f   : > { %v3315_v14 = vsel %vm721_vm0, %v7178_v44, %v2993_v20 }
 0x460   : > { %v3347_v28 = vsel %vm754_vm1, %v3315_v14, %v3121_v30 }
 0x462   : > { %v2702_v51 = vpop.f32.mrf.mxu2 }
 0x463   : > { %v2703_v2 = vadd.f32 %v7088_v55, %v2702_v51 }
 0x464   : > { %v3555_v4 = vpop.f32.mrf.mxu3 }
 0x465   : > { %4134 = vst.msk [vmem:[%s5449_s5 + $0x298] sm:$0xff] %vm721_vm0, %v2703_v2  ;;  %v3556_v62 = vadd.f32 %v7088_v55, %v3555_v4  ;;  %v3249_v5 = vpop.permute.xlu1 %3248  ;;  %v3253_v11 = vpop.permute.xlu2 %3252 }
 0x466   : > { %v3379_v60 = vsel %vm787_vm3, %v3347_v28, %v3249_v5  ;;  %v2396_v44 = vpop.permute.xlu0 %2395 }
 0x467   : > { %4328 = vst.msk [vmem:[%s5449_s5 + $0x398] sm:$0xff] %vm721_vm0, %v3556_v62  ;;  %v2526_v40 = vsel %vm787_vm3, %v2494_v50, %v2396_v44  ;;  %4306 = vmatmul.msk.f32.gmra.mxu3 %vm825_vm2, %v3379_v60 }
 0x468   : > { %4112 = vmatmul.msk.f32.gmra.mxu2 %vm825_vm2, %v2526_v40 }
 0x46d   : > { %v3123_v41 = vpop.permute.xlu1 %3122 }
 0x46e   : > { %v2270_v19 = vpop.permute.xlu0 %2269  ;;  %v3348_v33 = vsel %vm754_vm1, %v3316_v34, %v3123_v41 }
 0x46f   : > { %v2495_v38 = vsel %vm754_vm1, %v2463_v22, %v2270_v19 }
 0x470   : > { %v2527_v8 = vsel %vm787_vm3, %v2495_v38, %v2398_v45 }
 0x471   : > { %4113 = vmatmul.msk.f32.gmra.mxu2 %vm825_vm2, %v2527_v8 }
 0x472   : > { %v3558_v12 = vpop.f32.mrf.mxu3 }
 0x473   : > { %v2705_v36 = vpop.f32.mrf.mxu2  ;;  %v3559_v23 = vadd.f32 %v7088_v55, %v3558_v12 }
 0x474   : > { %v2706_v25 = vadd.f32 %v7088_v55, %v2705_v36 }
 0x475   : > { %4329 = vst.msk [vmem:[%s5449_s5 + $0x3a0] sm:$0xff] %vm721_vm0, %v3559_v23  ;;  %v2997_v39 = vpop.permute.xlu1 %2996 }
 0x476   : > { %4135 = vst.msk [vmem:[%s5449_s5 + $0x2a0] sm:$0xff] %vm721_vm0, %v2706_v25  ;;  %v3251_v59 = vpop.permute.xlu0 %3250  ;;  %v3317_v31 = vsel %vm721_vm0, %v7234_v57, %v2997_v39 }
 0x477   : > { %v3380_v47 = vsel %vm787_vm3, %v3348_v33, %v3251_v59 }
 0x478   : > { %4307 = vmatmul.msk.f32.gmra.mxu3 %vm825_vm2, %v3380_v47 }
 0x47c   : > { %v2708_v6 = vpop.f32.mrf.mxu2 }
 0x47d   : > { %v2709_v15 = vadd.f32 %v7088_v55, %v2708_v6  ;;  %v2400_v17 = vpop.permute.xlu1 %2399 }
 0x47e   : > { %v2528_v0 = vsel %vm787_vm3, %v2496_v7, %v2400_v17  ;;  %v3125_v49 = vpop.permute.xlu0 %3124 }
 0x47f   : > { %4136 = vst.msk [vmem:[%s5449_s5 + $0x2a8] sm:$0xff] %vm721_vm0, %v2709_v15  ;;  %v3349_v52 = vsel %vm754_vm1, %v3317_v31, %v3125_v49  ;;  %4114 = vmatmul.msk.f32.gmra.mxu2 %vm825_vm2, %v2528_v0 }
 0x480   : > { %v3381_v48 = vsel %vm787_vm3, %v3349_v52, %v3253_v11 }
 0x481   : > { %4308 = vmatmul.msk.f32.gmra.mxu3 %vm825_vm2, %v3381_v48 }
 0x483   : > { %v3561_v56 = vpop.f32.mrf.mxu3 }
 0x484   : > { %v3562_v18 = vadd.f32 %v7088_v55, %v3561_v56 }
 0x486   : > { %4330 = vst.msk [vmem:[%s5449_s5 + $0x3a8] sm:$0xff] %vm721_vm0, %v3562_v18 }
 0x48a   : > { %v2711_v57 = vpop.f32.mrf.mxu2 }
 0x48b   : > { %v2712_v32 = vadd.f32 %v7088_v55, %v2711_v57 }
 0x48c   : > { %v3564_v58 = vpop.f32.mrf.mxu3 }
 0x48d   : > { %4137 = vst.msk [vmem:[%s5449_s5 + $0x2b0] sm:$0xff] %vm721_vm0, %v2712_v32  ;;  %v3565_v43 = vadd.f32 %v7088_v55, %v3564_v58 }
 0x48f   : > { %4331 = vst.msk [vmem:[%s5449_s5 + $0x3b0] sm:$0xff] %vm721_vm0, %v3565_v43 }
 0x49a   : > { %v3567_v21 = vpop.f32.mrf.mxu3 }
 0x49b   : > { %v2714_v1 = vpop.f32.mrf.mxu2  ;;  %v3568_v53 = vadd.f32 %v7088_v55, %v3567_v21 }
 0x49c   : > { %v2715_v54 = vadd.f32 %v7088_v55, %v2714_v1 }
 0x49d   : > { %4332 = vst.msk [vmem:[%s5449_s5 + $0x3b8] sm:$0xff] %vm721_vm0, %v3568_v53 }
 0x49e   : > { %4138 = vst.msk [vmem:[%s5449_s5 + $0x2b8] sm:$0xff] %vm721_vm0, %v2715_v54 }
 0x4a4   : > { %v2717_v30 = vpop.f32.mrf.mxu2 }
 0x4a5   : > { %v2718_v24 = vadd.f32 %v7088_v55, %v2717_v30 }
 0x4a7   : > { %4139 = vst.msk [vmem:[%s5449_s5 + $0x2c0] sm:$0xff] %vm721_vm0, %v2718_v24 }
 0x4ab   : > { %v3570_v16 = vpop.f32.mrf.mxu3 }
 0x4ac   : > { %v3571_v26 = vadd.f32 %v7088_v55, %v3570_v16 }
 0x4ae   : > { %4333 = vst.msk [vmem:[%s5449_s5 + $0x3c0] sm:$0xff] %vm721_vm0, %v3571_v26 }
 0x4b2   : > { %v2720_v42 = vpop.f32.mrf.mxu2 }
 0x4b3   : > { %v2721_v9 = vadd.f32 %v7088_v55, %v2720_v42 }
 0x4b4   : > { %v3573_v20 = vpop.f32.mrf.mxu3 }
 0x4b5   : > { %4140 = vst.msk [vmem:[%s5449_s5 + $0x2c8] sm:$0xff] %vm721_vm0, %v2721_v9  ;;  %v3574_v61 = vadd.f32 %v7088_v55, %v3573_v20 }
 0x4b7   : > { %4334 = vst.msk [vmem:[%s5449_s5 + $0x3c8] sm:$0xff] %vm721_vm0, %v3574_v61 }
 0x4c2   : > { %v3576_v13 = vpop.f32.mrf.mxu3 }
 0x4c3   : > { %v2723_v14 = vpop.f32.mrf.mxu2  ;;  %v3577_v51 = vadd.f32 %v7088_v55, %v3576_v13 }
 0x4c4   : > { %v2724_v2 = vadd.f32 %v7088_v55, %v2723_v14 }
 0x4c5   : > { %4335 = vst.msk [vmem:[%s5449_s5 + $0x3d0] sm:$0xff] %vm721_vm0, %v3577_v51 }
 0x4c6   : > { %4141 = vst.msk [vmem:[%s5449_s5 + $0x2d0] sm:$0xff] %vm721_vm0, %v2724_v2 }
 0x4cc   : > { %v2726_v4 = vpop.f32.mrf.mxu2 }
 0x4cd   : > { %v2727_v29 = vadd.f32 %v7088_v55, %v2726_v4 }
 0x4cf   : > { %4142 = vst.msk [vmem:[%s5449_s5 + $0x2d8] sm:$0xff] %vm721_vm0, %v2727_v29 }
 0x4d3   : > { %v3579_v37 = vpop.f32.mrf.mxu3 }
 0x4d4   : > { %v3580_v62 = vadd.f32 %v7088_v55, %v3579_v37 }
 0x4d6   : > { %4336 = vst.msk [vmem:[%s5449_s5 + $0x3d8] sm:$0xff] %vm721_vm0, %v3580_v62 }
 0x4da   : > { %v2729_v5 = vpop.f32.mrf.mxu2 }
 0x4db   : > { %v2730_v28 = vadd.f32 %v7088_v55, %v2729_v5 }
 0x4dc   : > { %v3582_v50 = vpop.f32.mrf.mxu3 }
 0x4dd   : > { %4143 = vst.msk [vmem:[%s5449_s5 + $0x2e0] sm:$0xff] %vm721_vm0, %v2730_v28  ;;  %v3583_v60 = vadd.f32 %v7088_v55, %v3582_v50 }
 0x4df   : > { %4337 = vst.msk [vmem:[%s5449_s5 + $0x3e0] sm:$0xff] %vm721_vm0, %v3583_v60 }
 0x4ea   : > { %v3585_v44 = vpop.f32.mrf.mxu3 }
 0x4eb   : > { %v2732_v40 = vpop.f32.mrf.mxu2  ;;  %v3586_v27 = vadd.f32 %v7088_v55, %v3585_v44 }
 0x4ec   : > { %v2733_v45 = vadd.f32 %v7088_v55, %v2732_v40 }
 0x4ed   : > { %4338 = vst.msk [vmem:[%s5449_s5 + $0x3e8] sm:$0xff] %vm721_vm0, %v3586_v27 }
 0x4ee   : > { %4144 = vst.msk [vmem:[%s5449_s5 + $0x2e8] sm:$0xff] %vm721_vm0, %v2733_v45 }
 0x4f4   : > { %v2735_v41 = vpop.f32.mrf.mxu2 }
 0x4f5   : > { %v2736_v10 = vadd.f32 %v7088_v55, %v2735_v41 }
 0x4f7   : > { %4145 = vst.msk [vmem:[%s5449_s5 + $0x2f0] sm:$0xff] %vm721_vm0, %v2736_v10 }
 0x4fb   : > { %v3588_v22 = vpop.f32.mrf.mxu3 }
 0x4fc   : > { %v3589_v19 = vadd.f32 %v7088_v55, %v3588_v22 }
 0x4fe   : > { %4339 = vst.msk [vmem:[%s5449_s5 + $0x3f0] sm:$0xff] %vm721_vm0, %v3589_v19 }
 0x502   : > { %v2738_v38 = vpop.f32.mrf.mxu2 }
 0x503   : > { %v2739_v8 = vadd.f32 %v7088_v55, %v2738_v38 }
 0x504   : > { %v3591_v12 = vpop.f32.mrf.mxu3 }
 0x505   : > { %4146 = vst.msk [vmem:[%s5449_s5 + $0x2f8] sm:$0xff] %vm721_vm0, %v2739_v8  ;;  %v3592_v36 = vadd.f32 %v7088_v55, %v3591_v12 }
 0x507   : > { %4340 = vst.msk [vmem:[%s5449_s5 + $0x3f8] sm:$0xff] %vm721_vm0, %v3592_v36 }
 0x508 PF: > { %s13_s14 = sadd.s32 1, %s4421_s14   ;;  %s7888_s12 = smov %s4417_s13 }
 0x509   : > { %p10_p5 = scmp.ge.s32.totalorder %s13_s14, 4   ;;  %s7889_s13 = smov %s7891_s15 }
 0x50b   :  { %12 = sbr.rel (!%p10_p5) target bundleno = 2 (0x2), region = 70 }

</bundles_post_ra>
